<compile_context>
chip_gen: v7x
topology: tpu7x:2x2x1
jax: 0.10.0
libtpu: 0.0.40
codegen_flags: <defaults>
</compile_context>

<pallas_src>
import functools
import math

import jax
import jax.numpy as jnp
from jax import lax
from jax.experimental import pallas as pl
from jax.experimental.pallas import tpu as pltpu

LN_EPS = 1e-5


def _gelu_tanh(x):
    # TODO(synk): PyTorch nn.GELU() defaults to the exact erf form; the tanh
    # approximation is used here (EUP-friendly, numerically very close).
    c = math.sqrt(2.0 / math.pi)
    return 0.5 * x * (1.0 + jnp.tanh(c * (x + 0.044715 * x * x * x)))


def _layernorm(x, g, b):
    mean = jnp.mean(x, axis=-1, keepdims=True)
    xc = x - mean
    var = jnp.mean(xc * xc, axis=-1, keepdims=True)
    return xc * lax.rsqrt(var + LN_EPS) * g + b


# ------------- fused kernel: LN1+MHSA+res, LN2+MLP+res per row tile ----------

def _fused_block_kernel(x_ref, ln1g_ref, ln1b_ref, wq_ref, wk_ref, wv_ref,
                        wo_ref, ln2g_ref, ln2b_ref, w1_ref, b1_ref, w2_ref,
                        b2_ref, o_ref, *, n_heads, n_nodes):
    x = x_ref[...]                                    # (rows, C) f32, rows = bt*N
    rows, C = x.shape
    bt = rows // n_nodes
    dh = C // n_heads
    scale = 1.0 / math.sqrt(dh)

    # ---- LN1 (f32 VPU math); bf16 operand for the MXU ----
    h = _layernorm(x, ln1g_ref[...], ln1b_ref[...])
    hb = h.astype(jnp.bfloat16)

    # ---- fat Q/K/V projections: three full K=C matmuls, f32 accumulation ----
    q = jnp.dot(hb, wq_ref[...], preferred_element_type=jnp.float32)
    k = jnp.dot(hb, wk_ref[...], preferred_element_type=jnp.float32)
    v = jnp.dot(hb, wv_ref[...], preferred_element_type=jnp.float32)
    q3 = q.astype(jnp.bfloat16).reshape(bt, n_nodes, C)   # leading-dim split
    k3 = k.astype(jnp.bfloat16).reshape(bt, n_nodes, C)
    v3 = v.astype(jnp.bfloat16).reshape(bt, n_nodes, C)

    # ---- per-head attention over the node axis, batched over the bt tile ----
    head_outs = []
    for hd in range(n_heads):                         # static loop; temporaries
        lo = hd * dh                                  # consumed immediately
        qh = q3[:, :, lo:lo + dh]
        kh = k3[:, :, lo:lo + dh]
        vh = v3[:, :, lo:lo + dh]
        s = jnp.einsum('bnd,bmd->bnm', qh, kh,
                       preferred_element_type=jnp.float32) * scale  # (bt, N, N)
        s = s - jnp.max(s, axis=-1, keepdims=True)
        p = jnp.exp(s)
        p = p * pl.reciprocal(jnp.sum(p, axis=-1, keepdims=True), approx=True)
        # TODO(synk): attention-weight dropout (p=0.1) is identity (eval mode).
        head_outs.append(jnp.einsum('bnm,bmd->bnd', p.astype(jnp.bfloat16), vh,
                                    preferred_element_type=jnp.float32))

    attn = jnp.concatenate(head_outs, axis=-1)        # (bt, N, C) head concat
    attn2 = attn.reshape(rows, C).astype(jnp.bfloat16)
    y = jnp.dot(attn2, wo_ref[...],
                preferred_element_type=jnp.float32)   # single K=C out_proj
    x1 = x + y                                        # residual 1 (f32)

    # ---- LN2 + MLP (fc1 -> GELU -> fc2) + residual ----
    h2 = _layernorm(x1, ln2g_ref[...], ln2b_ref[...]).astype(jnp.bfloat16)
    m = jnp.dot(h2, w1_ref[...], preferred_element_type=jnp.float32) + b1_ref[...]
    m = _gelu_tanh(m).astype(jnp.bfloat16)
    # TODO(synk): MLP dropout (p=0.0) is identity.
    y2 = jnp.dot(m, w2_ref[...], preferred_element_type=jnp.float32) + b2_ref[...]
    o_ref[...] = x1 + y2                              # residual 2


def _pick_bt_tile(bt_total, n_nodes, target_rows=512):
    """Largest divisor of B*T whose row tile (bt*N) stays <= target_rows, while
    keeping >=2 grid steps so v7x's two TensorCores both get work."""
    best = 1
    for t in range(1, bt_total + 1):
        if bt_total % t:
            continue
        rows = t * n_nodes
        if rows % 8 and t != bt_total:          # (8,128) block constraint
            continue
        if rows <= target_rows:
            best = t
    if bt_total // best < 2:                    # keep the grid shardable (v7x)
        for t in range(best - 1, 0, -1):
            if bt_total % t == 0 and bt_total // t >= 2 and (t * n_nodes) % 8 == 0:
                best = t
                break
    if (best * n_nodes) % 8 and best != bt_total:
        best = bt_total
    return best


def transformer_block_node_self_forward(x, params, n_heads):
    """x: (B, T, N, C) -> (B, T, N, C).  regular_forward (proj_n=None)."""
    B, T, N, C = x.shape
    assert C % n_heads == 0
    BT = B * T
    mid = params['mlp_w1'].shape[1]

    # bf16 weights for the MXU (halves weight DMA and resident VMEM); LN
    # params and biases stay f32.  Q/K/V weights are pre-split so the kernel
    # never slices a 3C-wide slab.
    wq = params['w_qkv'][:, :C].astype(jnp.bfloat16)
    wk = params['w_qkv'][:, C:2 * C].astype(jnp.bfloat16)
    wv = params['w_qkv'][:, 2 * C:].astype(jnp.bfloat16)
    wo = params['w_out'].astype(jnp.bfloat16)
    w1 = params['mlp_w1'].astype(jnp.bfloat16)
    w2 = params['mlp_w2'].astype(jnp.bfloat16)

    bt_tile = _pick_bt_tile(BT, N)
    rows_tile = bt_tile * N
    grid = (BT // bt_tile,)

    x2 = x.reshape(BT * N, C)

    cost = pl.CostEstimate(
        flops=int(BT * N * (8 * C * C + 4 * N * C + 4 * C * mid)),
        transcendentals=int(BT * N * (n_heads * N + mid)),
        bytes_accessed=int(4 * 2 * BT * N * C + 2 * (4 * C * C + 2 * C * mid)
                           + 4 * (5 * C + mid)),
    )

    def wspec(shape):                                  # resident (constant map)
        return pl.BlockSpec(shape, lambda i: (0, 0))

    out = pl.pallas_call(
        functools.partial(_fused_block_kernel, n_heads=n_heads, n_nodes=N),
        out_shape=jax.ShapeDtypeStruct((BT * N, C), jnp.float32),
        grid=grid,
        in_specs=[
            pl.BlockSpec((rows_tile, C), lambda i: (i, 0)),   # x row tile
            wspec((1, C)), wspec((1, C)),                     # ln1 gamma/beta
            wspec((C, C)), wspec((C, C)), wspec((C, C)),      # Wq, Wk, Wv
            wspec((C, C)),                                    # Wout
            wspec((1, C)), wspec((1, C)),                     # ln2 gamma/beta
            wspec((C, mid)), wspec((1, mid)),                 # W1, b1
            wspec((mid, C)), wspec((1, C)),                   # W2, b2
        ],
        out_specs=pl.BlockSpec((rows_tile, C), lambda i: (i, 0)),
        compiler_params=pltpu.CompilerParams(
            dimension_semantics=("parallel",),
            vmem_limit_bytes=32 * 1024 * 1024),
        cost_estimate=cost,
    )(x2, params['ln1_g'], params['ln1_b'], wq, wk, wv, wo,
      params['ln2_g'], params['ln2_b'], w1, params['mlp_b1'], w2,
      params['mlp_b2'])
    return out.reshape(B, T, N, C)


# ------------------------------ Pure-JAX reference ---------------------------

def _reference_forward(x, params, n_heads):
    B, T, N, C = x.shape
    dh = C // n_heads

    def ln(v, g, b):
        mu = jnp.mean(v, axis=-1, keepdims=True)
        var = jnp.mean((v - mu) ** 2, axis=-1, keepdims=True)
        return (v - mu) * lax.rsqrt(var + LN_EPS) * g + b

    xr = x.reshape(B * T, N, C)
    h = ln(xr, params['ln1_g'][0], params['ln1_b'][0])
    qkv = h @ params['w_qkv']
    q, k, v = qkv[..., :C], qkv[..., C:2 * C], qkv[..., 2 * C:]

    def split(z):
        return z.reshape(B * T, N, n_heads, dh).transpose(0, 2, 1, 3)

    q, k, v = split(q), split(k), split(v)
    s = jnp.einsum('bhnd,bhmd->bhnm', q, k) / math.sqrt(dh)
    p = jax.nn.softmax(s, axis=-1)
    o = jnp.einsum('bhnm,bhmd->bhnd', p, v)
    o = o.transpose(0, 2, 1, 3).reshape(B * T, N, C)
    x1 = xr + o @ params['w_out']
    h2 = ln(x1, params['ln2_g'][0], params['ln2_b'][0])
    m = jax.nn.gelu(h2 @ params['mlp_w1'] + params['mlp_b1'][0], approximate=True)
    out = x1 + m @ params['mlp_w2'] + params['mlp_b2'][0]
    return out.reshape(B, T, N, C)


# ------------------------------ Param init -----------------------------------

def init_params(key, C, mlp_scale=4):
    mid = mlp_scale * C
    ks = jax.random.split(key, 4)

    def nrm(k, shape, sc):
        return sc * jax.random.normal(k, shape, jnp.float32)

    return dict(
        ln1_g=jnp.ones((1, C), jnp.float32), ln1_b=jnp.zeros((1, C), jnp.float32),
        ln2_g=jnp.ones((1, C), jnp.float32), ln2_b=jnp.zeros((1, C), jnp.float32),
        # nn.MultiheadAttention(bias=False): x @ Wqkv (cols = [Q|K|V]), attn @ Wout
        # (PyTorch checkpoints store the transpose; transpose when loading).
        w_qkv=nrm(ks[0], (C, 3 * C), 0.1),
        w_out=nrm(ks[1], (C, C), 0.1),
        # MLP: Linear(C, 4C) -> GELU -> Dropout -> Linear(4C, C) (kaiming-style)
        mlp_w1=nrm(ks[2], (C, mid), math.sqrt(2.0 / C)),
        mlp_b1=jnp.zeros((1, mid), jnp.float32),
        mlp_w2=nrm(ks[3], (mid, C), math.sqrt(2.0 / mid)),
        mlp_b2=jnp.zeros((1, C), jnp.float32),
    )


if __name__ == "__main__":
    key = jax.random.PRNGKey(0)
    kx, kp = jax.random.split(key)
    B, T, N, C, H = 2, 4, 16, 64, 8
    x = jax.random.normal(kx, (B, T, N, C), jnp.float32)
    params = init_params(kp, C)

    fwd = jax.jit(functools.partial(transformer_block_node_self_forward, n_heads=H))
    out = fwd(x, params)
    jax.block_until_ready(out)

    assert out.shape == (B, T, N, C)
    assert bool(jnp.all(jnp.isfinite(out)))

    ref = _reference_forward(x, params, H)
    max_err = float(jnp.max(jnp.abs(out - ref)))
    tol = 2e-2 * float(jnp.max(jnp.abs(ref))) + 5e-2   # bf16-operand matmul drift
    assert max_err < tol, f"mismatch vs reference: {max_err} (tol {tol})"
    print("KERNEL_OK")
</pallas_src>

<mosaic_0001>
module attributes {stable_mosaic.version = 11 : i64} {
  func.func @_fused_block_kernel(%arg0: i32, %arg1: memref<64x64xf32, #tpu.memory_space<vmem>>, %arg2: memref<1x64xf32, #tpu.memory_space<vmem>>, %arg3: memref<1x64xf32, #tpu.memory_space<vmem>>, %arg4: memref<64x64xbf16, #tpu.memory_space<vmem>>, %arg5: memref<64x64xbf16, #tpu.memory_space<vmem>>, %arg6: memref<64x64xbf16, #tpu.memory_space<vmem>>, %arg7: memref<64x64xbf16, #tpu.memory_space<vmem>>, %arg8: memref<1x64xf32, #tpu.memory_space<vmem>>, %arg9: memref<1x64xf32, #tpu.memory_space<vmem>>, %arg10: memref<64x256xbf16, #tpu.memory_space<vmem>>, %arg11: memref<1x256xf32, #tpu.memory_space<vmem>>, %arg12: memref<256x64xbf16, #tpu.memory_space<vmem>>, %arg13: memref<1x64xf32, #tpu.memory_space<vmem>>, %arg14: memref<64x64xf32, #tpu.memory_space<vmem>>) attributes {dimension_semantics = [#tpu.dimension_semantics<parallel>], iteration_bounds = array<i64: 2>, scalar_prefetch = 0 : i64, scratch_operands = 0 : i64, tpu.core_type = #tpu.core_type<tc>, window_params = [{transform_indices = @transform_0, window_bounds = array<i64: 64, 64>}, {pipeline_mode = #tpu.pipeline_mode<synchronous>, transform_indices = @transform_1, window_bounds = array<i64: 1, 64>}, {pipeline_mode = #tpu.pipeline_mode<synchronous>, transform_indices = @transform_2, window_bounds = array<i64: 1, 64>}, {pipeline_mode = #tpu.pipeline_mode<synchronous>, transform_indices = @transform_3, window_bounds = array<i64: 64, 64>}, {pipeline_mode = #tpu.pipeline_mode<synchronous>, transform_indices = @transform_4, window_bounds = array<i64: 64, 64>}, {pipeline_mode = #tpu.pipeline_mode<synchronous>, transform_indices = @transform_5, window_bounds = array<i64: 64, 64>}, {pipeline_mode = #tpu.pipeline_mode<synchronous>, transform_indices = @transform_6, window_bounds = array<i64: 64, 64>}, {pipeline_mode = #tpu.pipeline_mode<synchronous>, transform_indices = @transform_7, window_bounds = array<i64: 1, 64>}, {pipeline_mode = #tpu.pipeline_mode<synchronous>, transform_indices = @transform_8, window_bounds = array<i64: 1, 64>}, {pipeline_mode = #tpu.pipeline_mode<synchronous>, transform_indices = @transform_9, window_bounds = array<i64: 64, 256>}, {pipeline_mode = #tpu.pipeline_mode<synchronous>, transform_indices = @transform_10, window_bounds = array<i64: 1, 256>}, {pipeline_mode = #tpu.pipeline_mode<synchronous>, transform_indices = @transform_11, window_bounds = array<i64: 256, 64>}, {pipeline_mode = #tpu.pipeline_mode<synchronous>, transform_indices = @transform_12, window_bounds = array<i64: 1, 64>}, {transform_indices = @transform_13, window_bounds = array<i64: 64, 64>}]} {
    %c0 = arith.constant 0 : index
    %c0_0 = arith.constant 0 : index
    %0 = vector.load %arg1[%c0, %c0_0] : memref<64x64xf32, #tpu.memory_space<vmem>>, vector<64x64xf32>
    %c0_1 = arith.constant 0 : index
    %c0_2 = arith.constant 0 : index
    %1 = vector.load %arg2[%c0_1, %c0_2] : memref<1x64xf32, #tpu.memory_space<vmem>>, vector<1x64xf32>
    %c0_3 = arith.constant 0 : index
    %c0_4 = arith.constant 0 : index
    %2 = vector.load %arg3[%c0_3, %c0_4] : memref<1x64xf32, #tpu.memory_space<vmem>>, vector<1x64xf32>
    %cst = arith.constant dense<0.000000e+00> : vector<64xf32>
    %3 = vector.multi_reduction <add>, %0, %cst [1] : vector<64x64xf32> to vector<64xf32>
    %4 = vector.shape_cast %3 : vector<64xf32> to vector<64x1xf32>
    %cst_5 = arith.constant 6.400000e+01 : f32
    %5 = vector.broadcast %cst_5 : f32 to vector<64x1xf32>
    %6 = arith.divf %4, %5 : vector<64x1xf32>
    %7 = vector.broadcast %6 : vector<64x1xf32> to vector<64x64xf32>
    %8 = arith.subf %0, %7 : vector<64x64xf32>
    %9 = arith.mulf %8, %8 : vector<64x64xf32>
    %cst_6 = arith.constant dense<0.000000e+00> : vector<64xf32>
    %10 = vector.multi_reduction <add>, %9, %cst_6 [1] : vector<64x64xf32> to vector<64xf32>
    %11 = vector.shape_cast %10 : vector<64xf32> to vector<64x1xf32>
    %cst_7 = arith.constant 6.400000e+01 : f32
    %12 = vector.broadcast %cst_7 : f32 to vector<64x1xf32>
    %13 = arith.divf %11, %12 : vector<64x1xf32>
    %cst_8 = arith.constant 9.99999974E-6 : f32
    %14 = vector.broadcast %cst_8 : f32 to vector<64x1xf32>
    %15 = arith.addf %13, %14 : vector<64x1xf32>
    %16 = math.rsqrt %15 : vector<64x1xf32>
    %17 = vector.broadcast %16 : vector<64x1xf32> to vector<64x64xf32>
    %18 = arith.mulf %8, %17 : vector<64x64xf32>
    %19 = vector.broadcast %1 : vector<1x64xf32> to vector<64x64xf32>
    %20 = arith.mulf %18, %19 : vector<64x64xf32>
    %21 = vector.broadcast %2 : vector<1x64xf32> to vector<64x64xf32>
    %22 = arith.addf %20, %21 : vector<64x64xf32>
    %23 = arith.truncf %22 : vector<64x64xf32> to vector<64x64xbf16>
    %c0_9 = arith.constant 0 : index
    %c0_10 = arith.constant 0 : index
    %24 = vector.load %arg4[%c0_9, %c0_10] : memref<64x64xbf16, #tpu.memory_space<vmem>>, vector<64x64xbf16>
    %cst_11 = arith.constant dense<0.000000e+00> : vector<64x64xf32>
    %25 = tpu.matmul %23, %24, %cst_11 {dimension_numbers = #tpu.dot_dimension_numbers<[1], [0], [0], [1], [0, 0, 1, 1], [], []>} : vector<64x64xbf16>, vector<64x64xbf16>, vector<64x64xf32> -> vector<64x64xf32>
    %c0_12 = arith.constant 0 : index
    %c0_13 = arith.constant 0 : index
    %26 = vector.load %arg5[%c0_12, %c0_13] : memref<64x64xbf16, #tpu.memory_space<vmem>>, vector<64x64xbf16>
    %cst_14 = arith.constant dense<0.000000e+00> : vector<64x64xf32>
    %27 = tpu.matmul %23, %26, %cst_14 {dimension_numbers = #tpu.dot_dimension_numbers<[1], [0], [0], [1], [0, 0, 1, 1], [], []>} : vector<64x64xbf16>, vector<64x64xbf16>, vector<64x64xf32> -> vector<64x64xf32>
    %c0_15 = arith.constant 0 : index
    %c0_16 = arith.constant 0 : index
    %28 = vector.load %arg6[%c0_15, %c0_16] : memref<64x64xbf16, #tpu.memory_space<vmem>>, vector<64x64xbf16>
    %cst_17 = arith.constant dense<0.000000e+00> : vector<64x64xf32>
    %29 = tpu.matmul %23, %28, %cst_17 {dimension_numbers = #tpu.dot_dimension_numbers<[1], [0], [0], [1], [0, 0, 1, 1], [], []>} : vector<64x64xbf16>, vector<64x64xbf16>, vector<64x64xf32> -> vector<64x64xf32>
    %30 = arith.truncf %25 : vector<64x64xf32> to vector<64x64xbf16>
    %31 = vector.shape_cast %30 : vector<64x64xbf16> to vector<4x16x64xbf16>
    %32 = arith.truncf %27 : vector<64x64xf32> to vector<64x64xbf16>
    %33 = vector.shape_cast %32 : vector<64x64xbf16> to vector<4x16x64xbf16>
    %34 = arith.truncf %29 : vector<64x64xf32> to vector<64x64xbf16>
    %35 = vector.shape_cast %34 : vector<64x64xbf16> to vector<4x16x64xbf16>
    %36 = vector.extract_strided_slice %31 {offsets = [0, 0, 0], sizes = [4, 16, 8], strides = [1, 1, 1]} : vector<4x16x64xbf16> to vector<4x16x8xbf16>
    %37 = vector.extract_strided_slice %33 {offsets = [0, 0, 0], sizes = [4, 16, 8], strides = [1, 1, 1]} : vector<4x16x64xbf16> to vector<4x16x8xbf16>
    %38 = vector.extract_strided_slice %35 {offsets = [0, 0, 0], sizes = [4, 16, 8], strides = [1, 1, 1]} : vector<4x16x64xbf16> to vector<4x16x8xbf16>
    "tpu.trace_start"() <{level = 10 : i32, message = "bnd,bmd->bnm"}> : () -> ()
    %cst_18 = arith.constant dense<0.000000e+00> : vector<4x16x16xf32>
    %39 = tpu.matmul %36, %37, %cst_18 {dimension_numbers = #tpu.dot_dimension_numbers<[2], [2], [1], [1], [0, 0, 0, 1, 1, 1], [0], [0]>} : vector<4x16x8xbf16>, vector<4x16x8xbf16>, vector<4x16x16xf32> -> vector<4x16x16xf32>
    "tpu.trace_stop"() : () -> ()
    %cst_19 = arith.constant 0.353553385 : f32
    %40 = vector.broadcast %cst_19 : f32 to vector<4x16x16xf32>
    %41 = arith.mulf %39, %40 : vector<4x16x16xf32>
    %cst_20 = arith.constant dense<0xFF800000> : vector<4x16xf32>
    %42 = vector.multi_reduction <maximumf>, %41, %cst_20 [2] : vector<4x16x16xf32> to vector<4x16xf32>
    %43 = vector.shape_cast %42 : vector<4x16xf32> to vector<4x16x1xf32>
    %44 = vector.broadcast %43 : vector<4x16x1xf32> to vector<4x16x16xf32>
    %45 = arith.subf %41, %44 : vector<4x16x16xf32>
    %46 = math.exp %45 : vector<4x16x16xf32>
    %cst_21 = arith.constant dense<0.000000e+00> : vector<4x16xf32>
    %47 = vector.multi_reduction <add>, %46, %cst_21 [2] : vector<4x16x16xf32> to vector<4x16xf32>
    %48 = vector.shape_cast %47 : vector<4x16xf32> to vector<4x16x1xf32>
    %49 = tpu.reciprocal %48 {approx = true} : vector<4x16x1xf32> -> vector<4x16x1xf32>
    %50 = vector.broadcast %49 : vector<4x16x1xf32> to vector<4x16x16xf32>
    %51 = arith.mulf %46, %50 : vector<4x16x16xf32>
    %52 = arith.truncf %51 : vector<4x16x16xf32> to vector<4x16x16xbf16>
    "tpu.trace_start"() <{level = 10 : i32, message = "bnm,bmd->bnd"}> : () -> ()
    %cst_22 = arith.constant dense<0.000000e+00> : vector<4x16x8xf32>
    %53 = tpu.matmul %52, %38, %cst_22 {dimension_numbers = #tpu.dot_dimension_numbers<[2], [1], [1], [2], [0, 0, 0, 1, 1, 2], [0], [0]>} : vector<4x16x16xbf16>, vector<4x16x8xbf16>, vector<4x16x8xf32> -> vector<4x16x8xf32>
    "tpu.trace_stop"() : () -> ()
    %54 = vector.extract_strided_slice %31 {offsets = [0, 0, 8], sizes = [4, 16, 8], strides = [1, 1, 1]} : vector<4x16x64xbf16> to vector<4x16x8xbf16>
    %55 = vector.extract_strided_slice %33 {offsets = [0, 0, 8], sizes = [4, 16, 8], strides = [1, 1, 1]} : vector<4x16x64xbf16> to vector<4x16x8xbf16>
    %56 = vector.extract_strided_slice %35 {offsets = [0, 0, 8], sizes = [4, 16, 8], strides = [1, 1, 1]} : vector<4x16x64xbf16> to vector<4x16x8xbf16>
    "tpu.trace_start"() <{level = 10 : i32, message = "bnd,bmd->bnm"}> : () -> ()
    %cst_23 = arith.constant dense<0.000000e+00> : vector<4x16x16xf32>
    %57 = tpu.matmul %54, %55, %cst_23 {dimension_numbers = #tpu.dot_dimension_numbers<[2], [2], [1], [1], [0, 0, 0, 1, 1, 1], [0], [0]>} : vector<4x16x8xbf16>, vector<4x16x8xbf16>, vector<4x16x16xf32> -> vector<4x16x16xf32>
    "tpu.trace_stop"() : () -> ()
    %cst_24 = arith.constant 0.353553385 : f32
    %58 = vector.broadcast %cst_24 : f32 to vector<4x16x16xf32>
    %59 = arith.mulf %57, %58 : vector<4x16x16xf32>
    %cst_25 = arith.constant dense<0xFF800000> : vector<4x16xf32>
    %60 = vector.multi_reduction <maximumf>, %59, %cst_25 [2] : vector<4x16x16xf32> to vector<4x16xf32>
    %61 = vector.shape_cast %60 : vector<4x16xf32> to vector<4x16x1xf32>
    %62 = vector.broadcast %61 : vector<4x16x1xf32> to vector<4x16x16xf32>
    %63 = arith.subf %59, %62 : vector<4x16x16xf32>
    %64 = math.exp %63 : vector<4x16x16xf32>
    %cst_26 = arith.constant dense<0.000000e+00> : vector<4x16xf32>
    %65 = vector.multi_reduction <add>, %64, %cst_26 [2] : vector<4x16x16xf32> to vector<4x16xf32>
    %66 = vector.shape_cast %65 : vector<4x16xf32> to vector<4x16x1xf32>
    %67 = tpu.reciprocal %66 {approx = true} : vector<4x16x1xf32> -> vector<4x16x1xf32>
    %68 = vector.broadcast %67 : vector<4x16x1xf32> to vector<4x16x16xf32>
    %69 = arith.mulf %64, %68 : vector<4x16x16xf32>
    %70 = arith.truncf %69 : vector<4x16x16xf32> to vector<4x16x16xbf16>
    "tpu.trace_start"() <{level = 10 : i32, message = "bnm,bmd->bnd"}> : () -> ()
    %cst_27 = arith.constant dense<0.000000e+00> : vector<4x16x8xf32>
    %71 = tpu.matmul %70, %56, %cst_27 {dimension_numbers = #tpu.dot_dimension_numbers<[2], [1], [1], [2], [0, 0, 0, 1, 1, 2], [0], [0]>} : vector<4x16x16xbf16>, vector<4x16x8xbf16>, vector<4x16x8xf32> -> vector<4x16x8xf32>
    "tpu.trace_stop"() : () -> ()
    %72 = vector.extract_strided_slice %31 {offsets = [0, 0, 16], sizes = [4, 16, 8], strides = [1, 1, 1]} : vector<4x16x64xbf16> to vector<4x16x8xbf16>
    %73 = vector.extract_strided_slice %33 {offsets = [0, 0, 16], sizes = [4, 16, 8], strides = [1, 1, 1]} : vector<4x16x64xbf16> to vector<4x16x8xbf16>
    %74 = vector.extract_strided_slice %35 {offsets = [0, 0, 16], sizes = [4, 16, 8], strides = [1, 1, 1]} : vector<4x16x64xbf16> to vector<4x16x8xbf16>
    "tpu.trace_start"() <{level = 10 : i32, message = "bnd,bmd->bnm"}> : () -> ()
    %cst_28 = arith.constant dense<0.000000e+00> : vector<4x16x16xf32>
    %75 = tpu.matmul %72, %73, %cst_28 {dimension_numbers = #tpu.dot_dimension_numbers<[2], [2], [1], [1], [0, 0, 0, 1, 1, 1], [0], [0]>} : vector<4x16x8xbf16>, vector<4x16x8xbf16>, vector<4x16x16xf32> -> vector<4x16x16xf32>
    "tpu.trace_stop"() : () -> ()
    %cst_29 = arith.constant 0.353553385 : f32
    %76 = vector.broadcast %cst_29 : f32 to vector<4x16x16xf32>
    %77 = arith.mulf %75, %76 : vector<4x16x16xf32>
    %cst_30 = arith.constant dense<0xFF800000> : vector<4x16xf32>
    %78 = vector.multi_reduction <maximumf>, %77, %cst_30 [2] : vector<4x16x16xf32> to vector<4x16xf32>
    %79 = vector.shape_cast %78 : vector<4x16xf32> to vector<4x16x1xf32>
    %80 = vector.broadcast %79 : vector<4x16x1xf32> to vector<4x16x16xf32>
    %81 = arith.subf %77, %80 : vector<4x16x16xf32>
    %82 = math.exp %81 : vector<4x16x16xf32>
    %cst_31 = arith.constant dense<0.000000e+00> : vector<4x16xf32>
    %83 = vector.multi_reduction <add>, %82, %cst_31 [2] : vector<4x16x16xf32> to vector<4x16xf32>
    %84 = vector.shape_cast %83 : vector<4x16xf32> to vector<4x16x1xf32>
    %85 = tpu.reciprocal %84 {approx = true} : vector<4x16x1xf32> -> vector<4x16x1xf32>
    %86 = vector.broadcast %85 : vector<4x16x1xf32> to vector<4x16x16xf32>
    %87 = arith.mulf %82, %86 : vector<4x16x16xf32>
    %88 = arith.truncf %87 : vector<4x16x16xf32> to vector<4x16x16xbf16>
    "tpu.trace_start"() <{level = 10 : i32, message = "bnm,bmd->bnd"}> : () -> ()
    %cst_32 = arith.constant dense<0.000000e+00> : vector<4x16x8xf32>
    %89 = tpu.matmul %88, %74, %cst_32 {dimension_numbers = #tpu.dot_dimension_numbers<[2], [1], [1], [2], [0, 0, 0, 1, 1, 2], [0], [0]>} : vector<4x16x16xbf16>, vector<4x16x8xbf16>, vector<4x16x8xf32> -> vector<4x16x8xf32>
    "tpu.trace_stop"() : () -> ()
    %90 = vector.extract_strided_slice %31 {offsets = [0, 0, 24], sizes = [4, 16, 8], strides = [1, 1, 1]} : vector<4x16x64xbf16> to vector<4x16x8xbf16>
    %91 = vector.extract_strided_slice %33 {offsets = [0, 0, 24], sizes = [4, 16, 8], strides = [1, 1, 1]} : vector<4x16x64xbf16> to vector<4x16x8xbf16>
    %92 = vector.extract_strided_slice %35 {offsets = [0, 0, 24], sizes = [4, 16, 8], strides = [1, 1, 1]} : vector<4x16x64xbf16> to vector<4x16x8xbf16>
    "tpu.trace_start"() <{level = 10 : i32, message = "bnd,bmd->bnm"}> : () -> ()
    %cst_33 = arith.constant dense<0.000000e+00> : vector<4x16x16xf32>
    %93 = tpu.matmul %90, %91, %cst_33 {dimension_numbers = #tpu.dot_dimension_numbers<[2], [2], [1], [1], [0, 0, 0, 1, 1, 1], [0], [0]>} : vector<4x16x8xbf16>, vector<4x16x8xbf16>, vector<4x16x16xf32> -> vector<4x16x16xf32>
    "tpu.trace_stop"() : () -> ()
    %cst_34 = arith.constant 0.353553385 : f32
    %94 = vector.broadcast %cst_34 : f32 to vector<4x16x16xf32>
    %95 = arith.mulf %93, %94 : vector<4x16x16xf32>
    %cst_35 = arith.constant dense<0xFF800000> : vector<4x16xf32>
    %96 = vector.multi_reduction <maximumf>, %95, %cst_35 [2] : vector<4x16x16xf32> to vector<4x16xf32>
    %97 = vector.shape_cast %96 : vector<4x16xf32> to vector<4x16x1xf32>
    %98 = vector.broadcast %97 : vector<4x16x1xf32> to vector<4x16x16xf32>
    %99 = arith.subf %95, %98 : vector<4x16x16xf32>
    %100 = math.exp %99 : vector<4x16x16xf32>
    %cst_36 = arith.constant dense<0.000000e+00> : vector<4x16xf32>
    %101 = vector.multi_reduction <add>, %100, %cst_36 [2] : vector<4x16x16xf32> to vector<4x16xf32>
    %102 = vector.shape_cast %101 : vector<4x16xf32> to vector<4x16x1xf32>
    %103 = tpu.reciprocal %102 {approx = true} : vector<4x16x1xf32> -> vector<4x16x1xf32>
    %104 = vector.broadcast %103 : vector<4x16x1xf32> to vector<4x16x16xf32>
    %105 = arith.mulf %100, %104 : vector<4x16x16xf32>
    %106 = arith.truncf %105 : vector<4x16x16xf32> to vector<4x16x16xbf16>
    "tpu.trace_start"() <{level = 10 : i32, message = "bnm,bmd->bnd"}> : () -> ()
    %cst_37 = arith.constant dense<0.000000e+00> : vector<4x16x8xf32>
    %107 = tpu.matmul %106, %92, %cst_37 {dimension_numbers = #tpu.dot_dimension_numbers<[2], [1], [1], [2], [0, 0, 0, 1, 1, 2], [0], [0]>} : vector<4x16x16xbf16>, vector<4x16x8xbf16>, vector<4x16x8xf32> -> vector<4x16x8xf32>
    "tpu.trace_stop"() : () -> ()
    %108 = vector.extract_strided_slice %31 {offsets = [0, 0, 32], sizes = [4, 16, 8], strides = [1, 1, 1]} : vector<4x16x64xbf16> to vector<4x16x8xbf16>
    %109 = vector.extract_strided_slice %33 {offsets = [0, 0, 32], sizes = [4, 16, 8], strides = [1, 1, 1]} : vector<4x16x64xbf16> to vector<4x16x8xbf16>
    %110 = vector.extract_strided_slice %35 {offsets = [0, 0, 32], sizes = [4, 16, 8], strides = [1, 1, 1]} : vector<4x16x64xbf16> to vector<4x16x8xbf16>
    "tpu.trace_start"() <{level = 10 : i32, message = "bnd,bmd->bnm"}> : () -> ()
    %cst_38 = arith.constant dense<0.000000e+00> : vector<4x16x16xf32>
    %111 = tpu.matmul %108, %109, %cst_38 {dimension_numbers = #tpu.dot_dimension_numbers<[2], [2], [1], [1], [0, 0, 0, 1, 1, 1], [0], [0]>} : vector<4x16x8xbf16>, vector<4x16x8xbf16>, vector<4x16x16xf32> -> vector<4x16x16xf32>
    "tpu.trace_stop"() : () -> ()
    %cst_39 = arith.constant 0.353553385 : f32
    %112 = vector.broadcast %cst_39 : f32 to vector<4x16x16xf32>
    %113 = arith.mulf %111, %112 : vector<4x16x16xf32>
    %cst_40 = arith.constant dense<0xFF800000> : vector<4x16xf32>
    %114 = vector.multi_reduction <maximumf>, %113, %cst_40 [2] : vector<4x16x16xf32> to vector<4x16xf32>
    %115 = vector.shape_cast %114 : vector<4x16xf32> to vector<4x16x1xf32>
    %116 = vector.broadcast %115 : vector<4x16x1xf32> to vector<4x16x16xf32>
    %117 = arith.subf %113, %116 : vector<4x16x16xf32>
    %118 = math.exp %117 : vector<4x16x16xf32>
    %cst_41 = arith.constant dense<0.000000e+00> : vector<4x16xf32>
    %119 = vector.multi_reduction <add>, %118, %cst_41 [2] : vector<4x16x16xf32> to vector<4x16xf32>
    %120 = vector.shape_cast %119 : vector<4x16xf32> to vector<4x16x1xf32>
    %121 = tpu.reciprocal %120 {approx = true} : vector<4x16x1xf32> -> vector<4x16x1xf32>
    %122 = vector.broadcast %121 : vector<4x16x1xf32> to vector<4x16x16xf32>
    %123 = arith.mulf %118, %122 : vector<4x16x16xf32>
    %124 = arith.truncf %123 : vector<4x16x16xf32> to vector<4x16x16xbf16>
    "tpu.trace_start"() <{level = 10 : i32, message = "bnm,bmd->bnd"}> : () -> ()
    %cst_42 = arith.constant dense<0.000000e+00> : vector<4x16x8xf32>
    %125 = tpu.matmul %124, %110, %cst_42 {dimension_numbers = #tpu.dot_dimension_numbers<[2], [1], [1], [2], [0, 0, 0, 1, 1, 2], [0], [0]>} : vector<4x16x16xbf16>, vector<4x16x8xbf16>, vector<4x16x8xf32> -> vector<4x16x8xf32>
    "tpu.trace_stop"() : () -> ()
    %126 = vector.extract_strided_slice %31 {offsets = [0, 0, 40], sizes = [4, 16, 8], strides = [1, 1, 1]} : vector<4x16x64xbf16> to vector<4x16x8xbf16>
    %127 = vector.extract_strided_slice %33 {offsets = [0, 0, 40], sizes = [4, 16, 8], strides = [1, 1, 1]} : vector<4x16x64xbf16> to vector<4x16x8xbf16>
    %128 = vector.extract_strided_slice %35 {offsets = [0, 0, 40], sizes = [4, 16, 8], strides = [1, 1, 1]} : vector<4x16x64xbf16> to vector<4x16x8xbf16>
    "tpu.trace_start"() <{level = 10 : i32, message = "bnd,bmd->bnm"}> : () -> ()
    %cst_43 = arith.constant dense<0.000000e+00> : vector<4x16x16xf32>
    %129 = tpu.matmul %126, %127, %cst_43 {dimension_numbers = #tpu.dot_dimension_numbers<[2], [2], [1], [1], [0, 0, 0, 1, 1, 1], [0], [0]>} : vector<4x16x8xbf16>, vector<4x16x8xbf16>, vector<4x16x16xf32> -> vector<4x16x16xf32>
    "tpu.trace_stop"() : () -> ()
    %cst_44 = arith.constant 0.353553385 : f32
    %130 = vector.broadcast %cst_44 : f32 to vector<4x16x16xf32>
    %131 = arith.mulf %129, %130 : vector<4x16x16xf32>
    %cst_45 = arith.constant dense<0xFF800000> : vector<4x16xf32>
    %132 = vector.multi_reduction <maximumf>, %131, %cst_45 [2] : vector<4x16x16xf32> to vector<4x16xf32>
    %133 = vector.shape_cast %132 : vector<4x16xf32> to vector<4x16x1xf32>
    %134 = vector.broadcast %133 : vector<4x16x1xf32> to vector<4x16x16xf32>
    %135 = arith.subf %131, %134 : vector<4x16x16xf32>
    %136 = math.exp %135 : vector<4x16x16xf32>
    %cst_46 = arith.constant dense<0.000000e+00> : vector<4x16xf32>
    %137 = vector.multi_reduction <add>, %136, %cst_46 [2] : vector<4x16x16xf32> to vector<4x16xf32>
    %138 = vector.shape_cast %137 : vector<4x16xf32> to vector<4x16x1xf32>
    %139 = tpu.reciprocal %138 {approx = true} : vector<4x16x1xf32> -> vector<4x16x1xf32>
    %140 = vector.broadcast %139 : vector<4x16x1xf32> to vector<4x16x16xf32>
    %141 = arith.mulf %136, %140 : vector<4x16x16xf32>
    %142 = arith.truncf %141 : vector<4x16x16xf32> to vector<4x16x16xbf16>
    "tpu.trace_start"() <{level = 10 : i32, message = "bnm,bmd->bnd"}> : () -> ()
    %cst_47 = arith.constant dense<0.000000e+00> : vector<4x16x8xf32>
    %143 = tpu.matmul %142, %128, %cst_47 {dimension_numbers = #tpu.dot_dimension_numbers<[2], [1], [1], [2], [0, 0, 0, 1, 1, 2], [0], [0]>} : vector<4x16x16xbf16>, vector<4x16x8xbf16>, vector<4x16x8xf32> -> vector<4x16x8xf32>
    "tpu.trace_stop"() : () -> ()
    %144 = vector.extract_strided_slice %31 {offsets = [0, 0, 48], sizes = [4, 16, 8], strides = [1, 1, 1]} : vector<4x16x64xbf16> to vector<4x16x8xbf16>
    %145 = vector.extract_strided_slice %33 {offsets = [0, 0, 48], sizes = [4, 16, 8], strides = [1, 1, 1]} : vector<4x16x64xbf16> to vector<4x16x8xbf16>
    %146 = vector.extract_strided_slice %35 {offsets = [0, 0, 48], sizes = [4, 16, 8], strides = [1, 1, 1]} : vector<4x16x64xbf16> to vector<4x16x8xbf16>
    "tpu.trace_start"() <{level = 10 : i32, message = "bnd,bmd->bnm"}> : () -> ()
    %cst_48 = arith.constant dense<0.000000e+00> : vector<4x16x16xf32>
    %147 = tpu.matmul %144, %145, %cst_48 {dimension_numbers = #tpu.dot_dimension_numbers<[2], [2], [1], [1], [0, 0, 0, 1, 1, 1], [0], [0]>} : vector<4x16x8xbf16>, vector<4x16x8xbf16>, vector<4x16x16xf32> -> vector<4x16x16xf32>
    "tpu.trace_stop"() : () -> ()
    %cst_49 = arith.constant 0.353553385 : f32
    %148 = vector.broadcast %cst_49 : f32 to vector<4x16x16xf32>
    %149 = arith.mulf %147, %148 : vector<4x16x16xf32>
    %cst_50 = arith.constant dense<0xFF800000> : vector<4x16xf32>
    %150 = vector.multi_reduction <maximumf>, %149, %cst_50 [2] : vector<4x16x16xf32> to vector<4x16xf32>
    %151 = vector.shape_cast %150 : vector<4x16xf32> to vector<4x16x1xf32>
    %152 = vector.broadcast %151 : vector<4x16x1xf32> to vector<4x16x16xf32>
    %153 = arith.subf %149, %152 : vector<4x16x16xf32>
    %154 = math.exp %153 : vector<4x16x16xf32>
    %cst_51 = arith.constant dense<0.000000e+00> : vector<4x16xf32>
    %155 = vector.multi_reduction <add>, %154, %cst_51 [2] : vector<4x16x16xf32> to vector<4x16xf32>
    %156 = vector.shape_cast %155 : vector<4x16xf32> to vector<4x16x1xf32>
    %157 = tpu.reciprocal %156 {approx = true} : vector<4x16x1xf32> -> vector<4x16x1xf32>
    %158 = vector.broadcast %157 : vector<4x16x1xf32> to vector<4x16x16xf32>
    %159 = arith.mulf %154, %158 : vector<4x16x16xf32>
    %160 = arith.truncf %159 : vector<4x16x16xf32> to vector<4x16x16xbf16>
    "tpu.trace_start"() <{level = 10 : i32, message = "bnm,bmd->bnd"}> : () -> ()
    %cst_52 = arith.constant dense<0.000000e+00> : vector<4x16x8xf32>
    %161 = tpu.matmul %160, %146, %cst_52 {dimension_numbers = #tpu.dot_dimension_numbers<[2], [1], [1], [2], [0, 0, 0, 1, 1, 2], [0], [0]>} : vector<4x16x16xbf16>, vector<4x16x8xbf16>, vector<4x16x8xf32> -> vector<4x16x8xf32>
    "tpu.trace_stop"() : () -> ()
    %162 = vector.extract_strided_slice %31 {offsets = [0, 0, 56], sizes = [4, 16, 8], strides = [1, 1, 1]} : vector<4x16x64xbf16> to vector<4x16x8xbf16>
    %163 = vector.extract_strided_slice %33 {offsets = [0, 0, 56], sizes = [4, 16, 8], strides = [1, 1, 1]} : vector<4x16x64xbf16> to vector<4x16x8xbf16>
    %164 = vector.extract_strided_slice %35 {offsets = [0, 0, 56], sizes = [4, 16, 8], strides = [1, 1, 1]} : vector<4x16x64xbf16> to vector<4x16x8xbf16>
    "tpu.trace_start"() <{level = 10 : i32, message = "bnd,bmd->bnm"}> : () -> ()
    %cst_53 = arith.constant dense<0.000000e+00> : vector<4x16x16xf32>
    %165 = tpu.matmul %162, %163, %cst_53 {dimension_numbers = #tpu.dot_dimension_numbers<[2], [2], [1], [1], [0, 0, 0, 1, 1, 1], [0], [0]>} : vector<4x16x8xbf16>, vector<4x16x8xbf16>, vector<4x16x16xf32> -> vector<4x16x16xf32>
    "tpu.trace_stop"() : () -> ()
    %cst_54 = arith.constant 0.353553385 : f32
    %166 = vector.broadcast %cst_54 : f32 to vector<4x16x16xf32>
    %167 = arith.mulf %165, %166 : vector<4x16x16xf32>
    %cst_55 = arith.constant dense<0xFF800000> : vector<4x16xf32>
    %168 = vector.multi_reduction <maximumf>, %167, %cst_55 [2] : vector<4x16x16xf32> to vector<4x16xf32>
    %169 = vector.shape_cast %168 : vector<4x16xf32> to vector<4x16x1xf32>
    %170 = vector.broadcast %169 : vector<4x16x1xf32> to vector<4x16x16xf32>
    %171 = arith.subf %167, %170 : vector<4x16x16xf32>
    %172 = math.exp %171 : vector<4x16x16xf32>
    %cst_56 = arith.constant dense<0.000000e+00> : vector<4x16xf32>
    %173 = vector.multi_reduction <add>, %172, %cst_56 [2] : vector<4x16x16xf32> to vector<4x16xf32>
    %174 = vector.shape_cast %173 : vector<4x16xf32> to vector<4x16x1xf32>
    %175 = tpu.reciprocal %174 {approx = true} : vector<4x16x1xf32> -> vector<4x16x1xf32>
    %176 = vector.broadcast %175 : vector<4x16x1xf32> to vector<4x16x16xf32>
    %177 = arith.mulf %172, %176 : vector<4x16x16xf32>
    %178 = arith.truncf %177 : vector<4x16x16xf32> to vector<4x16x16xbf16>
    "tpu.trace_start"() <{level = 10 : i32, message = "bnm,bmd->bnd"}> : () -> ()
    %cst_57 = arith.constant dense<0.000000e+00> : vector<4x16x8xf32>
    %179 = tpu.matmul %178, %164, %cst_57 {dimension_numbers = #tpu.dot_dimension_numbers<[2], [1], [1], [2], [0, 0, 0, 1, 1, 2], [0], [0]>} : vector<4x16x16xbf16>, vector<4x16x8xbf16>, vector<4x16x8xf32> -> vector<4x16x8xf32>
    "tpu.trace_stop"() : () -> ()
    %180 = tpu.concatenate %53, %71, %89, %107, %125, %143, %161, %179 in 2 : vector<4x16x8xf32>, vector<4x16x8xf32>, vector<4x16x8xf32>, vector<4x16x8xf32>, vector<4x16x8xf32>, vector<4x16x8xf32>, vector<4x16x8xf32>, vector<4x16x8xf32> -> vector<4x16x64xf32>
    %181 = vector.shape_cast %180 : vector<4x16x64xf32> to vector<64x64xf32>
    %182 = arith.truncf %181 : vector<64x64xf32> to vector<64x64xbf16>
    %c0_58 = arith.constant 0 : index
    %c0_59 = arith.constant 0 : index
    %183 = vector.load %arg7[%c0_58, %c0_59] : memref<64x64xbf16, #tpu.memory_space<vmem>>, vector<64x64xbf16>
    %cst_60 = arith.constant dense<0.000000e+00> : vector<64x64xf32>
    %184 = tpu.matmul %182, %183, %cst_60 {dimension_numbers = #tpu.dot_dimension_numbers<[1], [0], [0], [1], [0, 0, 1, 1], [], []>} : vector<64x64xbf16>, vector<64x64xbf16>, vector<64x64xf32> -> vector<64x64xf32>
    %185 = arith.addf %0, %184 : vector<64x64xf32>
    %c0_61 = arith.constant 0 : index
    %c0_62 = arith.constant 0 : index
    %186 = vector.load %arg8[%c0_61, %c0_62] : memref<1x64xf32, #tpu.memory_space<vmem>>, vector<1x64xf32>
    %c0_63 = arith.constant 0 : index
    %c0_64 = arith.constant 0 : index
    %187 = vector.load %arg9[%c0_63, %c0_64] : memref<1x64xf32, #tpu.memory_space<vmem>>, vector<1x64xf32>
    %cst_65 = arith.constant dense<0.000000e+00> : vector<64xf32>
    %188 = vector.multi_reduction <add>, %185, %cst_65 [1] : vector<64x64xf32> to vector<64xf32>
    %189 = vector.shape_cast %188 : vector<64xf32> to vector<64x1xf32>
    %cst_66 = arith.constant 6.400000e+01 : f32
    %190 = vector.broadcast %cst_66 : f32 to vector<64x1xf32>
    %191 = arith.divf %189, %190 : vector<64x1xf32>
    %192 = vector.broadcast %191 : vector<64x1xf32> to vector<64x64xf32>
    %193 = arith.subf %185, %192 : vector<64x64xf32>
    %194 = arith.mulf %193, %193 : vector<64x64xf32>
    %cst_67 = arith.constant dense<0.000000e+00> : vector<64xf32>
    %195 = vector.multi_reduction <add>, %194, %cst_67 [1] : vector<64x64xf32> to vector<64xf32>
    %196 = vector.shape_cast %195 : vector<64xf32> to vector<64x1xf32>
    %cst_68 = arith.constant 6.400000e+01 : f32
    %197 = vector.broadcast %cst_68 : f32 to vector<64x1xf32>
    %198 = arith.divf %196, %197 : vector<64x1xf32>
    %cst_69 = arith.constant 9.99999974E-6 : f32
    %199 = vector.broadcast %cst_69 : f32 to vector<64x1xf32>
    %200 = arith.addf %198, %199 : vector<64x1xf32>
    %201 = math.rsqrt %200 : vector<64x1xf32>
    %202 = vector.broadcast %201 : vector<64x1xf32> to vector<64x64xf32>
    %203 = arith.mulf %193, %202 : vector<64x64xf32>
    %204 = vector.broadcast %186 : vector<1x64xf32> to vector<64x64xf32>
    %205 = arith.mulf %203, %204 : vector<64x64xf32>
    %206 = vector.broadcast %187 : vector<1x64xf32> to vector<64x64xf32>
    %207 = arith.addf %205, %206 : vector<64x64xf32>
    %208 = arith.truncf %207 : vector<64x64xf32> to vector<64x64xbf16>
    %c0_70 = arith.constant 0 : index
    %c0_71 = arith.constant 0 : index
    %209 = vector.load %arg10[%c0_70, %c0_71] : memref<64x256xbf16, #tpu.memory_space<vmem>>, vector<64x256xbf16>
    %cst_72 = arith.constant dense<0.000000e+00> : vector<64x256xf32>
    %210 = tpu.matmul %208, %209, %cst_72 {dimension_numbers = #tpu.dot_dimension_numbers<[1], [0], [0], [1], [0, 0, 1, 1], [], []>} : vector<64x64xbf16>, vector<64x256xbf16>, vector<64x256xf32> -> vector<64x256xf32>
    %c0_73 = arith.constant 0 : index
    %c0_74 = arith.constant 0 : index
    %211 = vector.load %arg11[%c0_73, %c0_74] : memref<1x256xf32, #tpu.memory_space<vmem>>, vector<1x256xf32>
    %212 = vector.broadcast %211 : vector<1x256xf32> to vector<64x256xf32>
    %213 = arith.addf %210, %212 : vector<64x256xf32>
    %cst_75 = arith.constant 5.000000e-01 : f32
    %214 = vector.broadcast %cst_75 : f32 to vector<64x256xf32>
    %215 = arith.mulf %214, %213 : vector<64x256xf32>
    %cst_76 = arith.constant 4.471500e-02 : f32
    %216 = vector.broadcast %cst_76 : f32 to vector<64x256xf32>
    %217 = arith.mulf %216, %213 : vector<64x256xf32>
    %218 = arith.mulf %217, %213 : vector<64x256xf32>
    %219 = arith.mulf %218, %213 : vector<64x256xf32>
    %220 = arith.addf %213, %219 : vector<64x256xf32>
    %cst_77 = arith.constant 0.797884583 : f32
    %221 = vector.broadcast %cst_77 : f32 to vector<64x256xf32>
    %222 = arith.mulf %221, %220 : vector<64x256xf32>
    %223 = math.tanh %222 : vector<64x256xf32>
    %cst_78 = arith.constant 1.000000e+00 : f32
    %224 = vector.broadcast %cst_78 : f32 to vector<64x256xf32>
    %225 = arith.addf %224, %223 : vector<64x256xf32>
    %226 = arith.mulf %215, %225 : vector<64x256xf32>
    %227 = arith.truncf %226 : vector<64x256xf32> to vector<64x256xbf16>
    %c0_79 = arith.constant 0 : index
    %c0_80 = arith.constant 0 : index
    %228 = vector.load %arg12[%c0_79, %c0_80] : memref<256x64xbf16, #tpu.memory_space<vmem>>, vector<256x64xbf16>
    %cst_81 = arith.constant dense<0.000000e+00> : vector<64x64xf32>
    %229 = tpu.matmul %227, %228, %cst_81 {dimension_numbers = #tpu.dot_dimension_numbers<[1], [0], [0], [1], [0, 0, 1, 1], [], []>} : vector<64x256xbf16>, vector<256x64xbf16>, vector<64x64xf32> -> vector<64x64xf32>
    %c0_82 = arith.constant 0 : index
    %c0_83 = arith.constant 0 : index
    %230 = vector.load %arg13[%c0_82, %c0_83] : memref<1x64xf32, #tpu.memory_space<vmem>>, vector<1x64xf32>
    %231 = vector.broadcast %230 : vector<1x64xf32> to vector<64x64xf32>
    %232 = arith.addf %229, %231 : vector<64x64xf32>
    %233 = arith.addf %185, %232 : vector<64x64xf32>
    %c0_84 = arith.constant 0 : index
    %c0_85 = arith.constant 0 : index
    %234 = vector.load %arg14[%c0_84, %c0_85] : memref<64x64xf32, #tpu.memory_space<vmem>>, vector<64x64xf32>
    tpu.vector_store %arg14[%c0_84, %c0_85], %233 {strides = array<i32>} : memref<64x64xf32, #tpu.memory_space<vmem>>, vector<64x64xf32>,
    return
  }
  func.func @transform_0(%arg0: i32) -> (i32, i32) {
    %c0_i32 = arith.constant 0 : i32
    %c0_i32_0 = arith.constant 0 : i32
    return %arg0, %c0_i32 : i32, i32
  }
  func.func @transform_1(%arg0: i32) -> (i32, i32) {
    %c0_i32 = arith.constant 0 : i32
    %c0_i32_0 = arith.constant 0 : i32
    %c0_i32_1 = arith.constant 0 : i32
    return %c0_i32, %c0_i32_0 : i32, i32
  }
  func.func @transform_2(%arg0: i32) -> (i32, i32) {
    %c0_i32 = arith.constant 0 : i32
    %c0_i32_0 = arith.constant 0 : i32
    %c0_i32_1 = arith.constant 0 : i32
    return %c0_i32, %c0_i32_0 : i32, i32
  }
  func.func @transform_3(%arg0: i32) -> (i32, i32) {
    %c0_i32 = arith.constant 0 : i32
    %c0_i32_0 = arith.constant 0 : i32
    %c0_i32_1 = arith.constant 0 : i32
    return %c0_i32, %c0_i32_0 : i32, i32
  }
  func.func @transform_4(%arg0: i32) -> (i32, i32) {
    %c0_i32 = arith.constant 0 : i32
    %c0_i32_0 = arith.constant 0 : i32
    %c0_i32_1 = arith.constant 0 : i32
    return %c0_i32, %c0_i32_0 : i32, i32
  }
  func.func @transform_5(%arg0: i32) -> (i32, i32) {
    %c0_i32 = arith.constant 0 : i32
    %c0_i32_0 = arith.constant 0 : i32
    %c0_i32_1 = arith.constant 0 : i32
    return %c0_i32, %c0_i32_0 : i32, i32
  }
  func.func @transform_6(%arg0: i32) -> (i32, i32) {
    %c0_i32 = arith.constant 0 : i32
    %c0_i32_0 = arith.constant 0 : i32
    %c0_i32_1 = arith.constant 0 : i32
    return %c0_i32, %c0_i32_0 : i32, i32
  }
  func.func @transform_7(%arg0: i32) -> (i32, i32) {
    %c0_i32 = arith.constant 0 : i32
    %c0_i32_0 = arith.constant 0 : i32
    %c0_i32_1 = arith.constant 0 : i32
    return %c0_i32, %c0_i32_0 : i32, i32
  }
  func.func @transform_8(%arg0: i32) -> (i32, i32) {
    %c0_i32 = arith.constant 0 : i32
    %c0_i32_0 = arith.constant 0 : i32
    %c0_i32_1 = arith.constant 0 : i32
    return %c0_i32, %c0_i32_0 : i32, i32
  }
  func.func @transform_9(%arg0: i32) -> (i32, i32) {
    %c0_i32 = arith.constant 0 : i32
    %c0_i32_0 = arith.constant 0 : i32
    %c0_i32_1 = arith.constant 0 : i32
    return %c0_i32, %c0_i32_0 : i32, i32
  }
  func.func @transform_10(%arg0: i32) -> (i32, i32) {
    %c0_i32 = arith.constant 0 : i32
    %c0_i32_0 = arith.constant 0 : i32
    %c0_i32_1 = arith.constant 0 : i32
    return %c0_i32, %c0_i32_0 : i32, i32
  }
  func.func @transform_11(%arg0: i32) -> (i32, i32) {
    %c0_i32 = arith.constant 0 : i32
    %c0_i32_0 = arith.constant 0 : i32
    %c0_i32_1 = arith.constant 0 : i32
    return %c0_i32, %c0_i32_0 : i32, i32
  }
  func.func @transform_12(%arg0: i32) -> (i32, i32) {
    %c0_i32 = arith.constant 0 : i32
    %c0_i32_0 = arith.constant 0 : i32
    %c0_i32_1 = arith.constant 0 : i32
    return %c0_i32, %c0_i32_0 : i32, i32
  }
  func.func @transform_13(%arg0: i32) -> (i32, i32) {
    %c0_i32 = arith.constant 0 : i32
    %c0_i32_0 = arith.constant 0 : i32
    return %arg0, %c0_i32 : i32, i32
  }
}

</mosaic_0001>

<bundles_post_ra>
// kernel: transformer_block_node_self_forward.1
= control target key start
LH: loop header
LB: loop body
LE: loop exit
PB: predicated region body
PF: predicated region fallthrough
CT: control target
= control target key end

     0   :  { %s9185_s0 = inlined_call_operand.vmem [shape: f32[128,64], index: 0, kind: input, shape index: {}]   ;;  %s9186_s1 = inlined_call_operand.vmem [shape: f32[1,64], index: 1, kind: input, shape index: {}]   ;;  %s9187_s2 = inlined_call_operand.vmem [shape: f32[1,64], index: 2, kind: input, shape index: {}]   ;;  %s9188_s3 = inlined_call_operand.vmem [shape: bf16[64,64], index: 3, kind: input, shape index: {}]   ;;  %s9189_s4 = inlined_call_operand.vmem [shape: bf16[64,64], index: 4, kind: input, shape index: {}]   ;;  %s9190_s5 = inlined_call_operand.vmem [shape: bf16[64,64], index: 5, kind: input, shape index: {}]   ;;  %s9191_s6 = inlined_call_operand.vmem [shape: bf16[64,64], index: 6, kind: input, shape index: {}]   ;;  %s9192_s7 = inlined_call_operand.vmem [shape: f32[1,64], index: 7, kind: input, shape index: {}]   ;;  %s9193_s8 = inlined_call_operand.vmem [shape: f32[1,64], index: 8, kind: input, shape index: {}]   ;;  %s9194_s9 = inlined_call_operand.vmem [shape: bf16[64,256], index: 9, kind: input, shape index: {}]   ;;  %s9195_s10 = inlined_call_operand.vmem [shape: f32[1,256], index: 10, kind: input, shape index: {}]   ;;  %s9196_s11 = inlined_call_operand.vmem [shape: bf16[256,64], index: 11, kind: input, shape index: {}]   ;;  %s9197_s12 = inlined_call_operand.vmem [shape: f32[1,64], index: 12, kind: input, shape index: {}]   ;;  %s9198_s13 = inlined_call_operand.hbm [shape: f32[128,64], index: 13, kind: output, shape index: {}]  }
   0x1   :  { %9223 = sst [smem:[#allocation28_spill]] %s9185_s0 }
   0x2   :  { %9224 = sst [smem:[#allocation29_spill]] %s9186_s1 }
   0x3   :  { %18 = vsyncpa [#allocation3], 0 }
   0x4   :  { %20 = vsyncpa [#allocation3 + $0x1], 0  ;;  %s7473_s25 = smov 0   ;;  %s7475_s26 = smov 0  }
   0x5   :  { %s7477_s27 = smov 0   ;;  %s7479_s28 = smov 0  }
   0x6 LB: > { %s7494_s29 = sadd.s32 4294967295, %s7382_s28   ;;  %s5961_s30 = sadd.s32 4294967294, %s7382_s28   ;;  %s7382_s28 = sphi %s7479_s28, %s9306_s28   ;;  %s7378_s27 = sphi %s7477_s27, %s9305_s27   ;;  %s7374_s26 = sphi %s7475_s26, %s9304_s26   ;;  %s7370_s25 = sphi %s7473_s25, %s9303_s25  }
   0x7   : > { %s7498_s14 = sadd.s32 1, %s7382_s28   ;;  %s311_s15 = sadd.s32 1, %s7378_s27 }
   0x8   : > { %s308_s16 = ssub.s32 %s7382_s28, %s7498_s14  ;;  %p321_p0 = scmp.ne.s32.totalorder %s7378_s27, %s7374_s26 }
   0x9   : > { %p309_p1 = scmp.eq.s32.totalorder %s308_s16, 0  ;;  %p322_p2 = scmp.eq.s32.totalorder %s7494_s29, 1 }
   0xa   : > { %p327_p3 = scmp.ne.s32.totalorder %s7374_s26, %s7370_s25  ;;  %p328_p4 = scmp.eq.s32.totalorder %s5961_s30, 1 }
   0xb   : > { %s7509_s17 = scalar_select %p309_p1, %s7378_s27, %s311_s15  }
   0xc   : > { %p7511_p5 = por %p322_p2, %p321_p0  ;;  %p7515_p6 = por %p328_p4, %p327_p3 }
   0xd   : > { %p5964_p7 = scmp.ge.s32.totalorder %s7382_s28, 1  ;;  %p391_p8 = scmp.lt.s32.totalorder %s7382_s28, 3 }
   0xf   : > { %p392_p9 = pnand %p5964_p7, %p391_p8 }
  0x11   : > { %395 = sbr.rel (%p392_p9) target bundleno = 6703 (0x1a2f), region = 72 }
  0x18   : > { %s5966_s20 = sshll.u32 %s7494_s29, 3  ;;  %vm453_vm0 = vcmask 523264   ;;  %s9227_s0 = sld [smem:[#allocation28_spill]]  ;;  %v6948_v56 = vld [vmem:[%s9188_s3] sm:$0xff]   ;;  %v6950_v58 = vld [vmem:[%s9188_s3 + $0x8] sm:$0xff]   ;;  %v6952_v60 = vld [vmem:[%s9188_s3 + $0x10] sm:$0xff]  }
  0x19   : > { %p436_p10 = scmp.lt.s32.totalorder %s5966_s20, 15  ;;  %v6949_v57 = vld [vmem:[%s9190_s5] sm:$0xff]   ;;  %6303 = vmatprep.subr.bf16.mxu1 %v6948_v56  ;;  %v6951_v59 = vld [vmem:[%s9190_s5 + $0x8] sm:$0xff]   ;;  %v6953_v61 = vld [vmem:[%s9190_s5 + $0x10] sm:$0xff]   ;;  %s9228_s1 = sld [smem:[#allocation29_spill]]  ;;  %vm7385_vm1 = vmmov 0  }
  0x1a   : > { %6335 = vmatprep.subr.bf16.mxu0 %v6949_v57  ;;  %6304 = vmatpush3.bf16.msra.mxu1 %v6948_v56  ;;  %v6954_v62 = vld [vmem:[%s9188_s3 + $0x18] sm:$0xff]   ;;  %vm906_vm2 = vcmask 64512   ;;  %vm1103_vm3 = vcmask 130048   ;;  %s7387_s22 = smov 112   ;;  %s7389_s23 = smov 96   ;;  %vm5068_vm4 = vcmask 195584  }
  0x1b   : > { %s9308_s20 = smov (!%p436_p10, %s5966_s20), 15  ;;  %6336 = vmatpush3.bf16.msra.mxu0 %v6949_v57  ;;  %6305 = vmatprep.subr.bf16.mxu1 %v6950_v58  ;;  %v6955_v63 = vld [vmem:[%s9190_s5 + $0x18] sm:$0xff]   ;;  %s7390_s30 = smov 88   ;;  %vm5077_vm5 = vcmask 261120   ;;  %vm5086_vm6 = vcmask 326656   ;;  %vm5095_vm7 = vcmask 392192  }
  0x1c   : > { %s5967_s21 = sshll.u32 %s9308_s20, 3  ;;  %6337 = vmatprep.subr.bf16.mxu0 %v6951_v59  ;;  %s7391_s15 = smov 80   ;;  %vm5104_vm8 = vcmask 457728  }
  0x1d   : > { %s7392_s16 = smov 72   ;;  %s9216_s20 = smov 8  }
  0x1e   : > { %s7525_s24 = scalar_lea.vmem %s9227_s0, %s5967_s21  ;;  %6306 = vmatpush3.bf16.msra.mxu1 %v6950_v58  ;;  %s7386_s21 = smov 120  }
  0x1f   : > { %v443_v0 = vld [vmem:[%s7525_s24] sm:$0xff]  ;;  %v445_v1 = vld [vmem:[%s7525_s24 + $0x10] sm:$0xff]  ;;  %v444_v2 = vld [vmem:[%s7525_s24 + $0x8] sm:$0xff]  ;;  %6338 = vmatpush3.bf16.msra.mxu0 %v6951_v59  ;;  %6307 = vmatprep.subr.bf16.mxu1 %v6952_v60  ;;  %s7388_s0 = smov 104  }
  0x20   : > { %v454_v3 = vsel %vm453_vm0, %v443_v0, 0.0  ;;  %v460_v4 = vsel %vm453_vm0, %v445_v1, 0.0  ;;  %v446_v5 = vld [vmem:[%s7525_s24 + $0x18] sm:$0xff]  ;;  %v447_v6 = vld [vmem:[%s7525_s24 + $0x20] sm:$0xff]  ;;  %v448_v7 = vld [vmem:[%s7525_s24 + $0x28] sm:$0xff]  ;;  %v457_v8 = vsel %vm453_vm0, %v444_v2, 0.0  ;;  %6339 = vmatprep.subr.bf16.mxu0 %v6953_v61 }
  0x21   : > { %455 = vadd.xlane.f32.xlu0 %v454_v3  ;;  %461 = vadd.xlane.f32.xlu1 %v460_v4  ;;  %v463_v9 = vsel %vm453_vm0, %v446_v5, 0.0  ;;  %v466_v10 = vsel %vm453_vm0, %v447_v6, 0.0  ;;  %v469_v11 = vsel %vm453_vm0, %v448_v7, 0.0  ;;  %v449_v12 = vld [vmem:[%s7525_s24 + $0x30] sm:$0xff]  ;;  %v450_v13 = vld [vmem:[%s7525_s24 + $0x38] sm:$0xff] }
  0x22   : > { %v472_v14 = vsel %vm453_vm0, %v449_v12, 0.0  ;;  %v475_v15 = vsel %vm453_vm0, %v450_v13, 0.0  ;;  %6308 = vmatpush3.bf16.msra.mxu1 %v6952_v60 }
  0x23   : > { %6340 = vmatpush3.bf16.msra.mxu0 %v6953_v61  ;;  %6309 = vmatprep.subr.bf16.mxu1 %v6954_v62 }
  0x24   : > { %6341 = vmatprep.subr.bf16.mxu0 %v6955_v63 }
  0x25   : > { %458 = vadd.xlane.f32.xlu0 %v457_v8  ;;  %464 = vadd.xlane.f32.xlu1 %v463_v9 }
  0x26   : > { %6310 = vmatpush3.bf16.msra.mxu1 %v6954_v62  ;;  %v6958_v62 = vld [vmem:[%s9189_s4 + $0x10] sm:$0xff]  }
  0x27   : > { %6342 = vmatpush3.bf16.msra.mxu0 %v6955_v63 }
  0x29   : > { %467 = vadd.xlane.f32.xlu0 %v466_v10  ;;  %470 = vadd.xlane.f32.xlu1 %v469_v11 }
  0x2d   : > { %473 = vadd.xlane.f32.xlu0 %v472_v14  ;;  %476 = vadd.xlane.f32.xlu1 %v475_v15 }
  0xae   : > { %v456_v16 = vpop.xlane.xlu0 %455  ;;  %v462_v17 = vpop.xlane.xlu1 %461 }
  0xaf   : > { %v479_v18 = vmul.f32 0.015625, %v456_v16  ;;  %v481_v19 = vmul.f32 0.015625, %v462_v17 }
  0xb1   : > { %v7543_v20 = vsub.f32 %v443_v0, %v479_v18  ;;  %v7545_v21 = vsub.f32 %v445_v1, %v481_v19  ;;  %v7610_v0 = vld [vmem:[%s9189_s4] sm:$0xff]  }
  0xb2   : > { %v459_v22 = vpop.xlane.xlu0 %458  ;;  %v465_v23 = vpop.xlane.xlu1 %464  ;;  %6319 = vmatprep.subr.bf16.mxu1 %v7610_v0 }
  0xb3   : > { %v480_v24 = vmul.f32 0.015625, %v459_v22  ;;  %v482_v25 = vmul.f32 0.015625, %v465_v23  ;;  %v495_v26 = vmul.f32 %v7543_v20, %v7543_v20  ;;  %v497_v27 = vmul.f32 %v7545_v21, %v7545_v21 }
  0xb5   : > { %v7551_v28 = vsub.f32 %v444_v2, %v480_v24  ;;  %v7553_v29 = vsub.f32 %v446_v5, %v482_v25  ;;  %v503_v30 = vsel %vm453_vm0, %v495_v26, 0.0  ;;  %v509_v33 = vsel %vm453_vm0, %v497_v27, 0.0 }
  0xb6   : > { %504 = vadd.xlane.f32.xlu0 %v503_v30  ;;  %v468_v31 = vpop.xlane.xlu0 %467  ;;  %v471_v32 = vpop.xlane.xlu1 %470  ;;  %v5968_v30 = vld [vmem:[%s9228_s1] ss:$0 sm:$0xff]  ;;  %s7401_s1 = smov [#allocation2]  }
  0xb7   : > { %v483_v34 = vmul.f32 0.015625, %v468_v31  ;;  %v484_v35 = vmul.f32 0.015625, %v471_v32  ;;  %v496_v36 = vmul.f32 %v7551_v28, %v7551_v28  ;;  %v498_v37 = vmul.f32 %v7553_v29, %v7553_v29 }
  0xb9   : > { %v7561_v38 = vsub.f32 %v447_v6, %v483_v34  ;;  %v7563_v39 = vsub.f32 %v448_v7, %v484_v35  ;;  %v506_v40 = vsel %vm453_vm0, %v496_v36, 0.0  ;;  %v512_v43 = vsel %vm453_vm0, %v498_v37, 0.0  ;;  %v5969_v36 = vld [vmem:[%s9187_s2] ss:$0 sm:$0xff] }
  0xba   : > { %510 = vadd.xlane.f32.xlu0 %v509_v33  ;;  %507 = vadd.xlane.f32.xlu1 %v506_v40  ;;  %v474_v41 = vpop.xlane.xlu0 %473  ;;  %v477_v42 = vpop.xlane.xlu1 %476 }
  0xbb   : > { %v485_v44 = vmul.f32 0.015625, %v474_v41  ;;  %v486_v45 = vmul.f32 0.015625, %v477_v42  ;;  %v499_v46 = vmul.f32 %v7561_v38, %v7561_v38  ;;  %v500_v47 = vmul.f32 %v7563_v39, %v7563_v39 }
  0xbd   : > { %v7571_v48 = vsub.f32 %v449_v12, %v485_v44  ;;  %v7573_v49 = vsub.f32 %v450_v13, %v486_v45  ;;  %v515_v50 = vsel %vm453_vm0, %v499_v46, 0.0  ;;  %v518_v51 = vsel %vm453_vm0, %v500_v47, 0.0 }
  0xbe   : > { %513 = vadd.xlane.f32.xlu1 %v512_v43  ;;  %516 = vadd.xlane.f32.xlu0 %v515_v50 }
  0xbf   : > { %v501_v52 = vmul.f32 %v7571_v48, %v7571_v48  ;;  %v502_v53 = vmul.f32 %v7573_v49, %v7573_v49 }
  0xc1   : > { %v521_v54 = vsel %vm453_vm0, %v501_v52, 0.0  ;;  %v524_v55 = vsel %vm453_vm0, %v502_v53, 0.0 }
  0xc2   : > { %519 = vadd.xlane.f32.xlu1 %v518_v51  ;;  %522 = vadd.xlane.f32.xlu0 %v521_v54 }
  0xc6   : > { %525 = vadd.xlane.f32.xlu1 %v524_v55 }
 0x143   : > { %v505_v1 = vpop.xlane.xlu0 %504 }
 0x144   : > { %v527_v2 = vmul.f32 0.015625, %v505_v1 }
 0x146   : > { %v535_v3 = vadd.f32 1e-05, %v527_v2 }
 0x147   : > { %v508_v4 = vpop.xlane.xlu1 %507  ;;  %v511_v5 = vpop.xlane.xlu0 %510 }
 0x148   : > { %6992 = vrsqrt.f32 %v535_v3  ;;  %v528_v6 = vmul.f32 0.015625, %v508_v4  ;;  %v529_v7 = vmul.f32 0.015625, %v511_v5 }
 0x14a   : > { %v536_v8 = vadd.f32 1e-05, %v528_v6  ;;  %v537_v9 = vadd.f32 1e-05, %v529_v7 }
 0x14b   : > { %v514_v10 = vpop.xlane.xlu1 %513  ;;  %v517_v11 = vpop.xlane.xlu0 %516 }
 0x14c   : > { %6994 = vrsqrt.f32 %v536_v8  ;;  %v530_v12 = vmul.f32 0.015625, %v514_v10  ;;  %v531_v13 = vmul.f32 0.015625, %v517_v11 }
 0x14d   : > { %6996 = vrsqrt.f32 %v537_v9 }
 0x14e   : > { %v538_v14 = vadd.f32 1e-05, %v530_v12  ;;  %v539_v15 = vadd.f32 1e-05, %v531_v13 }
 0x14f   : > { %v520_v16 = vpop.xlane.xlu1 %519  ;;  %v523_v17 = vpop.xlane.xlu0 %522 }
 0x150   : > { %6998 = vrsqrt.f32 %v538_v14  ;;  %v532_v18 = vmul.f32 0.015625, %v520_v16  ;;  %v533_v19 = vmul.f32 0.015625, %v523_v17 }
 0x151   : > { %7000 = vrsqrt.f32 %v539_v15 }
 0x152   : > { %v6993_v22 = vpop.eup %6992  ;;  %v540_v23 = vadd.f32 1e-05, %v532_v18  ;;  %v541_v24 = vadd.f32 1e-05, %v533_v19 }
 0x153   : > { %v526_v25 = vpop.xlane.xlu1 %525  ;;  %v551_v26 = vmul.f32 %v6993_v22, %v7543_v20 }
 0x154   : > { %7002 = vrsqrt.f32 %v540_v23  ;;  %v534_v27 = vmul.f32 0.015625, %v526_v25 }
 0x155   : > { %7004 = vrsqrt.f32 %v541_v24  ;;  %v565_v35 = vmul.f32 %v5968_v30, %v551_v26 }
 0x156   : > { %v6995_v31 = vpop.eup %6994  ;;  %v542_v32 = vadd.f32 1e-05, %v534_v27 }
 0x157   : > { %v6997_v33 = vpop.eup %6996  ;;  %v552_v34 = vmul.f32 %v6995_v31, %v7551_v28  ;;  %v579_v42 = vadd.f32 %v5969_v36, %v565_v35 }
 0x158   : > { %7006 = vrsqrt.f32 %v542_v32  ;;  %v553_v20 = vmul.f32 %v6997_v33, %v7545_v21 }
 0x159   : > { %v566_v37 = vmul.f32 %v5968_v30, %v552_v34 }
 0x15a   : > { %v6999_v40 = vpop.eup %6998  ;;  %v567_v45 = vmul.f32 %v5968_v30, %v553_v20 }
 0x15b   : > { %v7001_v41 = vpop.eup %7000  ;;  %v580_v43 = vadd.f32 %v5969_v36, %v566_v37  ;;  %v554_v44 = vmul.f32 %v6999_v40, %v7553_v29 }
 0x15c   : > { %v555_v46 = vmul.f32 %v7001_v41, %v7561_v38  ;;  %v581_v21 = vadd.f32 %v5969_v36, %v567_v45  ;;  %v6957_v38 = vld [vmem:[%s9189_s4 + $0x8] sm:$0xff]  }
 0x15d   : > { %v587_v47 = vpack.c.bf16 %v580_v43, %v579_v42  ;;  %v568_v28 = vmul.f32 %v5968_v30, %v554_v44 }
 0x15e   : > { %v7003_v50 = vpop.eup %7002  ;;  %v569_v51 = vmul.f32 %v5968_v30, %v555_v46 }
 0x15f   : > { %v7005_v52 = vpop.eup %7004  ;;  %6311 = vmatprep.mubr.msk.bf16.mxu1 %vm453_vm0, %v587_v47  ;;  %6343 = vmatprep.mubr.msk.bf16.mxu0 %vm453_vm0, %v587_v47  ;;  %v582_v53 = vadd.f32 %v5969_v36, %v568_v28  ;;  %v556_v54 = vmul.f32 %v7003_v50, %v7563_v39 }
 0x160   : > { %v557_v55 = vmul.f32 %v7005_v52, %v7571_v48  ;;  %v583_v58 = vadd.f32 %v5969_v36, %v569_v51 }
 0x161   : > { %v588_v56 = vpack.c.bf16 %v582_v53, %v581_v21  ;;  %v570_v29 = vmul.f32 %v5968_v30, %v556_v54 }
 0x162   : > { %v7007_v57 = vpop.eup %7006  ;;  %v571_v61 = vmul.f32 %v5968_v30, %v557_v55 }
 0x163   : > { %6312 = vmatmul.mubr.msk.bf16.vlgmr.msra.gmra.mrb[0].mxu1 %vm453_vm0, %v588_v56  ;;  %6344 = vmatmul.mubr.msk.bf16.vlgmr.msra.gmra.mrb[0].mxu0 %vm453_vm0, %v588_v56  ;;  %v584_v59 = vadd.f32 %v5969_v36, %v570_v29  ;;  %v558_v60 = vmul.f32 %v7007_v57, %v7573_v49  ;;  %v6959_v49 = vld [vmem:[%s9189_s4 + $0x18] sm:$0xff]  }
 0x164   : > { %6320 = vmatpush3.bf16.msra.mxu1 %v7610_v0  ;;  %v585_v63 = vadd.f32 %v5969_v36, %v571_v61  ;;  %v9199_v0 = vmov 0.0  }
 0x165   : > { %v589_v39 = vpack.c.bf16 %v584_v59, %v583_v58  ;;  %6321 = vmatprep.subr.bf16.mxu1 %v6957_v38  ;;  %v572_v48 = vmul.f32 %v5968_v30, %v558_v60  ;;  %6363 = vmatprep.subr.bf16.mxu0 %v9199_v0 }
 0x167   : > { %6315 = vmatprep.mubr.msk.bf16.mxu1 %vm453_vm0, %v589_v39  ;;  %6347 = vmatprep.mubr.msk.bf16.mxu0 %vm453_vm0, %v589_v39  ;;  %v586_v1 = vadd.f32 %v5969_v36, %v572_v48 }
 0x168   : > { %6322 = vmatpush3.bf16.msra.mxu1 %v6957_v38 }
 0x169   : > { %v590_v2 = vpack.c.bf16 %v586_v1, %v585_v63  ;;  %6323 = vmatprep.subr.bf16.mxu1 %v6958_v62 }
 0x16b   : > { %6316 = vmatmul.mubr.msk.bf16.gmra.mrb[4].mxu1 %vm453_vm0, %v590_v2  ;;  %6348 = vmatmul.mubr.msk.bf16.gmra.mrb[4].mxu0 %vm453_vm0, %v590_v2 }
 0x16c   : > { %6324 = vmatpush3.bf16.msra.mxu1 %v6958_v62  ;;  %6327 = vmatprep.mubr.msk.bf16.mxu1 %vm453_vm0, %v587_v47 }
 0x16d   : > { %6325 = vmatprep.subr.bf16.mxu1 %v6959_v49  ;;  %6365 = vmatprep.mubr.msk.bf16.mxu0 %vm7385_vm1, %v9199_v0 }
 0x170   : > { %6326 = vmatpush3.bf16.msra.mxu1 %v6959_v49 }
 0x171   : > { %6351 = vmatprep.subr.bf16.mxu1 %v9199_v0 }
 0x173   : > { %6328 = vmatmul.mubr.msk.bf16.vlgmr.msra.gmra.mrb[8].mxu1 %vm453_vm0, %v588_v56 }
 0x174   : > { %6331 = vmatprep.mubr.msk.bf16.mxu1 %vm453_vm0, %v589_v39 }
 0x17b   : > { %6332 = vmatmul.mubr.msk.bf16.gmra.mrb[12].mxu1 %vm453_vm0, %v590_v2 }
 0x17c   : > { %6353 = vmatprep.mubr.msk.bf16.mxu1 %vm7385_vm1, %v9199_v0 }
 0x236   : > { %v6313_v3 = vpop.f32.mrb[0].mxu1  ;;  %v6345_v4 = vpop.f32.mrb[0].mxu0 }
 0x237   : > { %v669_v5 = vpop.f32.mrb[1].mxu1  ;;  %v863_v6 = vpop.f32.mrb[1].mxu0 }
 0x238   : > { %v6314_v7 = vpop.f32.mrb[2].mxu1  ;;  %v6346_v8 = vpop.f32.mrb[2].mxu0 }
 0x239   : > { %v7655_v9 = vpack.c.bf16 %v6314_v7, %v6313_v3  ;;  %v7657_v10 = vpack.c.bf16 %v6346_v8, %v6345_v4  ;;  %v672_v11 = vpop.f32.mrb[3].mxu1  ;;  %v866_v12 = vpop.f32.mrb[3].mxu0 }
 0x23a   : > { %v7659_v13 = vpack.c.bf16 %v672_v11, %v669_v5  ;;  %v7661_v14 = vpack.c.bf16 %v866_v12, %v863_v6 }
 0x23e   : > { %v6317_v15 = vpop.f32.mrb[4].mxu1  ;;  %v6349_v16 = vpop.f32.mrb[4].mxu0 }
 0x23f   : > { %v685_v17 = vpop.f32.mrb[5].mxu1  ;;  %v879_v18 = vpop.f32.mrb[5].mxu0 }
 0x240   : > { %v6318_v19 = vpop.f32.mrb[6].mxu1  ;;  %v6350_v22 = vpop.f32.mrb[6].mxu0 }
 0x241   : > { %v7663_v23 = vpack.c.bf16 %v6318_v19, %v6317_v15  ;;  %v7665_v24 = vpack.c.bf16 %v6350_v22, %v6349_v16  ;;  %v688_v25 = vpop.f32.mrb[7].mxu1  ;;  %v882_v26 = vpop.f32.mrb[7].mxu0 }
 0x242   : > { %v7667_v27 = vpack.c.bf16 %v688_v25, %v685_v17  ;;  %v7669_v30 = vpack.c.bf16 %v882_v26, %v879_v18 }
 0x246   : > { %v6329_v31 = vpop.f32.mrb[8].mxu1 }
 0x247   : > { %v766_v32 = vpop.f32.mrb[9].mxu1 }
 0x248   : > { %v6330_v33 = vpop.f32.mrb[10].mxu1 }
 0x249   : > { %v7671_v34 = vpack.c.bf16 %v6330_v33, %v6329_v31  ;;  %v769_v35 = vpop.f32.mrb[11].mxu1 }
 0x24a   : > { %v7673_v36 = vpack.c.bf16 %v769_v35, %v766_v32 }
 0x24b   : > { %v958_v45 = vsel %vm906_vm2, %v7671_v34, 0 }
 0x24c   : > { %v911_v20 = vsel %vm906_vm2, %v7673_v36, 0 }
 0x24d   : > { %6352 = vmatpush3.bf16.xpose.msra.mxu1 %v911_v20 }
 0x24e   : > { %v6333_v37 = vpop.f32.mrb[12].mxu1  ;;  %6357 = vmatprep.subr.bf16.mxu1 %v9199_v0 }
 0x24f   : > { %v782_v40 = vpop.f32.mrb[13].mxu1 }
 0x250   : > { %v6334_v41 = vpop.f32.mrb[14].mxu1 }
 0x251   : > { %v7678_v42 = vpack.c.bf16 %v6334_v41, %v6333_v37  ;;  %v785_v43 = vpop.f32.mrb[15].mxu1 }
 0x252   : > { %v7680_v44 = vpack.c.bf16 %v785_v43, %v782_v40 }
 0x253   : > { %v1052_v47 = vsel %vm906_vm2, %v7678_v42, 0 }
 0x254   : > { %6354 = vmatmul.mubr.msk.bf16.vlgmr.msra.gmra.mrb[16].mxu1 %vm906_vm2, %v7659_v13  ;;  %v1005_v46 = vsel %vm906_vm2, %v7680_v44, 0 }
 0x255   : > { %6358 = vmatpush3.bf16.xpose.msra.mxu1 %v958_v45  ;;  %6364 = vmatpush3.bf16.xpose.msra.mxu0 %v1005_v46 }
 0x256   : > { %6359 = vmatprep.mubr.msk.bf16.mxu1 %vm7385_vm1, %v9199_v0  ;;  %6369 = vmatprep.subr.bf16.mxu1 %v9199_v0 }
 0x257   : > { %6375 = vmatprep.subr.bf16.mxu0 %v9199_v0 }
 0x25c   : > { %6360 = vmatmul.mubr.msk.bf16.vlgmr.msra.gmra.mrb[20].mxu1 %vm906_vm2, %v7655_v9  ;;  %6366 = vmatmul.mubr.msk.bf16.vlgmr.msra.gmra.mrb[8].mxu0 %vm906_vm2, %v7667_v27 }
 0x25d   : > { %6370 = vmatpush3.bf16.xpose.msra.mxu1 %v1052_v47  ;;  %6376 = vmatpush3.bf16.msra.mxu0 %v7661_v14 }
 0x25e   : > { %6371 = vmatprep.mubr.msk.bf16.mxu1 %vm7385_vm1, %v9199_v0  ;;  %6381 = vmatprep.subr.bf16.mxu1 %v9199_v0 }
 0x25f   : > { %6377 = vmatprep.mubr.msk.bf16.mxu0 %vm7385_vm1, %v9199_v0  ;;  %6387 = vmatprep.subr.bf16.mxu0 %v9199_v0 }
 0x264   : > { %6372 = vmatmul.mubr.msk.bf16.vlgmr.msra.gmra.mrb[24].mxu1 %vm906_vm2, %v7663_v23 }
 0x265   : > { %6382 = vmatpush3.bf16.msra.mxu1 %v7657_v10  ;;  %6383 = vmatprep.mubr.msk.bf16.mxu1 %vm7385_vm1, %v9199_v0 }
 0x266   : > { %6393 = vmatprep.subr.bf16.mxu1 %v9199_v0 }
 0x327   : > { %v947_v28 = vpop.f32.mrb[16].mxu1 }
 0x328   : > { %v1095_v50 = vmul.f32 0.35355338, %v947_v28  ;;  %v6355_v51 = vpop.f32.mrb[17].mxu1 }
 0x329   : > { %v950_v52 = vpop.f32.mrb[18].mxu1 }
 0x32a   : > { %v1096_v21 = vmul.f32 0.35355338, %v950_v52  ;;  %v6356_v53 = vpop.f32.mrb[19].mxu1  ;;  %v1104_v54 = vsel %vm1103_vm3, %v1095_v50, -inf }
 0x32b   : > { %1105 = vmax.xlane.f32.xlu0 %v1104_v54 }
 0x32c   : > { %v1107_v55 = vsel %vm1103_vm3, %v1096_v21, -inf }
 0x32d   : > { %1108 = vmax.xlane.f32.xlu1 %v1107_v55 }
 0x32f   : > { %v994_v56 = vpop.f32.mrb[20].mxu1  ;;  %v1041_v29 = vpop.f32.mrb[8].mxu0 }
 0x330   : > { %v1097_v38 = vmul.f32 0.35355338, %v994_v56  ;;  %v6361_v57 = vpop.f32.mrb[21].mxu1  ;;  %v6367_v58 = vpop.f32.mrb[9].mxu0  ;;  %v1099_v62 = vmul.f32 0.35355338, %v1041_v29 }
 0x331   : > { %v997_v59 = vpop.f32.mrb[22].mxu1  ;;  %v1044_v60 = vpop.f32.mrb[10].mxu0 }
 0x332   : > { %v1098_v61 = vmul.f32 0.35355338, %v997_v59  ;;  %v6362_v39 = vpop.f32.mrb[23].mxu1  ;;  %v6368_v48 = vpop.f32.mrb[11].mxu0  ;;  %v1110_v63 = vsel %vm1103_vm3, %v1097_v38, -inf  ;;  %v1116_v3 = vsel %vm1103_vm3, %v1099_v62, -inf }
 0x333   : > { %v1100_v1 = vmul.f32 0.35355338, %v1044_v60  ;;  %1111 = vmax.xlane.f32.xlu0 %v1110_v63 }
 0x334   : > { %v1113_v2 = vsel %vm1103_vm3, %v1098_v61, -inf }
 0x335   : > { %1114 = vmax.xlane.f32.xlu1 %v1113_v2  ;;  %v1119_v6 = vsel %vm1103_vm3, %v1100_v1, -inf }
 0x337   : > { %v1088_v49 = vpop.f32.mrb[24].mxu1  ;;  %1117 = vmax.xlane.f32.xlu0 %v1116_v3 }
 0x338   : > { %v1101_v4 = vmul.f32 0.35355338, %v1088_v49  ;;  %v6373_v5 = vpop.f32.mrb[25].mxu1 }
 0x339   : > { %v1091_v7 = vpop.f32.mrb[26].mxu1  ;;  %1120 = vmax.xlane.f32.xlu1 %v1119_v6 }
 0x33a   : > { %v7717_v8 = vmul.f32 0.35355338, %v1091_v7  ;;  %v6374_v11 = vpop.f32.mrb[27].mxu1  ;;  %v1122_v12 = vsel %vm1103_vm3, %v1101_v4, -inf }
 0x33b   : > { %1123 = vmax.xlane.f32.xlu0 %v1122_v12 }
 0x33c   : > { %v1125_v15 = vsel %vm1103_vm3, %v7717_v8, -inf }
 0x33d   : > { %1126 = vmax.xlane.f32.xlu1 %v1125_v15 }
 0x3b8   : > { %v1106_v16 = vpop.xlane.xlu0 %1105 }
 0x3b9   : > { %v1128_v17 = vsub.f32 %v1095_v50, %v1106_v16 }
 0x3ba   : > { %v1109_v18 = vpop.xlane.xlu1 %1108 }
 0x3bb   : > { %v1136_v19 = vmul.f32 1.442695, %v1128_v17  ;;  %v1129_v22 = vsub.f32 %v1096_v21, %v1109_v18 }
 0x3bd   : > { %7008 = vpow2.f32 %v1136_v19  ;;  %v1138_v25 = vmul.f32 1.442695, %v1129_v22 }
 0x3bf   : > { %7010 = vpow2.f32 %v1138_v25 }
 0x3c0   : > { %v1112_v26 = vpop.xlane.xlu0 %1111 }
 0x3c1   : > { %v1130_v31 = vsub.f32 %v1097_v38, %v1112_v26 }
 0x3c2   : > { %v1115_v32 = vpop.xlane.xlu1 %1114 }
 0x3c3   : > { %v1131_v33 = vsub.f32 %v1098_v61, %v1115_v32  ;;  %v1140_v35 = vmul.f32 1.442695, %v1130_v31 }
 0x3c4   : > { %v1118_v37 = vpop.xlane.xlu0 %1117 }
 0x3c5   : > { %v1142_v20 = vmul.f32 1.442695, %v1131_v33  ;;  %7012 = vpow2.f32 %v1140_v35  ;;  %v1132_v40 = vsub.f32 %v1099_v62, %v1118_v37 }
 0x3c6   : > { %v1121_v41 = vpop.xlane.xlu1 %1120 }
 0x3c7   : > { %v7009_v43 = vpop.eup %7008  ;;  %7014 = vpow2.f32 %v1142_v20  ;;  %v1133_v45 = vsub.f32 %v1100_v1, %v1121_v41  ;;  %v1144_v46 = vmul.f32 1.442695, %v1132_v40 }
 0x3c8   : > { %v1152_v47 = vsel %vm1103_vm3, %v7009_v43, 0.0  ;;  %v1124_v51 = vpop.xlane.xlu0 %1123 }
 0x3c9   : > { %v7011_v28 = vpop.eup %7010  ;;  %v1146_v50 = vmul.f32 1.442695, %v1133_v45  ;;  %1153 = vadd.xlane.f32.xlu0 %v1152_v47  ;;  %7016 = vpow2.f32 %v1144_v46  ;;  %v1134_v52 = vsub.f32 %v1101_v4, %v1124_v51 }
 0x3ca   : > { %v1155_v21 = vsel %vm1103_vm3, %v7011_v28, 0.0  ;;  %v1127_v39 = vpop.xlane.xlu1 %1126 }
 0x3cb   : > { %7018 = vpow2.f32 %v1146_v50  ;;  %1156 = vadd.xlane.f32.xlu1 %v1155_v21  ;;  %v1148_v53 = vmul.f32 1.442695, %v1134_v52  ;;  %v1135_v48 = vsub.f32 %v7717_v8, %v1127_v39 }
 0x3cd   : > { %7020 = vpow2.f32 %v1148_v53  ;;  %v1150_v62 = vmul.f32 1.442695, %v1135_v48 }
 0x3cf   : > { %v7013_v54 = vpop.eup %7012  ;;  %7022 = vpow2.f32 %v1150_v62 }
 0x3d0   : > { %v1158_v56 = vsel %vm1103_vm3, %v7013_v54, 0.0 }
 0x3d1   : > { %v7015_v55 = vpop.eup %7014  ;;  %1159 = vadd.xlane.f32.xlu0 %v1158_v56 }
 0x3d2   : > { %v1161_v29 = vsel %vm1103_vm3, %v7015_v55, 0.0 }
 0x3d3   : > { %1162 = vadd.xlane.f32.xlu1 %v1161_v29  ;;  %v7017_v38 = vpop.eup %7016 }
 0x3d4   : > { %v1164_v58 = vsel %vm1103_vm3, %v7017_v38, 0.0 }
 0x3d5   : > { %v7019_v57 = vpop.eup %7018  ;;  %1165 = vadd.xlane.f32.xlu0 %v1164_v58 }
 0x3d6   : > { %v1167_v59 = vsel %vm1103_vm3, %v7019_v57, 0.0 }
 0x3d7   : > { %1168 = vadd.xlane.f32.xlu1 %v1167_v59  ;;  %v7728_v60 = vpop.eup %7020 }
 0x3d8   : > { %v1170_v61 = vsel %vm1103_vm3, %v7728_v60, 0.0 }
 0x3d9   : > { %1171 = vadd.xlane.f32.xlu0 %v1170_v61  ;;  %v7743_v63 = vpop.eup %7022 }
 0x3da   : > { %v1173_v1 = vsel %vm1103_vm3, %v7743_v63, 0.0 }
 0x3e8   : > { %1429 = vrot.lane.b32.xlu1 %v7671_v34, %s7386_s21 }
 0x3ec   : > { %1373 = vrot.lane.b32.xlu1 %v7659_v13, %s7386_s21 }
 0x3ef   : > { %1376 = vrot.lane.b32.xlu0 %v7673_v36, %s7386_s21 }
 0x3f3   : > { %1426 = vrot.lane.b32.xlu0 %v7655_v9, %s7386_s21 }
 0x3f7   : > { %1479 = vrot.lane.b32.xlu0 %v7667_v27, %s7386_s21 }
 0x410   : > { %1174 = vadd.xlane.f32.xlu1 %v1173_v1 }
 0x421   : > { %1482 = vrot.lane.b32.xlu1 %v7680_v44, %s7386_s21 }
 0x425   : > { %1535 = vrot.lane.b32.xlu1 %v7678_v42, %s7386_s21 }
 0x429   : > { %1532 = vrot.lane.b32.xlu1 %v7663_v23, %s7386_s21 }
 0x456   : > { %v1154_v2 = vpop.xlane.xlu0 %1153 }
 0x457   : > { %7024 = vrcp.f32 %v1154_v2 }
 0x458   : > { %v1157_v49 = vpop.xlane.xlu1 %1156 }
 0x459   : > { %7026 = vrcp.f32 %v1157_v49 }
 0x45e   : > { %v1160_v3 = vpop.xlane.xlu0 %1159 }
 0x45f   : > { %7028 = vrcp.f32 %v1160_v3 }
 0x460   : > { %v1163_v4 = vpop.xlane.xlu1 %1162 }
 0x461   : > { %v7025_v5 = vpop.eup %7024  ;;  %7030 = vrcp.f32 %v1163_v4 }
 0x462   : > { %v1166_v7 = vpop.xlane.xlu0 %1165  ;;  %v1184_v8 = vmul.f32 %v7025_v5, %v7009_v43 }
 0x463   : > { %v7027_v6 = vpop.eup %7026  ;;  %7032 = vrcp.f32 %v1166_v7 }
 0x464   : > { %v1185_v11 = vmul.f32 %v7027_v6, %v7011_v28  ;;  %v1169_v12 = vpop.xlane.xlu1 %1168 }
 0x465   : > { %7034 = vrcp.f32 %v1169_v12 }
 0x466   : > { %v1192_v15 = vpack.c.bf16 %v1185_v11, %v1184_v8  ;;  %v1172_v18 = vpop.xlane.xlu0 %1171 }
 0x467   : > { %7036 = vrcp.f32 %v1172_v18 }
 0x468   : > { %6378 = vmatmul.mubr.msk.bf16.vlgmr.msra.gmra.mrb[12].mxu0 %vm1103_vm3, %v1192_v15  ;;  %v1430_v40 = vpop.permute.xlu1 %1429 }
 0x469   : > { %6388 = vmatpush3.bf16.msra.mxu0 %v7669_v30  ;;  %6389 = vmatprep.mubr.msk.bf16.mxu0 %vm7385_vm1, %v9199_v0  ;;  %v7029_v16 = vpop.eup %7028 }
 0x46a   : > { %6399 = vmatprep.subr.bf16.mxu0 %v9199_v0  ;;  %v1186_v19 = vmul.f32 %v7029_v16, %v7013_v54  ;;  %v1377_v35 = vpop.permute.xlu0 %1376  ;;  %v1435_v54 = vsel %vm906_vm2, %v1430_v40, 0 }
 0x46b   : > { %v7031_v17 = vpop.eup %7030  ;;  %v1382_v37 = vsel %vm906_vm2, %v1377_v35, 0 }
 0x46c   : > { %v1187_v22 = vmul.f32 %v7031_v17, %v7015_v55  ;;  %v1374_v41 = vpop.permute.xlu1 %1373 }
 0x46d   : > { %v7033_v25 = vpop.eup %7032 }
 0x46e   : > { %v1193_v26 = vpack.c.bf16 %v1187_v22, %v1186_v19  ;;  %v1188_v32 = vmul.f32 %v7033_v25, %v7017_v38  ;;  %v1427_v47 = vpop.permute.xlu0 %1426 }
 0x46f   : > { %v7035_v31 = vpop.eup %7034 }
 0x470   : > { %v1189_v33 = vmul.f32 %v7035_v31, %v7019_v57  ;;  %6384 = vmatmul.mubr.msk.bf16.vlgmr.msra.gmra.mrb[28].mxu1 %vm1103_vm3, %v1193_v26 }
 0x471   : > { %6394 = vmatpush3.bf16.msra.mxu1 %v7665_v24  ;;  %6395 = vmatprep.mubr.msk.bf16.mxu1 %vm7385_vm1, %v9199_v0  ;;  %v7037_v28 = vpop.eup %7036 }
 0x472   : > { %v1194_v20 = vpack.c.bf16 %v1189_v33, %v1188_v32  ;;  %6405 = vmatprep.subr.bf16.mxu1 %v9199_v0  ;;  %v1190_v51 = vmul.f32 %v7037_v28, %v7728_v60  ;;  %v1480_v52 = vpop.permute.xlu0 %1479 }
 0x474   : > { %6390 = vmatmul.mubr.msk.bf16.vlgmr.msra.gmra.mrb[16].mxu0 %vm1103_vm3, %v1194_v20 }
 0x475   : > { %6400 = vmatpush3.bf16.xpose.msra.mxu0 %v1382_v37  ;;  %6401 = vmatprep.mubr.msk.bf16.mxu0 %vm7385_vm1, %v9199_v0 }
 0x476   : > { %6411 = vmatprep.subr.bf16.mxu0 %v9199_v0 }
 0x47c   : > { %6402 = vmatmul.mubr.msk.bf16.vlgmr.msra.gmra.mrb[20].mxu0 %vm906_vm2, %v1374_v41 }
 0x47d   : > { %6413 = vmatprep.mubr.msk.bf16.mxu0 %vm7385_vm1, %v9199_v0 }
 0x49d   : > { %v1175_v43 = vpop.xlane.xlu1 %1174 }
 0x49e   : > { %7038 = vrcp.f32 %v1175_v43 }
 0x4a1   : > { %v1483_v45 = vpop.permute.xlu1 %1482 }
 0x4a2   : > { %v1488_v46 = vsel %vm906_vm2, %v1483_v45, 0 }
 0x4a3   : > { %6412 = vmatpush3.bf16.xpose.msra.mxu0 %v1488_v46 }
 0x4a4   : > { %6423 = vmatprep.subr.bf16.mxu0 %v9199_v0 }
 0x4a5   : > { %v1536_v55 = vpop.permute.xlu1 %1535 }
 0x4a6   : > { %v1541_v56 = vsel %vm906_vm2, %v1536_v55, 0 }
 0x4a8   : > { %v7039_v50 = vpop.eup %7038 }
 0x4a9   : > { %v1191_v21 = vmul.f32 %v7039_v50, %v7743_v63  ;;  %v1533_v29 = vpop.permute.xlu1 %1532 }
 0x4aa   : > { %6414 = vmatmul.mubr.msk.bf16.vlgmr.msra.gmra.mrb[24].mxu0 %vm906_vm2, %v1480_v52 }
 0x4ab   : > { %v1195_v53 = vpack.c.bf16 %v1191_v21, %v1190_v51  ;;  %6425 = vmatprep.mubr.msk.bf16.mxu0 %vm7385_vm1, %v9199_v0 }
 0x4ad   : > { %6396 = vmatmul.mubr.msk.bf16.vlgmr.msra.gmra.mrb[32].mxu1 %vm1103_vm3, %v1195_v53 }
 0x4ae   : > { %6406 = vmatpush3.bf16.xpose.msra.mxu1 %v1435_v54  ;;  %6407 = vmatprep.mubr.msk.bf16.mxu1 %vm7385_vm1, %v9199_v0 }
 0x4af   : > { %6417 = vmatprep.subr.bf16.mxu1 %v9199_v0 }
 0x4b5   : > { %6408 = vmatmul.mubr.msk.bf16.vlgmr.msra.gmra.mrb[36].mxu1 %vm906_vm2, %v1427_v47 }
 0x4b6   : > { %6418 = vmatpush3.bf16.xpose.msra.mxu1 %v1541_v56  ;;  %6419 = vmatprep.mubr.msk.bf16.mxu1 %vm7385_vm1, %v9199_v0 }
 0x4b7   : > { %6429 = vmatprep.subr.bf16.mxu1 %v9199_v0 }
 0x4bd   : > { %6420 = vmatmul.mubr.msk.bf16.vlgmr.msra.gmra.mrb[40].mxu1 %vm906_vm2, %v1533_v29 }
 0x4be   : > { %6431 = vmatprep.mubr.msk.bf16.mxu1 %vm7385_vm1, %v9199_v0 }
 0x53b   : > { %v7791_v38 = vpop.f32.mrb[12].mxu0 }
 0x53c   : > { %9229 = vst [vmem:[#allocation5_spill] sm:$0xff] %v7791_v38  ;;  %v6379_v57 = vpop.f32.mrb[13].mxu0 }
 0x53d   : > { %v7793_v58 = vpop.f32.mrb[14].mxu0 }
 0x53e   : > { %9230 = vst [vmem:[#allocation6_spill] sm:$0xff] %v7793_v58  ;;  %v6380_v59 = vpop.f32.mrb[15].mxu0 }
 0x543   : > { %v7795_v60 = vpop.f32.mrb[28].mxu1 }
 0x544   : > { %9231 = vst [vmem:[#allocation7_spill] sm:$0xff] %v7795_v60  ;;  %v6385_v61 = vpop.f32.mrb[29].mxu1 }
 0x545   : > { %v7797_v39 = vpop.f32.mrb[30].mxu1 }
 0x546   : > { %9232 = vst [vmem:[#allocation8_spill] sm:$0xff] %v7797_v39  ;;  %v6386_v48 = vpop.f32.mrb[31].mxu1 }
 0x547   : > { %v7799_v62 = vpop.f32.mrb[16].mxu0 }
 0x548   : > { %9233 = vst [vmem:[#allocation9_spill] sm:$0xff] %v7799_v62  ;;  %v6391_v63 = vpop.f32.mrb[17].mxu0 }
 0x549   : > { %v7801_v1 = vpop.f32.mrb[18].mxu0 }
 0x54a   : > { %9234 = vst [vmem:[#allocation10_spill] sm:$0xff] %v7801_v1  ;;  %v6392_v2 = vpop.f32.mrb[19].mxu0 }
 0x54f   : > { %v1418_v49 = vpop.f32.mrb[20].mxu0 }
 0x550   : > { %v1584_v3 = vmul.f32 0.35355338, %v1418_v49  ;;  %v6403_v4 = vpop.f32.mrb[21].mxu0 }
 0x551   : > { %v1421_v5 = vpop.f32.mrb[22].mxu0 }
 0x552   : > { %v1585_v6 = vmul.f32 0.35355338, %v1421_v5  ;;  %v6404_v7 = vpop.f32.mrb[23].mxu0  ;;  %v1592_v8 = vsel %vm1103_vm3, %v1584_v3, -inf }
 0x553   : > { %1593 = vmax.xlane.f32.xlu0 %v1592_v8 }
 0x554   : > { %v1595_v11 = vsel %vm1103_vm3, %v1585_v6, -inf }
 0x555   : > { %1596 = vmax.xlane.f32.xlu1 %v1595_v11 }
 0x57d   : > { %v1524_v12 = vpop.f32.mrb[24].mxu0 }
 0x57e   : > { %v6415_v15 = vpop.f32.mrb[25].mxu0  ;;  %v1588_v43 = vmul.f32 0.35355338, %v1524_v12 }
 0x57f   : > { %v1527_v16 = vpop.f32.mrb[26].mxu0 }
 0x580   : > { %v1589_v17 = vmul.f32 0.35355338, %v1527_v16  ;;  %v7805_v18 = vpop.f32.mrb[32].mxu1  ;;  %v6416_v19 = vpop.f32.mrb[27].mxu0  ;;  %v1604_v52 = vsel %vm1103_vm3, %v1588_v43, -inf }
 0x581   : > { %9235 = vst [vmem:[#allocation11_spill] sm:$0xff] %v7805_v18  ;;  %v6397_v22 = vpop.f32.mrb[33].mxu1 }
 0x582   : > { %v7807_v25 = vpop.f32.mrb[34].mxu1  ;;  %v1607_v26 = vsel %vm1103_vm3, %v1589_v17, -inf }
 0x583   : > { %9236 = vst [vmem:[#allocation12_spill] sm:$0xff] %v7807_v25  ;;  %v6398_v31 = vpop.f32.mrb[35].mxu1  ;;  %1608 = vmax.xlane.f32.xlu1 %v1607_v26 }
 0x588   : > { %v1471_v32 = vpop.f32.mrb[36].mxu1 }
 0x589   : > { %v1586_v33 = vmul.f32 0.35355338, %v1471_v32  ;;  %v6409_v35 = vpop.f32.mrb[37].mxu1 }
 0x58a   : > { %v1474_v20 = vpop.f32.mrb[38].mxu1 }
 0x58b   : > { %v1587_v37 = vmul.f32 0.35355338, %v1474_v20  ;;  %v6410_v40 = vpop.f32.mrb[39].mxu1  ;;  %v1598_v41 = vsel %vm1103_vm3, %v1586_v33, -inf }
 0x58c   : > { %1599 = vmax.xlane.f32.xlu0 %v1598_v41 }
 0x58d   : > { %v1601_v45 = vsel %vm1103_vm3, %v1587_v37, -inf }
 0x590   : > { %v1577_v46 = vpop.f32.mrb[40].mxu1  ;;  %1602 = vmax.xlane.f32.xlu0 %v1601_v45 }
 0x591   : > { %v6421_v47 = vpop.f32.mrb[41].mxu1  ;;  %v1590_v50 = vmul.f32 0.35355338, %v1577_v46 }
 0x592   : > { %v1580_v28 = vpop.f32.mrb[42].mxu1 }
 0x593   : > { %v6422_v51 = vpop.f32.mrb[43].mxu1  ;;  %v1610_v21 = vsel %vm1103_vm3, %v1590_v50, -inf  ;;  %v7820_v53 = vmul.f32 0.35355338, %v1580_v28 }
 0x594   : > { %1605 = vmax.xlane.f32.xlu0 %v1604_v52  ;;  %1733 = vrot.lane.b32.xlu1 %v7657_v10, %s7386_s21 }
 0x595   : > { %v1613_v54 = vsel %vm1103_vm3, %v7820_v53, -inf }
 0x598   : > { %1611 = vmax.xlane.f32.xlu0 %v1610_v21  ;;  %1781 = vrot.lane.b32.xlu1 %v7669_v30, %s7386_s21 }
 0x5ae   : > { %1685 = vrot.lane.b32.xlu0 %v7661_v14, %s7386_s21 }
 0x5bc   : > { %1614 = vmax.xlane.f32.xlu1 %v1613_v54 }
 0x5cd   : > { %1829 = vrot.lane.b32.xlu1 %v7665_v24, %s7386_s21  ;;  %s7394_s21 = smov 16  }
 0x5e0   : > { %v1594_v55 = vpop.xlane.xlu0 %1593 }
 0x5e1   : > { %v1616_v56 = vsub.f32 %v1584_v3, %v1594_v55 }
 0x5e2   : > { %v1597_v29 = vpop.xlane.xlu1 %1596 }
 0x5e3   : > { %v1624_v57 = vmul.f32 1.442695, %v1616_v56  ;;  %v1617_v59 = vsub.f32 %v1585_v6, %v1597_v29 }
 0x5e5   : > { %7040 = vpow2.f32 %v1624_v57  ;;  %v1626_v61 = vmul.f32 1.442695, %v1617_v59 }
 0x5e7   : > { %7042 = vpow2.f32 %v1626_v61 }
 0x5ef   : > { %v7826_v48 = vpop.eup %7040 }
 0x5f0   : > { %v1640_v63 = vsel %vm1103_vm3, %v7826_v48, 0.0 }
 0x5f1   : > { %v7830_v2 = vpop.eup %7042  ;;  %1641 = vadd.xlane.f32.xlu0 %v1640_v63 }
 0x5f2   : > { %v1643_v49 = vsel %vm1103_vm3, %v7830_v2, 0.0 }
 0x5f3   : > { %1644 = vadd.xlane.f32.xlu1 %v1643_v49 }
 0x610   : > { %v1609_v4 = vpop.xlane.xlu1 %1608 }
 0x611   : > { %v1621_v7 = vsub.f32 %v1589_v17, %v1609_v4 }
 0x613   : > { %v1634_v15 = vmul.f32 1.442695, %v1621_v7 }
 0x614   : > { %v1734_v3 = vpop.permute.xlu1 %1733 }
 0x615   : > { %6430 = vmatpush3.bf16.msra.mxu1 %v1734_v3 }
 0x616   : > { %6441 = vmatprep.subr.bf16.mxu1 %v9199_v0 }
 0x619   : > { %v1600_v5 = vpop.xlane.xlu0 %1599 }
 0x61a   : > { %v1618_v6 = vsub.f32 %v1586_v33, %v1600_v5 }
 0x61c   : > { %v1628_v8 = vmul.f32 1.442695, %v1618_v6 }
 0x61d   : > { %v1603_v11 = vpop.xlane.xlu0 %1602 }
 0x61e   : > { %7044 = vpow2.f32 %v1628_v8  ;;  %v1619_v12 = vsub.f32 %v1587_v37, %v1603_v11 }
 0x620   : > { %v1630_v16 = vmul.f32 1.442695, %v1619_v12 }
 0x621   : > { %v1606_v19 = vpop.xlane.xlu0 %1605 }
 0x622   : > { %7046 = vpow2.f32 %v1630_v16  ;;  %v1620_v22 = vsub.f32 %v1588_v43, %v1606_v19 }
 0x623   : > { %7048 = vpow2.f32 %v1634_v15 }
 0x624   : > { %v1632_v26 = vmul.f32 1.442695, %v1620_v22 }
 0x625   : > { %v1612_v31 = vpop.xlane.xlu0 %1611 }
 0x626   : > { %7050 = vpow2.f32 %v1632_v26  ;;  %v1622_v32 = vsub.f32 %v1590_v50, %v1612_v31  ;;  %v1782_v50 = vpop.permute.xlu1 %1781 }
 0x628   : > { %v7045_v35 = vpop.eup %7044  ;;  %v1636_v20 = vmul.f32 1.442695, %v1622_v32 }
 0x629   : > { %v1686_v40 = vpop.permute.xlu0 %1685  ;;  %v1646_v33 = vsel %vm1103_vm3, %v7045_v35, 0.0 }
 0x62a   : > { %7052 = vpow2.f32 %v1636_v20  ;;  %1647 = vadd.xlane.f32.xlu0 %v1646_v33  ;;  %6424 = vmatpush3.bf16.msra.mxu0 %v1686_v40 }
 0x62b   : > { %6435 = vmatprep.subr.bf16.mxu0 %v9199_v0 }
 0x62c   : > { %v7047_v17 = vpop.eup %7046 }
 0x62d   : > { %v1649_v37 = vsel %vm1103_vm3, %v7047_v17, 0.0  ;;  %v7049_v41 = vpop.eup %7048 }
 0x62e   : > { %1650 = vadd.xlane.f32.xlu1 %v1649_v37  ;;  %v1655_v46 = vsel %vm1103_vm3, %v7049_v41, 0.0 }
 0x630   : > { %v7051_v43 = vpop.eup %7050 }
 0x631   : > { %v1652_v45 = vsel %vm1103_vm3, %v7051_v43, 0.0 }
 0x632   : > { %1653 = vadd.xlane.f32.xlu0 %v1652_v45  ;;  %1656 = vadd.xlane.f32.xlu1 %v1655_v46 }
 0x634   : > { %v7840_v47 = vpop.eup %7052 }
 0x635   : > { %v1658_v28 = vsel %vm1103_vm3, %v7840_v47, 0.0 }
 0x636   : > { %1659 = vadd.xlane.f32.xlu0 %v1658_v28 }
 0x643   : > { %1929 = vrot.lane.b32.xlu1 %v7671_v34, %s7387_s22 }
 0x649   : > { %v1615_v51 = vpop.xlane.xlu1 %1614 }
 0x64a   : > { %v1623_v52 = vsub.f32 %v7820_v53, %v1615_v51 }
 0x64c   : > { %1878 = vrot.lane.b32.xlu0 %v7673_v36, %s7387_s22  ;;  %v1638_v21 = vmul.f32 1.442695, %v1623_v52 }
 0x64d   : > { %v1830_v56 = vpop.permute.xlu1 %1829 }
 0x64e   : > { %7054 = vpow2.f32 %v1638_v21 }
 0x650   : > { %1876 = vrot.lane.b32.xlu0 %v7659_v13, %s7387_s22 }
 0x654   : > { %1927 = vrot.lane.b32.xlu0 %v7655_v9, %s7387_s22 }
 0x658   : > { %1978 = vrot.lane.b32.xlu0 %v7667_v27, %s7387_s22  ;;  %v7855_v54 = vpop.eup %7054 }
 0x659   : > { %v1661_v55 = vsel %vm1103_vm3, %v7855_v54, 0.0 }
 0x667   : > { %1662 = vadd.xlane.f32.xlu1 %v1661_v55 }
 0x678   : > { %1980 = vrot.lane.b32.xlu1 %v7680_v44, %s7387_s22 }
 0x67c   : > { %2031 = vrot.lane.b32.xlu1 %v7678_v42, %s7387_s22 }
 0x67e   : > { %v1642_v53 = vpop.xlane.xlu0 %1641 }
 0x67f   : > { %7056 = vrcp.f32 %v1642_v53 }
 0x680   : > { %2029 = vrot.lane.b32.xlu1 %v7663_v23, %s7387_s22  ;;  %v1645_v29 = vpop.xlane.xlu1 %1644 }
 0x681   : > { %7058 = vrcp.f32 %v1645_v29 }
 0x689   : > { %v7057_v57 = vpop.eup %7056 }
 0x68a   : > { %v1672_v61 = vmul.f32 %v7057_v57, %v7826_v48 }
 0x68b   : > { %v7059_v59 = vpop.eup %7058 }
 0x68c   : > { %v1673_v63 = vmul.f32 %v7059_v59, %v7830_v2 }
 0x68e   : > { %v1680_v49 = vpack.c.bf16 %v1673_v63, %v1672_v61 }
 0x690   : > { %6426 = vmatmul.mubr.msk.bf16.vlgmr.msra.gmra.mrb[28].mxu0 %vm1103_vm3, %v1680_v49 }
 0x691   : > { %6436 = vmatpush3.bf16.msra.mxu0 %v1782_v50  ;;  %6437 = vmatprep.mubr.msk.bf16.mxu0 %vm7385_vm1, %v9199_v0 }
 0x692   : > { %6447 = vmatprep.subr.bf16.mxu0 %v9199_v0 }
 0x6b7   : > { %v1648_v4 = vpop.xlane.xlu0 %1647 }
 0x6b8   : > { %7060 = vrcp.f32 %v1648_v4 }
 0x6bb   : > { %v1651_v3 = vpop.xlane.xlu1 %1650 }
 0x6bc   : > { %7062 = vrcp.f32 %v1651_v3 }
 0x6bf   : > { %v1654_v5 = vpop.xlane.xlu0 %1653  ;;  %v1657_v6 = vpop.xlane.xlu1 %1656 }
 0x6c0   : > { %7064 = vrcp.f32 %v1654_v5 }
 0x6c1   : > { %7066 = vrcp.f32 %v1657_v6 }
 0x6c2   : > { %v7061_v48 = vpop.eup %7060 }
 0x6c3   : > { %v1674_v2 = vmul.f32 %v7061_v48, %v7045_v35  ;;  %v1660_v11 = vpop.xlane.xlu0 %1659  ;;  %v1930_v20 = vpop.permute.xlu1 %1929 }
 0x6c4   : > { %7068 = vrcp.f32 %v1660_v11  ;;  %v1935_v51 = vsel %vm906_vm2, %v1930_v20, 0 }
 0x6c6   : > { %v7063_v7 = vpop.eup %7062 }
 0x6c7   : > { %v1675_v8 = vmul.f32 %v7063_v7, %v7047_v17  ;;  %v1879_v26 = vpop.permute.xlu0 %1878 }
 0x6c8   : > { %v1884_v32 = vsel %vm906_vm2, %v1879_v26, 0 }
 0x6c9   : > { %v1681_v12 = vpack.c.bf16 %v1675_v8, %v1674_v2 }
 0x6ca   : > { %v7065_v15 = vpop.eup %7064 }
 0x6cb   : > { %v7067_v16 = vpop.eup %7066  ;;  %v1676_v19 = vmul.f32 %v7065_v15, %v7051_v43  ;;  %6432 = vmatmul.mubr.msk.bf16.vlgmr.msra.gmra.mrb[44].mxu1 %vm1103_vm3, %v1681_v12  ;;  %v1877_v35 = vpop.permute.xlu0 %1876 }
 0x6cc   : > { %v1677_v22 = vmul.f32 %v7067_v16, %v7049_v41  ;;  %6442 = vmatpush3.bf16.msra.mxu1 %v1830_v56  ;;  %6443 = vmatprep.mubr.msk.bf16.mxu1 %vm7385_vm1, %v9199_v0 }
 0x6cd   : > { %6453 = vmatprep.subr.bf16.mxu1 %v9199_v0 }
 0x6ce   : > { %v1682_v31 = vpack.c.bf16 %v1677_v22, %v1676_v19  ;;  %v7069_v41 = vpop.eup %7068 }
 0x6cf   : > { %v1928_v37 = vpop.permute.xlu0 %1927  ;;  %v1678_v45 = vmul.f32 %v7069_v41, %v7840_v47 }
 0x6d0   : > { %6438 = vmatmul.mubr.msk.bf16.vlgmr.msra.gmra.mrb[32].mxu0 %vm1103_vm3, %v1682_v31 }
 0x6d1   : > { %6448 = vmatpush3.bf16.xpose.msra.mxu0 %v1884_v32  ;;  %6449 = vmatprep.mubr.msk.bf16.mxu0 %vm7385_vm1, %v9199_v0 }
 0x6d2   : > { %6459 = vmatprep.subr.bf16.mxu0 %v9199_v0 }
 0x6d3   : > { %v1979_v46 = vpop.permute.xlu0 %1978 }
 0x6d8   : > { %6450 = vmatmul.mubr.msk.bf16.vlgmr.msra.gmra.mrb[36].mxu0 %vm906_vm2, %v1877_v35 }
 0x6d9   : > { %6461 = vmatprep.mubr.msk.bf16.mxu0 %vm7385_vm1, %v9199_v0 }
 0x6f4   : > { %v1663_v40 = vpop.xlane.xlu1 %1662 }
 0x6f5   : > { %7070 = vrcp.f32 %v1663_v40 }
 0x6f8   : > { %v1981_v33 = vpop.permute.xlu1 %1980 }
 0x6f9   : > { %v1986_v17 = vsel %vm906_vm2, %v1981_v33, 0 }
 0x6fa   : > { %6460 = vmatpush3.bf16.xpose.msra.mxu0 %v1986_v17 }
 0x6fb   : > { %6471 = vmatprep.subr.bf16.mxu0 %v9199_v0 }
 0x6fc   : > { %v2032_v47 = vpop.permute.xlu1 %2031 }
 0x6fd   : > { %v2037_v52 = vsel %vm906_vm2, %v2032_v47, 0 }
 0x6ff   : > { %v7071_v43 = vpop.eup %7070 }
 0x700   : > { %v1679_v28 = vmul.f32 %v7071_v43, %v7855_v54  ;;  %v2030_v21 = vpop.permute.xlu1 %2029 }
 0x701   : > { %6462 = vmatmul.mubr.msk.bf16.vlgmr.msra.gmra.mrb[40].mxu0 %vm906_vm2, %v1979_v46 }
 0x702   : > { %v1683_v50 = vpack.c.bf16 %v1679_v28, %v1678_v45  ;;  %6473 = vmatprep.mubr.msk.bf16.mxu0 %vm7385_vm1, %v9199_v0 }
 0x704   : > { %6444 = vmatmul.mubr.msk.bf16.vlgmr.msra.gmra.mrb[48].mxu1 %vm1103_vm3, %v1683_v50 }
 0x705   : > { %6454 = vmatpush3.bf16.xpose.msra.mxu1 %v1935_v51  ;;  %6455 = vmatprep.mubr.msk.bf16.mxu1 %vm7385_vm1, %v9199_v0 }
 0x706   : > { %6465 = vmatprep.subr.bf16.mxu1 %v9199_v0 }
 0x70c   : > { %6456 = vmatmul.mubr.msk.bf16.vlgmr.msra.gmra.mrb[52].mxu1 %vm906_vm2, %v1928_v37 }
 0x70d   : > { %6466 = vmatpush3.bf16.xpose.msra.mxu1 %v2037_v52  ;;  %6467 = vmatprep.mubr.msk.bf16.mxu1 %vm7385_vm1, %v9199_v0 }
 0x70e   : > { %6477 = vmatprep.subr.bf16.mxu1 %v9199_v0 }
 0x714   : > { %6468 = vmatmul.mubr.msk.bf16.vlgmr.msra.gmra.mrb[56].mxu1 %vm906_vm2, %v2030_v21 }
 0x715   : > { %6479 = vmatprep.mubr.msk.bf16.mxu1 %vm7385_vm1, %v9199_v0 }
 0x763   : > { %v7903_v54 = vpop.f32.mrb[28].mxu0 }
 0x764   : > { %v6427_v55 = vpop.f32.mrb[29].mxu0 }
 0x765   : > { %v7905_v56 = vpop.f32.mrb[30].mxu0 }
 0x766   : > { %v6428_v29 = vpop.f32.mrb[31].mxu0 }
 0x79e   : > { %v7909_v57 = vpop.f32.mrb[44].mxu1 }
 0x79f   : > { %v6433_v59 = vpop.f32.mrb[45].mxu1 }
 0x7a0   : > { %v7911_v61 = vpop.f32.mrb[46].mxu1 }
 0x7a1   : > { %v6434_v49 = vpop.f32.mrb[47].mxu1 }
 0x7a3   : > { %v7915_v4 = vpop.f32.mrb[32].mxu0 }
 0x7a4   : > { %v6439_v3 = vpop.f32.mrb[33].mxu0 }
 0x7a5   : > { %v7917_v5 = vpop.f32.mrb[34].mxu0 }
 0x7a6   : > { %v6440_v48 = vpop.f32.mrb[35].mxu0 }
 0x7ab   : > { %v1920_v7 = vpop.f32.mrb[36].mxu0 }
 0x7ac   : > { %v2080_v2 = vmul.f32 0.35355338, %v1920_v7  ;;  %v6451_v8 = vpop.f32.mrb[37].mxu0 }
 0x7ad   : > { %v1923_v11 = vpop.f32.mrb[38].mxu0 }
 0x7ae   : > { %v2081_v12 = vmul.f32 0.35355338, %v1923_v11  ;;  %v6452_v15 = vpop.f32.mrb[39].mxu0  ;;  %v2088_v16 = vsel %vm1103_vm3, %v2080_v2, -inf }
 0x7af   : > { %2089 = vmax.xlane.f32.xlu0 %v2088_v16 }
 0x7b0   : > { %v2091_v19 = vsel %vm1103_vm3, %v2081_v12, -inf }
 0x7b1   : > { %2092 = vmax.xlane.f32.xlu1 %v2091_v19 }
 0x7d4   : > { %v2022_v22 = vpop.f32.mrb[40].mxu0 }
 0x7d5   : > { %v6463_v26 = vpop.f32.mrb[41].mxu0  ;;  %v2084_v52 = vmul.f32 0.35355338, %v2022_v22 }
 0x7d6   : > { %v2025_v31 = vpop.f32.mrb[42].mxu0 }
 0x7d7   : > { %v2085_v32 = vmul.f32 0.35355338, %v2025_v31  ;;  %v7923_v35 = vpop.f32.mrb[48].mxu1  ;;  %v6464_v20 = vpop.f32.mrb[43].mxu0  ;;  %v2100_v48 = vsel %vm1103_vm3, %v2084_v52, -inf }
 0x7d8   : > { %9237 = vst [vmem:[#allocation13_spill] sm:$0xff] %v7923_v35  ;;  %v6445_v40 = vpop.f32.mrb[49].mxu1 }
 0x7d9   : > { %v7925_v33 = vpop.f32.mrb[50].mxu1  ;;  %v2103_v17 = vsel %vm1103_vm3, %v2085_v32, -inf }
 0x7da   : > { %9238 = vst [vmem:[#allocation14_spill] sm:$0xff] %v7925_v33  ;;  %v6446_v41 = vpop.f32.mrb[51].mxu1  ;;  %2104 = vmax.xlane.f32.xlu1 %v2103_v17 }
 0x7df   : > { %v1971_v43 = vpop.f32.mrb[52].mxu1 }
 0x7e0   : > { %v2082_v45 = vmul.f32 0.35355338, %v1971_v43  ;;  %v6457_v46 = vpop.f32.mrb[53].mxu1 }
 0x7e1   : > { %v1974_v28 = vpop.f32.mrb[54].mxu1 }
 0x7e2   : > { %v2083_v50 = vmul.f32 0.35355338, %v1974_v28  ;;  %v6458_v51 = vpop.f32.mrb[55].mxu1  ;;  %v2094_v47 = vsel %vm1103_vm3, %v2082_v45, -inf }
 0x7e3   : > { %2095 = vmax.xlane.f32.xlu0 %v2094_v47 }
 0x7e4   : > { %v2097_v21 = vsel %vm1103_vm3, %v2083_v50, -inf }
 0x7e7   : > { %v2073_v55 = vpop.f32.mrb[56].mxu1  ;;  %2098 = vmax.xlane.f32.xlu0 %v2097_v21 }
 0x7e8   : > { %v6469_v29 = vpop.f32.mrb[57].mxu1  ;;  %v2086_v49 = vmul.f32 0.35355338, %v2073_v55 }
 0x7e9   : > { %v2076_v59 = vpop.f32.mrb[58].mxu1 }
 0x7ea   : > { %v6470_v3 = vpop.f32.mrb[59].mxu1  ;;  %v2106_v7 = vsel %vm1103_vm3, %v2086_v49, -inf  ;;  %v7940_v8 = vmul.f32 0.35355338, %v2076_v59 }
 0x7eb   : > { %2101 = vmax.xlane.f32.xlu0 %v2100_v48  ;;  %2227 = vrot.lane.b32.xlu1 %v7657_v10, %s7387_s22 }
 0x7ec   : > { %v2109_v11 = vsel %vm1103_vm3, %v7940_v8, -inf }
 0x7ef   : > { %2107 = vmax.xlane.f32.xlu0 %v2106_v7  ;;  %2274 = vrot.lane.b32.xlu1 %v7669_v30, %s7387_s22 }
 0x805   : > { %2180 = vrot.lane.b32.xlu0 %v7661_v14, %s7387_s22 }
 0x813   : > { %2110 = vmax.xlane.f32.xlu1 %v2109_v11 }
 0x824   : > { %2321 = vrot.lane.b32.xlu1 %v7665_v24, %s7387_s22  ;;  %s7395_s22 = smov 24  }
 0x83c   : > { %v2090_v15 = vpop.xlane.xlu0 %2089 }
 0x83d   : > { %v2112_v16 = vsub.f32 %v2080_v2, %v2090_v15 }
 0x83e   : > { %v2093_v19 = vpop.xlane.xlu1 %2092 }
 0x83f   : > { %v2120_v22 = vmul.f32 1.442695, %v2112_v16  ;;  %v2113_v26 = vsub.f32 %v2081_v12, %v2093_v19 }
 0x841   : > { %7072 = vpow2.f32 %v2120_v22  ;;  %v2122_v31 = vmul.f32 1.442695, %v2113_v26 }
 0x843   : > { %7074 = vpow2.f32 %v2122_v31 }
 0x84b   : > { %v7946_v20 = vpop.eup %7072 }
 0x84c   : > { %v2136_v40 = vsel %vm1103_vm3, %v7946_v20, 0.0 }
 0x84d   : > { %v7950_v17 = vpop.eup %7074  ;;  %2137 = vadd.xlane.f32.xlu0 %v2136_v40 }
 0x84e   : > { %v2139_v41 = vsel %vm1103_vm3, %v7950_v17, 0.0 }
 0x84f   : > { %2140 = vadd.xlane.f32.xlu1 %v2139_v41 }
 0x867   : > { %v2105_v43 = vpop.xlane.xlu1 %2104 }
 0x868   : > { %v2117_v28 = vsub.f32 %v2085_v32, %v2105_v43 }
 0x86a   : > { %v2130_v55 = vmul.f32 1.442695, %v2117_v28 }
 0x86b   : > { %v2228_v2 = vpop.permute.xlu1 %2227 }
 0x86c   : > { %6478 = vmatpush3.bf16.msra.mxu1 %v2228_v2 }
 0x86d   : > { %6489 = vmatprep.subr.bf16.mxu1 %v9199_v0 }
 0x86f   : > { %v2275_v41 = vpop.permute.xlu1 %2274 }
 0x870   : > { %v2096_v12 = vpop.xlane.xlu0 %2095 }
 0x871   : > { %v2114_v46 = vsub.f32 %v2082_v45, %v2096_v12 }
 0x873   : > { %v2124_v51 = vmul.f32 1.442695, %v2114_v46 }
 0x874   : > { %v2099_v47 = vpop.xlane.xlu0 %2098 }
 0x875   : > { %7076 = vpow2.f32 %v2124_v51  ;;  %v2115_v21 = vsub.f32 %v2083_v50, %v2099_v47 }
 0x877   : > { %v2126_v29 = vmul.f32 1.442695, %v2115_v21 }
 0x878   : > { %v2102_v59 = vpop.xlane.xlu0 %2101 }
 0x879   : > { %7078 = vpow2.f32 %v2126_v29  ;;  %v2116_v3 = vsub.f32 %v2084_v52, %v2102_v59 }
 0x87a   : > { %7080 = vpow2.f32 %v2130_v55 }
 0x87b   : > { %v2128_v48 = vmul.f32 1.442695, %v2116_v3 }
 0x87c   : > { %v2108_v7 = vpop.xlane.xlu0 %2107 }
 0x87d   : > { %7082 = vpow2.f32 %v2128_v48  ;;  %v2118_v11 = vsub.f32 %v2086_v49, %v2108_v7 }
 0x87f   : > { %v7077_v15 = vpop.eup %7076  ;;  %v2132_v16 = vmul.f32 1.442695, %v2118_v11 }
 0x880   : > { %v2181_v19 = vpop.permute.xlu0 %2180  ;;  %v2142_v45 = vsel %vm1103_vm3, %v7077_v15, 0.0 }
 0x881   : > { %7084 = vpow2.f32 %v2132_v16  ;;  %2143 = vadd.xlane.f32.xlu0 %v2142_v45  ;;  %6472 = vmatpush3.bf16.msra.mxu0 %v2181_v19 }
 0x882   : > { %6483 = vmatprep.subr.bf16.mxu0 %v9199_v0 }
 0x883   : > { %v7079_v32 = vpop.eup %7078 }
 0x884   : > { %v2145_v50 = vsel %vm1103_vm3, %v7079_v32, 0.0  ;;  %v7081_v22 = vpop.eup %7080 }
 0x885   : > { %2146 = vadd.xlane.f32.xlu1 %v2145_v50  ;;  %v2151_v49 = vsel %vm1103_vm3, %v7081_v22, 0.0 }
 0x887   : > { %v7083_v52 = vpop.eup %7082 }
 0x888   : > { %v2148_v26 = vsel %vm1103_vm3, %v7083_v52, 0.0 }
 0x889   : > { %2149 = vadd.xlane.f32.xlu0 %v2148_v26  ;;  %2152 = vadd.xlane.f32.xlu1 %v2151_v49 }
 0x88b   : > { %v7960_v31 = vpop.eup %7084 }
 0x88c   : > { %v2154_v40 = vsel %vm1103_vm3, %v7960_v31, 0.0 }
 0x88d   : > { %2155 = vadd.xlane.f32.xlu0 %v2154_v40 }
 0x89a   : > { %2421 = vrot.lane.b32.xlu1 %v7671_v34, %s7388_s0 }
 0x8a0   : > { %v2111_v43 = vpop.xlane.xlu1 %2110 }
 0x8a1   : > { %v2119_v2 = vsub.f32 %v7940_v8, %v2111_v43 }
 0x8a3   : > { %2370 = vrot.lane.b32.xlu0 %v7673_v36, %s7388_s0  ;;  %v2134_v12 = vmul.f32 1.442695, %v2119_v2 }
 0x8a4   : > { %v2322_v8 = vpop.permute.xlu1 %2321 }
 0x8a5   : > { %7086 = vpow2.f32 %v2134_v12 }
 0x8a7   : > { %2368 = vrot.lane.b32.xlu0 %v7659_v13, %s7388_s0 }
 0x8ab   : > { %2419 = vrot.lane.b32.xlu0 %v7655_v9, %s7388_s0 }
 0x8af   : > { %2470 = vrot.lane.b32.xlu0 %v7667_v27, %s7388_s0  ;;  %v7975_v46 = vpop.eup %7086 }
 0x8b0   : > { %v2157_v28 = vsel %vm1103_vm3, %v7975_v46, 0.0 }
 0x8be   : > { %2158 = vadd.xlane.f32.xlu1 %v2157_v28 }
 0x8cf   : > { %2472 = vrot.lane.b32.xlu1 %v7680_v44, %s7388_s0 }
 0x8d3   : > { %2523 = vrot.lane.b32.xlu1 %v7678_v42, %s7388_s0 }
 0x8d7   : > { %2521 = vrot.lane.b32.xlu1 %v7663_v23, %s7388_s0 }
 0x8da   : > { %v2138_v51 = vpop.xlane.xlu0 %2137 }
 0x8db   : > { %7088 = vrcp.f32 %v2138_v51 }
 0x8dc   : > { %v2141_v47 = vpop.xlane.xlu1 %2140 }
 0x8dd   : > { %7090 = vrcp.f32 %v2141_v47 }
 0x8e5   : > { %v7089_v21 = vpop.eup %7088 }
 0x8e6   : > { %v2168_v29 = vmul.f32 %v7089_v21, %v7946_v20 }
 0x8e7   : > { %v7091_v55 = vpop.eup %7090 }
 0x8e8   : > { %v2169_v59 = vmul.f32 %v7091_v55, %v7950_v17 }
 0x8ea   : > { %v2176_v3 = vpack.c.bf16 %v2169_v59, %v2168_v29 }
 0x8ec   : > { %6474 = vmatmul.mubr.msk.bf16.vlgmr.msra.gmra.mrb[44].mxu0 %vm1103_vm3, %v2176_v3 }
 0x8ed   : > { %6484 = vmatpush3.bf16.msra.mxu0 %v2275_v41  ;;  %6485 = vmatprep.mubr.msk.bf16.mxu0 %vm7385_vm1, %v9199_v0 }
 0x8ee   : > { %6495 = vmatprep.subr.bf16.mxu0 %v9199_v0 }
 0x90e   : > { %v2144_v48 = vpop.xlane.xlu0 %2143 }
 0x90f   : > { %7092 = vrcp.f32 %v2144_v48 }
 0x912   : > { %v2147_v7 = vpop.xlane.xlu1 %2146 }
 0x913   : > { %7094 = vrcp.f32 %v2147_v7 }
 0x916   : > { %v2150_v11 = vpop.xlane.xlu0 %2149  ;;  %v2153_v16 = vpop.xlane.xlu1 %2152 }
 0x917   : > { %7096 = vrcp.f32 %v2150_v11 }
 0x918   : > { %7098 = vrcp.f32 %v2153_v16 }
 0x919   : > { %v7093_v20 = vpop.eup %7092 }
 0x91a   : > { %v2170_v17 = vmul.f32 %v7093_v20, %v7077_v15  ;;  %v2156_v50 = vpop.xlane.xlu0 %2155 }
 0x91b   : > { %7100 = vrcp.f32 %v2156_v50 }
 0x91d   : > { %v7095_v19 = vpop.eup %7094 }
 0x91e   : > { %v2171_v45 = vmul.f32 %v7095_v19, %v7079_v32  ;;  %v2371_v2 = vpop.permute.xlu0 %2370  ;;  %v2422_v32 = vpop.permute.xlu1 %2421 }
 0x91f   : > { %v2376_v28 = vsel %vm906_vm2, %v2371_v2, 0  ;;  %v2427_v48 = vsel %vm906_vm2, %v2422_v32, 0 }
 0x920   : > { %v2177_v26 = vpack.c.bf16 %v2171_v45, %v2170_v17 }
 0x921   : > { %v7097_v49 = vpop.eup %7096 }
 0x922   : > { %v7099_v40 = vpop.eup %7098  ;;  %v2172_v41 = vmul.f32 %v7097_v49, %v7083_v52  ;;  %6480 = vmatmul.mubr.msk.bf16.vlgmr.msra.gmra.mrb[60].mxu1 %vm1103_vm3, %v2177_v26  ;;  %v2369_v15 = vpop.permute.xlu0 %2368 }
 0x923   : > { %v2173_v43 = vmul.f32 %v7099_v40, %v7081_v22  ;;  %6490 = vmatpush3.bf16.msra.mxu1 %v2322_v8  ;;  %6491 = vmatprep.mubr.msk.bf16.mxu1 %vm7385_vm1, %v9199_v0 }
 0x924   : > { %6501 = vmatprep.subr.bf16.mxu1 %v9199_v0 }
 0x925   : > { %v2178_v12 = vpack.c.bf16 %v2173_v43, %v2172_v41  ;;  %v7101_v47 = vpop.eup %7100 }
 0x926   : > { %v2420_v51 = vpop.permute.xlu0 %2419  ;;  %v2174_v55 = vmul.f32 %v7101_v47, %v7960_v31 }
 0x927   : > { %6486 = vmatmul.mubr.msk.bf16.vlgmr.msra.gmra.mrb[48].mxu0 %vm1103_vm3, %v2178_v12 }
 0x928   : > { %6496 = vmatpush3.bf16.xpose.msra.mxu0 %v2376_v28  ;;  %6497 = vmatprep.mubr.msk.bf16.mxu0 %vm7385_vm1, %v9199_v0 }
 0x929   : > { %6507 = vmatprep.subr.bf16.mxu0 %v9199_v0 }
 0x92a   : > { %v2471_v29 = vpop.permute.xlu0 %2470 }
 0x92f   : > { %6498 = vmatmul.mubr.msk.bf16.vlgmr.msra.gmra.mrb[52].mxu0 %vm906_vm2, %v2369_v15 }
 0x930   : > { %6509 = vmatprep.mubr.msk.bf16.mxu0 %vm7385_vm1, %v9199_v0 }
 0x94b   : > { %v2159_v22 = vpop.xlane.xlu1 %2158 }
 0x94c   : > { %7102 = vrcp.f32 %v2159_v22 }
 0x94f   : > { %v2473_v52 = vpop.permute.xlu1 %2472 }
 0x950   : > { %v2478_v8 = vsel %vm906_vm2, %v2473_v52, 0 }
 0x951   : > { %6508 = vmatpush3.bf16.xpose.msra.mxu0 %v2478_v8 }
 0x952   : > { %6519 = vmatprep.subr.bf16.mxu0 %v9199_v0 }
 0x953   : > { %v2524_v31 = vpop.permute.xlu1 %2523 }
 0x954   : > { %v2529_v7 = vsel %vm906_vm2, %v2524_v31, 0 }
 0x956   : > { %v7103_v21 = vpop.eup %7102 }
 0x957   : > { %v2175_v59 = vmul.f32 %v7103_v21, %v7975_v46  ;;  %v2522_v46 = vpop.permute.xlu1 %2521 }
 0x958   : > { %6510 = vmatmul.mubr.msk.bf16.vlgmr.msra.gmra.mrb[56].mxu0 %vm906_vm2, %v2471_v29 }
 0x959   : > { %v2179_v3 = vpack.c.bf16 %v2175_v59, %v2174_v55  ;;  %6521 = vmatprep.mubr.msk.bf16.mxu0 %vm7385_vm1, %v9199_v0 }
 0x95b   : > { %6492 = vmatmul.mubr.msk.bf16.vlgmr.msra.gmra.mrb[64].mxu1 %vm1103_vm3, %v2179_v3 }
 0x95c   : > { %6502 = vmatpush3.bf16.xpose.msra.mxu1 %v2427_v48  ;;  %6503 = vmatprep.mubr.msk.bf16.mxu1 %vm7385_vm1, %v9199_v0 }
 0x95d   : > { %6513 = vmatprep.subr.bf16.mxu1 %v9199_v0 }
 0x963   : > { %6504 = vmatmul.mubr.msk.bf16.vlgmr.msra.gmra.mrb[68].mxu1 %vm906_vm2, %v2420_v51 }
 0x964   : > { %6514 = vmatpush3.bf16.xpose.msra.mxu1 %v2529_v7  ;;  %6515 = vmatprep.mubr.msk.bf16.mxu1 %vm7385_vm1, %v9199_v0 }
 0x965   : > { %6525 = vmatprep.subr.bf16.mxu1 %v9199_v0 }
 0x96b   : > { %6516 = vmatmul.mubr.msk.bf16.vlgmr.msra.gmra.mrb[72].mxu1 %vm906_vm2, %v2522_v46 }
 0x96c   : > { %6527 = vmatprep.mubr.msk.bf16.mxu1 %vm7385_vm1, %v9199_v0 }
 0x9bf   : > { %v8023_v11 = vpop.f32.mrb[44].mxu0 }
 0x9c0   : > { %v6475_v16 = vpop.f32.mrb[45].mxu0 }
 0x9c1   : > { %v8025_v20 = vpop.f32.mrb[46].mxu0 }
 0x9c2   : > { %v6476_v17 = vpop.f32.mrb[47].mxu0 }
 0x9f5   : > { %v8029_v45 = vpop.f32.mrb[60].mxu1 }
 0x9f6   : > { %v6481_v50 = vpop.f32.mrb[61].mxu1 }
 0x9f7   : > { %v8031_v26 = vpop.f32.mrb[62].mxu1 }
 0x9f8   : > { %v6482_v40 = vpop.f32.mrb[63].mxu1 }
 0x9fa   : > { %v8035_v41 = vpop.f32.mrb[48].mxu0 }
 0x9fb   : > { %v6487_v43 = vpop.f32.mrb[49].mxu0 }
 0x9fc   : > { %v8037_v2 = vpop.f32.mrb[50].mxu0 }
 0x9fd   : > { %v6488_v28 = vpop.f32.mrb[51].mxu0 }
 0xa02   : > { %v2412_v15 = vpop.f32.mrb[52].mxu0 }
 0xa03   : > { %v2572_v32 = vmul.f32 0.35355338, %v2412_v15  ;;  %v6499_v22 = vpop.f32.mrb[53].mxu0 }
 0xa04   : > { %v2415_v52 = vpop.f32.mrb[54].mxu0 }
 0xa05   : > { %v2573_v8 = vmul.f32 0.35355338, %v2415_v52  ;;  %v6500_v51 = vpop.f32.mrb[55].mxu0  ;;  %v2580_v47 = vsel %vm1103_vm3, %v2572_v32, -inf }
 0xa06   : > { %2581 = vmax.xlane.f32.xlu0 %v2580_v47 }
 0xa07   : > { %v2583_v21 = vsel %vm1103_vm3, %v2573_v8, -inf }
 0xa08   : > { %2584 = vmax.xlane.f32.xlu1 %v2583_v21 }
 0xa2b   : > { %v2514_v55 = vpop.f32.mrb[56].mxu0 }
 0xa2c   : > { %v6511_v29 = vpop.f32.mrb[57].mxu0  ;;  %v2576_v47 = vmul.f32 0.35355338, %v2514_v55 }
 0xa2d   : > { %v2517_v59 = vpop.f32.mrb[58].mxu0 }
 0xa2e   : > { %v2577_v3 = vmul.f32 0.35355338, %v2517_v59  ;;  %v8043_v48 = vpop.f32.mrb[64].mxu1  ;;  %v6512_v31 = vpop.f32.mrb[59].mxu0 }
 0xa2f   : > { %9239 = vst [vmem:[#allocation15_spill] sm:$0xff] %v8043_v48  ;;  %v6493_v7 = vpop.f32.mrb[65].mxu1 }
 0xa30   : > { %v8045_v46 = vpop.f32.mrb[66].mxu1  ;;  %v2595_v16 = vsel %vm1103_vm3, %v2577_v3, -inf }
 0xa31   : > { %9240 = vst [vmem:[#allocation16_spill] sm:$0xff] %v8045_v46  ;;  %v6494_v50 = vpop.f32.mrb[67].mxu1  ;;  %2596 = vmax.xlane.f32.xlu1 %v2595_v16  ;;  %v2592_v16 = vsel %vm1103_vm3, %v2576_v47, -inf }
 0xa36   : > { %v2463_v40 = vpop.f32.mrb[68].mxu1 }
 0xa37   : > { %v2574_v43 = vmul.f32 0.35355338, %v2463_v40  ;;  %v6505_v28 = vpop.f32.mrb[69].mxu1 }
 0xa38   : > { %v2466_v15 = vpop.f32.mrb[70].mxu1 }
 0xa39   : > { %v2575_v22 = vmul.f32 0.35355338, %v2466_v15  ;;  %v6506_v52 = vpop.f32.mrb[71].mxu1  ;;  %v2586_v51 = vsel %vm1103_vm3, %v2574_v43, -inf }
 0xa3a   : > { %2587 = vmax.xlane.f32.xlu0 %v2586_v51 }
 0xa3b   : > { %v2589_v21 = vsel %vm1103_vm3, %v2575_v22, -inf }
 0xa3e   : > { %v2565_v29 = vpop.f32.mrb[72].mxu1  ;;  %2590 = vmax.xlane.f32.xlu0 %v2589_v21 }
 0xa3f   : > { %v6517_v59 = vpop.f32.mrb[73].mxu1  ;;  %v2578_v7 = vmul.f32 0.35355338, %v2565_v29 }
 0xa40   : > { %v2568_v31 = vpop.f32.mrb[74].mxu1 }
 0xa41   : > { %v6518_v17 = vpop.f32.mrb[75].mxu1  ;;  %v2598_v50 = vsel %vm1103_vm3, %v2578_v7, -inf  ;;  %v8060_v55 = vmul.f32 0.35355338, %v2568_v31 }
 0xa42   : > { %2593 = vmax.xlane.f32.xlu0 %v2592_v16  ;;  %2719 = vrot.lane.b32.xlu1 %v7657_v10, %s7388_s0 }
 0xa43   : > { %v2601_v17 = vsel %vm1103_vm3, %v8060_v55, -inf }
 0xa46   : > { %2599 = vmax.xlane.f32.xlu0 %v2598_v50  ;;  %2766 = vrot.lane.b32.xlu1 %v7669_v30, %s7388_s0 }
 0xa5c   : > { %2672 = vrot.lane.b32.xlu0 %v7661_v14, %s7388_s0 }
 0xa6a   : > { %2602 = vmax.xlane.f32.xlu1 %v2601_v17 }
 0xa7b   : > { %2813 = vrot.lane.b32.xlu1 %v7665_v24, %s7388_s0  ;;  %s9221_s0 = smov 32  }
 0xa93   : > { %v2582_v40 = vpop.xlane.xlu0 %2581 }
 0xa94   : > { %v2604_v28 = vsub.f32 %v2572_v32, %v2582_v40 }
 0xa95   : > { %v2585_v15 = vpop.xlane.xlu1 %2584 }
 0xa96   : > { %v2612_v52 = vmul.f32 1.442695, %v2604_v28  ;;  %v2605_v51 = vsub.f32 %v2573_v8, %v2585_v15 }
 0xa98   : > { %7104 = vpow2.f32 %v2612_v52  ;;  %v2614_v21 = vmul.f32 1.442695, %v2605_v51 }
 0xa9a   : > { %7106 = vpow2.f32 %v2614_v21 }
 0xaa2   : > { %v8066_v29 = vpop.eup %7104 }
 0xaa3   : > { %v2628_v59 = vsel %vm1103_vm3, %v8066_v29, 0.0 }
 0xaa4   : > { %v8070_v31 = vpop.eup %7106  ;;  %2629 = vadd.xlane.f32.xlu0 %v2628_v59 }
 0xaa5   : > { %v2631_v16 = vsel %vm1103_vm3, %v8070_v31, 0.0 }
 0xaa6   : > { %2632 = vadd.xlane.f32.xlu1 %v2631_v16 }
 0xabe   : > { %v2597_v50 = vpop.xlane.xlu1 %2596 }
 0xabf   : > { %v2609_v40 = vsub.f32 %v2577_v3, %v2597_v50 }
 0xac1   : > { %v2622_v51 = vmul.f32 1.442695, %v2609_v40 }
 0xac2   : > { %v2720_v32 = vpop.permute.xlu1 %2719 }
 0xac3   : > { %6526 = vmatpush3.bf16.msra.mxu1 %v2720_v32 }
 0xac4   : > { %6537 = vmatprep.subr.bf16.mxu1 %v9199_v0 }
 0xac7   : > { %v2588_v8 = vpop.xlane.xlu0 %2587 }
 0xac8   : > { %v2606_v17 = vsub.f32 %v2574_v43, %v2588_v8 }
 0xaca   : > { %v2616_v28 = vmul.f32 1.442695, %v2606_v17 }
 0xacb   : > { %v2591_v15 = vpop.xlane.xlu0 %2590 }
 0xacc   : > { %7108 = vpow2.f32 %v2616_v28  ;;  %v2607_v52 = vsub.f32 %v2575_v22, %v2591_v15 }
 0xace   : > { %v2618_v21 = vmul.f32 1.442695, %v2607_v52 }
 0xacf   : > { %v2594_v37 = vpop.xlane.xlu0 %2593 }
 0xad0   : > { %7110 = vpow2.f32 %v2618_v21  ;;  %v2608_v59 = vsub.f32 %v2576_v47, %v2594_v37 }
 0xad1   : > { %7112 = vpow2.f32 %v2622_v51 }
 0xad2   : > { %v2620_v49 = vmul.f32 1.442695, %v2608_v59 }
 0xad3   : > { %v2600_v16 = vpop.xlane.xlu0 %2599 }
 0xad4   : > { %7114 = vpow2.f32 %v2620_v49  ;;  %v2610_v63 = vsub.f32 %v2578_v7, %v2600_v16 }
 0xad6   : > { %v7109_v32 = vpop.eup %7108  ;;  %v2624_v12 = vmul.f32 1.442695, %v2610_v63 }
 0xad7   : > { %v2673_v6 = vpop.permute.xlu0 %2672  ;;  %v2634_v43 = vsel %vm1103_vm3, %v7109_v32, 0.0 }
 0xad8   : > { %7116 = vpow2.f32 %v2624_v12  ;;  %2635 = vadd.xlane.f32.xlu0 %v2634_v43  ;;  %6520 = vmatpush3.bf16.msra.mxu0 %v2673_v6  ;;  %v2767_v6 = vpop.permute.xlu1 %2766 }
 0xad9   : > { %6531 = vmatprep.subr.bf16.mxu0 %v9199_v0 }
 0xada   : > { %v7111_v3 = vpop.eup %7110 }
 0xadb   : > { %v2637_v22 = vsel %vm1103_vm3, %v7111_v3, 0.0  ;;  %v7113_v50 = vpop.eup %7112 }
 0xadc   : > { %2638 = vadd.xlane.f32.xlu1 %v2637_v22  ;;  %v2643_v49 = vsel %vm1103_vm3, %v7113_v50, 0.0 }
 0xade   : > { %v7115_v37 = vpop.eup %7114 }
 0xadf   : > { %v2640_v47 = vsel %vm1103_vm3, %v7115_v37, 0.0 }
 0xae0   : > { %2641 = vadd.xlane.f32.xlu0 %v2640_v47  ;;  %2644 = vadd.xlane.f32.xlu1 %v2643_v49 }
 0xae2   : > { %v8080_v63 = vpop.eup %7116 }
 0xae3   : > { %v2646_v12 = vsel %vm1103_vm3, %v8080_v63, 0.0 }
 0xae4   : > { %2647 = vadd.xlane.f32.xlu0 %v2646_v12 }
 0xaf1   : > { %2913 = vrot.lane.b32.xlu1 %v7671_v34, %s7389_s23 }
 0xaf7   : > { %v2603_v7 = vpop.xlane.xlu1 %2602 }
 0xaf8   : > { %v2611_v8 = vsub.f32 %v8060_v55, %v2603_v7 }
 0xafa   : > { %2862 = vrot.lane.b32.xlu0 %v7673_v36, %s7389_s23  ;;  %v2626_v17 = vmul.f32 1.442695, %v2611_v8 }
 0xafb   : > { %v2814_v55 = vpop.permute.xlu1 %2813 }
 0xafc   : > { %7118 = vpow2.f32 %v2626_v17 }
 0xafe   : > { %2860 = vrot.lane.b32.xlu0 %v7659_v13, %s7389_s23 }
 0xb02   : > { %2911 = vrot.lane.b32.xlu0 %v7655_v9, %s7389_s23 }
 0xb06   : > { %2962 = vrot.lane.b32.xlu0 %v7667_v27, %s7389_s23  ;;  %v8095_v40 = vpop.eup %7118 }
 0xb07   : > { %v2649_v28 = vsel %vm1103_vm3, %v8095_v40, 0.0 }
 0xb15   : > { %2650 = vadd.xlane.f32.xlu1 %v2649_v28 }
 0xb26   : > { %2964 = vrot.lane.b32.xlu1 %v7680_v44, %s7389_s23 }
 0xb2a   : > { %3015 = vrot.lane.b32.xlu1 %v7678_v42, %s7389_s23 }
 0xb2e   : > { %3013 = vrot.lane.b32.xlu1 %v7663_v23, %s7389_s23 }
 0xb31   : > { %v2630_v15 = vpop.xlane.xlu0 %2629 }
 0xb32   : > { %7120 = vrcp.f32 %v2630_v15 }
 0xb33   : > { %v2633_v52 = vpop.xlane.xlu1 %2632 }
 0xb34   : > { %7122 = vrcp.f32 %v2633_v52 }
 0xb3c   : > { %v7121_v51 = vpop.eup %7120 }
 0xb3d   : > { %v2660_v59 = vmul.f32 %v7121_v51, %v8066_v29 }
 0xb3e   : > { %v7123_v21 = vpop.eup %7122 }
 0xb3f   : > { %v2661_v16 = vmul.f32 %v7123_v21, %v8070_v31 }
 0xb41   : > { %v2668_v43 = vpack.c.bf16 %v2661_v16, %v2660_v59 }
 0xb43   : > { %6522 = vmatmul.mubr.msk.bf16.vlgmr.msra.gmra.mrb[60].mxu0 %vm1103_vm3, %v2668_v43 }
 0xb44   : > { %6532 = vmatpush3.bf16.msra.mxu0 %v2767_v6  ;;  %6533 = vmatprep.mubr.msk.bf16.mxu0 %vm7385_vm1, %v9199_v0 }
 0xb45   : > { %6543 = vmatprep.subr.bf16.mxu0 %v9199_v0 }
 0xb65   : > { %v2636_v22 = vpop.xlane.xlu0 %2635 }
 0xb66   : > { %7124 = vrcp.f32 %v2636_v22 }
 0xb69   : > { %v2639_v47 = vpop.xlane.xlu1 %2638 }
 0xb6a   : > { %7126 = vrcp.f32 %v2639_v47 }
 0xb6d   : > { %v2642_v49 = vpop.xlane.xlu0 %2641  ;;  %v2645_v12 = vpop.xlane.xlu1 %2644 }
 0xb6e   : > { %7128 = vrcp.f32 %v2642_v49 }
 0xb6f   : > { %7130 = vrcp.f32 %v2645_v12 }
 0xb70   : > { %v7125_v29 = vpop.eup %7124 }
 0xb71   : > { %v2662_v31 = vmul.f32 %v7125_v29, %v7109_v32  ;;  %v2648_v17 = vpop.xlane.xlu0 %2647 }
 0xb72   : > { %7132 = vrcp.f32 %v2648_v17 }
 0xb74   : > { %v7127_v7 = vpop.eup %7126 }
 0xb75   : > { %v2663_v8 = vmul.f32 %v7127_v7, %v7111_v3  ;;  %v2863_v21 = vpop.permute.xlu0 %2862  ;;  %v2914_v3 = vpop.permute.xlu1 %2913 }
 0xb76   : > { %v2868_v16 = vsel %vm906_vm2, %v2863_v21, 0 }
 0xb77   : > { %v2669_v28 = vpack.c.bf16 %v2663_v8, %v2662_v31  ;;  %v2919_v31 = vsel %vm906_vm2, %v2914_v3, 0 }
 0xb78   : > { %v7129_v6 = vpop.eup %7128 }
 0xb79   : > { %v7131_v15 = vpop.eup %7130  ;;  %v2664_v52 = vmul.f32 %v7129_v6, %v7115_v37  ;;  %6528 = vmatmul.mubr.msk.bf16.vlgmr.msra.gmra.mrb[76].mxu1 %vm1103_vm3, %v2669_v28  ;;  %v2861_v32 = vpop.permute.xlu0 %2860 }
 0xb7a   : > { %v2665_v51 = vmul.f32 %v7131_v15, %v7113_v50  ;;  %6538 = vmatpush3.bf16.msra.mxu1 %v2814_v55  ;;  %6539 = vmatprep.mubr.msk.bf16.mxu1 %vm7385_vm1, %v9199_v0 }
 0xb7b   : > { %6549 = vmatprep.subr.bf16.mxu1 %v9199_v0 }
 0xb7c   : > { %v2670_v59 = vpack.c.bf16 %v2665_v51, %v2664_v52  ;;  %v7133_v22 = vpop.eup %7132 }
 0xb7d   : > { %v2912_v43 = vpop.permute.xlu0 %2911  ;;  %v2666_v49 = vmul.f32 %v7133_v22, %v8080_v63 }
 0xb7e   : > { %6534 = vmatmul.mubr.msk.bf16.vlgmr.msra.gmra.mrb[64].mxu0 %vm1103_vm3, %v2670_v59 }
 0xb7f   : > { %6544 = vmatpush3.bf16.xpose.msra.mxu0 %v2868_v16  ;;  %6545 = vmatprep.mubr.msk.bf16.mxu0 %vm7385_vm1, %v9199_v0 }
 0xb80   : > { %6555 = vmatprep.subr.bf16.mxu0 %v9199_v0 }
 0xb81   : > { %v2963_v12 = vpop.permute.xlu0 %2962 }
 0xb86   : > { %6546 = vmatmul.mubr.msk.bf16.vlgmr.msra.gmra.mrb[68].mxu0 %vm906_vm2, %v2861_v32 }
 0xb87   : > { %6557 = vmatprep.mubr.msk.bf16.mxu0 %vm7385_vm1, %v9199_v0 }
 0xba2   : > { %v2651_v50 = vpop.xlane.xlu1 %2650 }
 0xba3   : > { %7134 = vrcp.f32 %v2651_v50 }
 0xba6   : > { %v2965_v37 = vpop.permute.xlu1 %2964 }
 0xba7   : > { %v2970_v55 = vsel %vm906_vm2, %v2965_v37, 0 }
 0xba8   : > { %6556 = vmatpush3.bf16.xpose.msra.mxu0 %v2970_v55 }
 0xba9   : > { %6567 = vmatprep.subr.bf16.mxu0 %v9199_v0 }
 0xbaa   : > { %v3016_v63 = vpop.permute.xlu1 %3015 }
 0xbab   : > { %v3021_v8 = vsel %vm906_vm2, %v3016_v63, 0 }
 0xbad   : > { %v7135_v47 = vpop.eup %7134 }
 0xbae   : > { %v2667_v29 = vmul.f32 %v7135_v47, %v8095_v40  ;;  %v3014_v40 = vpop.permute.xlu1 %3013 }
 0xbaf   : > { %6558 = vmatmul.mubr.msk.bf16.vlgmr.msra.gmra.mrb[72].mxu0 %vm906_vm2, %v2963_v12 }
 0xbb0   : > { %v2671_v7 = vpack.c.bf16 %v2667_v29, %v2666_v49  ;;  %6569 = vmatprep.mubr.msk.bf16.mxu0 %vm7385_vm1, %v9199_v0 }
 0xbb2   : > { %6540 = vmatmul.mubr.msk.bf16.vlgmr.msra.gmra.mrb[80].mxu1 %vm1103_vm3, %v2671_v7 }
 0xbb3   : > { %6550 = vmatpush3.bf16.xpose.msra.mxu1 %v2919_v31  ;;  %6551 = vmatprep.mubr.msk.bf16.mxu1 %vm7385_vm1, %v9199_v0 }
 0xbb4   : > { %6561 = vmatprep.subr.bf16.mxu1 %v9199_v0 }
 0xbba   : > { %6552 = vmatmul.mubr.msk.bf16.vlgmr.msra.gmra.mrb[84].mxu1 %vm906_vm2, %v2912_v43 }
 0xbbb   : > { %6562 = vmatpush3.bf16.xpose.msra.mxu1 %v3021_v8  ;;  %6563 = vmatprep.mubr.msk.bf16.mxu1 %vm7385_vm1, %v9199_v0 }
 0xbbc   : > { %6573 = vmatprep.subr.bf16.mxu1 %v9199_v0 }
 0xbc2   : > { %6564 = vmatmul.mubr.msk.bf16.vlgmr.msra.gmra.mrb[88].mxu1 %vm906_vm2, %v3014_v40 }
 0xbc3   : > { %6575 = vmatprep.mubr.msk.bf16.mxu1 %vm7385_vm1, %v9199_v0 }
 0xc16   : > { %v8143_v17 = vpop.f32.mrb[60].mxu0 }
 0xc17   : > { %v6523_v28 = vpop.f32.mrb[61].mxu0 }
 0xc18   : > { %v8145_v6 = vpop.f32.mrb[62].mxu0 }
 0xc19   : > { %v6524_v52 = vpop.f32.mrb[63].mxu0 }
 0xc4c   : > { %v8149_v51 = vpop.f32.mrb[76].mxu1 }
 0xc4d   : > { %v6529_v21 = vpop.f32.mrb[77].mxu1 }
 0xc4e   : > { %v8151_v59 = vpop.f32.mrb[78].mxu1 }
 0xc4f   : > { %v6530_v32 = vpop.f32.mrb[79].mxu1 }
 0xc51   : > { %v8155_v3 = vpop.f32.mrb[64].mxu0 }
 0xc52   : > { %v6535_v50 = vpop.f32.mrb[65].mxu0 }
 0xc53   : > { %v8157_v37 = vpop.f32.mrb[66].mxu0 }
 0xc54   : > { %v6536_v43 = vpop.f32.mrb[67].mxu0 }
 0xc59   : > { %v2904_v22 = vpop.f32.mrb[68].mxu0 }
 0xc5a   : > { %v3064_v47 = vmul.f32 0.35355338, %v2904_v22  ;;  %v6547_v49 = vpop.f32.mrb[69].mxu0 }
 0xc5b   : > { %v2907_v12 = vpop.f32.mrb[70].mxu0 }
 0xc5c   : > { %v3065_v29 = vmul.f32 0.35355338, %v2907_v12  ;;  %v6548_v7 = vpop.f32.mrb[71].mxu0  ;;  %v3072_v31 = vsel %vm1103_vm3, %v3064_v47, -inf }
 0xc5d   : > { %3073 = vmax.xlane.f32.xlu0 %v3072_v31 }
 0xc5e   : > { %v3075_v63 = vsel %vm1103_vm3, %v3065_v29, -inf }
 0xc5f   : > { %3076 = vmax.xlane.f32.xlu1 %v3075_v63 }
 0xc82   : > { %v3006_v8 = vpop.f32.mrb[72].mxu0 }
 0xc83   : > { %v6559_v40 = vpop.f32.mrb[73].mxu0 }
 0xc84   : > { %v3009_v28 = vpop.f32.mrb[74].mxu0 }
 0xc85   : > { %v3069_v52 = vmul.f32 0.35355338, %v3009_v28  ;;  %v8163_v21 = vpop.f32.mrb[80].mxu1  ;;  %v6560_v32 = vpop.f32.mrb[75].mxu0 }
 0xc86   : > { %9241 = vst [vmem:[#allocation17_spill] sm:$0xff] %v8163_v21  ;;  %v6541_v50 = vpop.f32.mrb[81].mxu1  ;;  %v3068_v32 = vmul.f32 0.35355338, %v3006_v8 }
 0xc87   : > { %v8165_v43 = vpop.f32.mrb[82].mxu1  ;;  %v3087_v22 = vsel %vm1103_vm3, %v3069_v52, -inf }
 0xc88   : > { %9242 = vst [vmem:[#allocation18_spill] sm:$0xff] %v8165_v43  ;;  %v6542_v12 = vpop.f32.mrb[83].mxu1  ;;  %3088 = vmax.xlane.f32.xlu1 %v3087_v22  ;;  %v3084_v22 = vsel %vm1103_vm3, %v3068_v32, -inf }
 0xc8d   : > { %v2955_v7 = vpop.f32.mrb[84].mxu1 }
 0xc8e   : > { %v3066_v31 = vmul.f32 0.35355338, %v2955_v7  ;;  %v6553_v63 = vpop.f32.mrb[85].mxu1 }
 0xc8f   : > { %v2958_v16 = vpop.f32.mrb[86].mxu1 }
 0xc90   : > { %v3067_v40 = vmul.f32 0.35355338, %v2958_v16  ;;  %v6554_v55 = vpop.f32.mrb[87].mxu1  ;;  %v3078_v28 = vsel %vm1103_vm3, %v3066_v31, -inf }
 0xc91   : > { %3079 = vmax.xlane.f32.xlu0 %v3078_v28 }
 0xc92   : > { %v3081_v50 = vsel %vm1103_vm3, %v3067_v40, -inf }
 0xc95   : > { %v3057_v15 = vpop.f32.mrb[88].mxu1  ;;  %3082 = vmax.xlane.f32.xlu0 %v3081_v50 }
 0xc96   : > { %v6565_v19 = vpop.f32.mrb[89].mxu1  ;;  %v3070_v0 = vmul.f32 0.35355338, %v3057_v15 }
 0xc97   : > { %v3060_v53 = vpop.f32.mrb[90].mxu1 }
 0xc98   : > { %v6566_v49 = vpop.f32.mrb[91].mxu1  ;;  %v3090_v16 = vsel %vm1103_vm3, %v3070_v0, -inf  ;;  %v8180_v55 = vmul.f32 0.35355338, %v3060_v53 }
 0xc99   : > { %3085 = vmax.xlane.f32.xlu0 %v3084_v22  ;;  %3211 = vrot.lane.b32.xlu1 %v7657_v10, %s7389_s23 }
 0xc9a   : > { %v3093_v19 = vsel %vm1103_vm3, %v8180_v55, -inf }
 0xc9d   : > { %3091 = vmax.xlane.f32.xlu0 %v3090_v16  ;;  %3258 = vrot.lane.b32.xlu1 %v7669_v30, %s7389_s23 }
 0xcb3   : > { %3164 = vrot.lane.b32.xlu0 %v7661_v14, %s7389_s23 }
 0xcc1   : > { %3094 = vmax.xlane.f32.xlu1 %v3093_v19  ;;  %v9243_v19 = vmov 0.0  }
 0xcd2   : > { %3305 = vrot.lane.b32.xlu1 %v7665_v24, %s7389_s23  ;;  %s9219_s23 = smov 40  }
 0xcea   : > { %v3074_v15 = vpop.xlane.xlu0 %3073 }
 0xceb   : > { %v3096_v8 = vsub.f32 %v3064_v47, %v3074_v15 }
 0xcec   : > { %v3077_v49 = vpop.xlane.xlu1 %3076 }
 0xced   : > { %v3104_v12 = vmul.f32 1.442695, %v3096_v8  ;;  %v3097_v7 = vsub.f32 %v3065_v29, %v3077_v49 }
 0xcef   : > { %7136 = vpow2.f32 %v3104_v12  ;;  %v3106_v63 = vmul.f32 1.442695, %v3097_v7 }
 0xcf1   : > { %7138 = vpow2.f32 %v3106_v63 }
 0xcf9   : > { %v8186_v28 = vpop.eup %7136 }
 0xcfa   : > { %v3120_v53 = vsel %vm1103_vm3, %v8186_v28, 0.0 }
 0xcfb   : > { %v8190_v50 = vpop.eup %7138  ;;  %3121 = vadd.xlane.f32.xlu0 %v3120_v53 }
 0xcfc   : > { %v3123_v22 = vsel %vm1103_vm3, %v8190_v50, 0.0 }
 0xcfd   : > { %3124 = vadd.xlane.f32.xlu1 %v3123_v22 }
 0xd15   : > { %v3089_v16 = vpop.xlane.xlu1 %3088 }
 0xd16   : > { %v3101_v8 = vsub.f32 %v3069_v52, %v3089_v16 }
 0xd18   : > { %v3114_v63 = vmul.f32 1.442695, %v3101_v8 }
 0xd19   : > { %v3212_v47 = vpop.permute.xlu1 %3211 }
 0xd1a   : > { %6574 = vmatpush3.bf16.msra.mxu1 %v3212_v47 }
 0xd1b   : > { %6585 = vmatprep.subr.bf16.mxu1 %v9243_v19 }
 0xd1e   : > { %v3080_v29 = vpop.xlane.xlu0 %3079 }
 0xd1f   : > { %v3098_v15 = vsub.f32 %v3066_v31, %v3080_v29 }
 0xd21   : > { %v3108_v49 = vmul.f32 1.442695, %v3098_v15 }
 0xd22   : > { %v3083_v12 = vpop.xlane.xlu0 %3082 }
 0xd23   : > { %7140 = vpow2.f32 %v3108_v49  ;;  %v3099_v7 = vsub.f32 %v3067_v40, %v3083_v12 }
 0xd25   : > { %v3110_v62 = vmul.f32 1.442695, %v3099_v7 }
 0xd26   : > { %v3086_v1 = vpop.xlane.xlu0 %3085 }
 0xd27   : > { %7142 = vpow2.f32 %v3110_v62  ;;  %v3100_v53 = vsub.f32 %v3068_v32, %v3086_v1 }
 0xd28   : > { %7144 = vpow2.f32 %v3114_v63 }
 0xd29   : > { %v3112_v60 = vmul.f32 1.442695, %v3100_v53 }
 0xd2a   : > { %v3092_v22 = vpop.xlane.xlu0 %3091 }
 0xd2b   : > { %7146 = vpow2.f32 %v3112_v60  ;;  %v3102_v39 = vsub.f32 %v3070_v0, %v3092_v22 }
 0xd2d   : > { %v7141_v47 = vpop.eup %7140  ;;  %v3116_v38 = vmul.f32 1.442695, %v3102_v39 }
 0xd2e   : > { %v3165_v58 = vpop.permute.xlu0 %3164  ;;  %v3126_v31 = vsel %vm1103_vm3, %v7141_v47, 0.0 }
 0xd2f   : > { %7148 = vpow2.f32 %v3116_v38  ;;  %3127 = vadd.xlane.f32.xlu0 %v3126_v31  ;;  %6568 = vmatpush3.bf16.msra.mxu0 %v3165_v58  ;;  %v3259_v58 = vpop.permute.xlu1 %3258 }
 0xd30   : > { %6579 = vmatprep.subr.bf16.mxu0 %v9243_v19 }
 0xd31   : > { %v7143_v52 = vpop.eup %7142 }
 0xd32   : > { %v3129_v40 = vsel %vm1103_vm3, %v7143_v52, 0.0  ;;  %v7145_v62 = vpop.eup %7144 }
 0xd33   : > { %3130 = vadd.xlane.f32.xlu1 %v3129_v40  ;;  %v3135_v0 = vsel %vm1103_vm3, %v7145_v62, 0.0 }
 0xd35   : > { %v7147_v1 = vpop.eup %7146 }
 0xd36   : > { %v3132_v32 = vsel %vm1103_vm3, %v7147_v1, 0.0 }
 0xd37   : > { %3133 = vadd.xlane.f32.xlu0 %v3132_v32  ;;  %3136 = vadd.xlane.f32.xlu1 %v3135_v0 }
 0xd39   : > { %v8200_v60 = vpop.eup %7148 }
 0xd3a   : > { %v3138_v38 = vsel %vm1103_vm3, %v8200_v60, 0.0 }
 0xd3b   : > { %3139 = vadd.xlane.f32.xlu0 %v3138_v38 }
 0xd48   : > { %3405 = vrot.lane.b32.xlu1 %v7671_v34, %s7390_s30 }
 0xd4e   : > { %v3095_v39 = vpop.xlane.xlu1 %3094 }
 0xd4f   : > { %v3103_v16 = vsub.f32 %v8180_v55, %v3095_v39 }
 0xd51   : > { %3354 = vrot.lane.b32.xlu0 %v7673_v36, %s7390_s30  ;;  %v3118_v29 = vmul.f32 1.442695, %v3103_v16 }
 0xd52   : > { %v3306_v55 = vpop.permute.xlu1 %3305 }
 0xd53   : > { %7150 = vpow2.f32 %v3118_v29 }
 0xd55   : > { %3352 = vrot.lane.b32.xlu0 %v7659_v13, %s7390_s30 }
 0xd59   : > { %3403 = vrot.lane.b32.xlu0 %v7655_v9, %s7390_s30 }
 0xd5d   : > { %3454 = vrot.lane.b32.xlu0 %v7667_v27, %s7390_s30  ;;  %v8215_v15 = vpop.eup %7150 }
 0xd5e   : > { %v3141_v8 = vsel %vm1103_vm3, %v8215_v15, 0.0 }
 0xd6c   : > { %3142 = vadd.xlane.f32.xlu1 %v3141_v8 }
 0xd7d   : > { %3456 = vrot.lane.b32.xlu1 %v7680_v44, %s7390_s30 }
 0xd81   : > { %3507 = vrot.lane.b32.xlu1 %v7678_v42, %s7390_s30 }
 0xd85   : > { %3505 = vrot.lane.b32.xlu1 %v7663_v23, %s7390_s30 }
 0xd88   : > { %v3122_v49 = vpop.xlane.xlu0 %3121 }
 0xd89   : > { %7152 = vrcp.f32 %v3122_v49 }
 0xd8a   : > { %v3125_v12 = vpop.xlane.xlu1 %3124 }
 0xd8b   : > { %7154 = vrcp.f32 %v3125_v12 }
 0xd93   : > { %v7153_v7 = vpop.eup %7152 }
 0xd94   : > { %v3152_v53 = vmul.f32 %v7153_v7, %v8186_v28 }
 0xd95   : > { %v7155_v63 = vpop.eup %7154 }
 0xd96   : > { %v3153_v22 = vmul.f32 %v7155_v63, %v8190_v50 }
 0xd98   : > { %v3160_v31 = vpack.c.bf16 %v3153_v22, %v3152_v53 }
 0xd9a   : > { %6570 = vmatmul.mubr.msk.bf16.vlgmr.msra.gmra.mrb[76].mxu0 %vm1103_vm3, %v3160_v31 }
 0xd9b   : > { %6580 = vmatpush3.bf16.msra.mxu0 %v3259_v58  ;;  %6581 = vmatprep.mubr.msk.bf16.mxu0 %vm7385_vm1, %v9243_v19 }
 0xd9c   : > { %6591 = vmatprep.subr.bf16.mxu0 %v9243_v19 }
 0xdbc   : > { %v3128_v40 = vpop.xlane.xlu0 %3127 }
 0xdbd   : > { %7156 = vrcp.f32 %v3128_v40 }
 0xdc0   : > { %v3131_v32 = vpop.xlane.xlu1 %3130 }
 0xdc1   : > { %7158 = vrcp.f32 %v3131_v32 }
 0xdc4   : > { %v3134_v0 = vpop.xlane.xlu0 %3133  ;;  %v3137_v38 = vpop.xlane.xlu1 %3136 }
 0xdc5   : > { %7160 = vrcp.f32 %v3134_v0 }
 0xdc6   : > { %7162 = vrcp.f32 %v3137_v38 }
 0xdc7   : > { %v7157_v28 = vpop.eup %7156 }
 0xdc8   : > { %v3154_v50 = vmul.f32 %v7157_v28, %v7141_v47  ;;  %v3140_v29 = vpop.xlane.xlu0 %3139 }
 0xdc9   : > { %7164 = vrcp.f32 %v3140_v29 }
 0xdcb   : > { %v7159_v39 = vpop.eup %7158 }
 0xdcc   : > { %v3155_v16 = vmul.f32 %v7159_v39, %v7143_v52  ;;  %v3355_v63 = vpop.permute.xlu0 %3354  ;;  %v3406_v52 = vpop.permute.xlu1 %3405 }
 0xdcd   : > { %v3360_v22 = vsel %vm906_vm2, %v3355_v63, 0 }
 0xdce   : > { %v3161_v8 = vpack.c.bf16 %v3155_v16, %v3154_v50  ;;  %v3411_v50 = vsel %vm906_vm2, %v3406_v52, 0 }
 0xdcf   : > { %v7161_v58 = vpop.eup %7160 }
 0xdd0   : > { %v7163_v49 = vpop.eup %7162  ;;  %v3156_v12 = vmul.f32 %v7161_v58, %v7147_v1  ;;  %6576 = vmatmul.mubr.msk.bf16.vlgmr.msra.gmra.mrb[92].mxu1 %vm1103_vm3, %v3161_v8  ;;  %v3353_v47 = vpop.permute.xlu0 %3352 }
 0xdd1   : > { %v3157_v7 = vmul.f32 %v7163_v49, %v7145_v62  ;;  %6586 = vmatpush3.bf16.msra.mxu1 %v3306_v55  ;;  %6587 = vmatprep.mubr.msk.bf16.mxu1 %vm7385_vm1, %v9243_v19 }
 0xdd2   : > { %6597 = vmatprep.subr.bf16.mxu1 %v9243_v19 }
 0xdd3   : > { %v3162_v53 = vpack.c.bf16 %v3157_v7, %v3156_v12  ;;  %v7165_v40 = vpop.eup %7164 }
 0xdd4   : > { %v3404_v31 = vpop.permute.xlu0 %3403  ;;  %v3158_v0 = vmul.f32 %v7165_v40, %v8200_v60 }
 0xdd5   : > { %6582 = vmatmul.mubr.msk.bf16.vlgmr.msra.gmra.mrb[80].mxu0 %vm1103_vm3, %v3162_v53 }
 0xdd6   : > { %6592 = vmatpush3.bf16.xpose.msra.mxu0 %v3360_v22  ;;  %6593 = vmatprep.mubr.msk.bf16.mxu0 %vm7385_vm1, %v9243_v19 }
 0xdd7   : > { %6603 = vmatprep.subr.bf16.mxu0 %v9243_v19 }
 0xdd8   : > { %v3455_v38 = vpop.permute.xlu0 %3454 }
 0xddd   : > { %6594 = vmatmul.mubr.msk.bf16.vlgmr.msra.gmra.mrb[84].mxu0 %vm906_vm2, %v3353_v47 }
 0xdde   : > { %6605 = vmatprep.mubr.msk.bf16.mxu0 %vm7385_vm1, %v9243_v19 }
 0xdf9   : > { %v3143_v62 = vpop.xlane.xlu1 %3142 }
 0xdfa   : > { %7166 = vrcp.f32 %v3143_v62 }
 0xdfd   : > { %v3457_v1 = vpop.permute.xlu1 %3456 }
 0xdfe   : > { %v3462_v55 = vsel %vm906_vm2, %v3457_v1, 0 }
 0xdff   : > { %6604 = vmatpush3.bf16.xpose.msra.mxu0 %v3462_v55 }
 0xe00   : > { %6615 = vmatprep.subr.bf16.mxu0 %v9243_v19 }
 0xe01   : > { %v3508_v60 = vpop.permute.xlu1 %3507 }
 0xe02   : > { %v3513_v16 = vsel %vm906_vm2, %v3508_v60, 0 }
 0xe04   : > { %v7167_v32 = vpop.eup %7166 }
 0xe05   : > { %v3159_v28 = vmul.f32 %v7167_v32, %v8215_v15  ;;  %v3506_v15 = vpop.permute.xlu1 %3505 }
 0xe06   : > { %6606 = vmatmul.mubr.msk.bf16.vlgmr.msra.gmra.mrb[88].mxu0 %vm906_vm2, %v3455_v38 }
 0xe07   : > { %v3163_v39 = vpack.c.bf16 %v3159_v28, %v3158_v0  ;;  %6617 = vmatprep.mubr.msk.bf16.mxu0 %vm7385_vm1, %v9243_v19 }
 0xe09   : > { %6588 = vmatmul.mubr.msk.bf16.vlgmr.msra.gmra.mrb[96].mxu1 %vm1103_vm3, %v3163_v39 }
 0xe0a   : > { %6598 = vmatpush3.bf16.xpose.msra.mxu1 %v3411_v50  ;;  %6599 = vmatprep.mubr.msk.bf16.mxu1 %vm7385_vm1, %v9243_v19 }
 0xe0b   : > { %6609 = vmatprep.subr.bf16.mxu1 %v9243_v19 }
 0xe11   : > { %6600 = vmatmul.mubr.msk.bf16.vlgmr.msra.gmra.mrb[100].mxu1 %vm906_vm2, %v3404_v31 }
 0xe12   : > { %6610 = vmatpush3.bf16.xpose.msra.mxu1 %v3513_v16  ;;  %6611 = vmatprep.mubr.msk.bf16.mxu1 %vm7385_vm1, %v9243_v19 }
 0xe13   : > { %6621 = vmatprep.subr.bf16.mxu1 %v9243_v19 }
 0xe19   : > { %6612 = vmatmul.mubr.msk.bf16.vlgmr.msra.gmra.mrb[104].mxu1 %vm906_vm2, %v3506_v15 }
 0xe1a   : > { %6623 = vmatprep.mubr.msk.bf16.mxu1 %vm7385_vm1, %v9243_v19 }
 0xe6d   : > { %v8263_v29 = vpop.f32.mrb[76].mxu0 }
 0xe6e   : > { %v6571_v8 = vpop.f32.mrb[77].mxu0 }
 0xe6f   : > { %v8265_v58 = vpop.f32.mrb[78].mxu0 }
 0xe70   : > { %v6572_v12 = vpop.f32.mrb[79].mxu0 }
 0xea3   : > { %v8269_v7 = vpop.f32.mrb[92].mxu1 }
 0xea4   : > { %v6577_v63 = vpop.f32.mrb[93].mxu1 }
 0xea5   : > { %v8271_v53 = vpop.f32.mrb[94].mxu1 }
 0xea6   : > { %v6578_v47 = vpop.f32.mrb[95].mxu1 }
 0xea8   : > { %v8275_v52 = vpop.f32.mrb[80].mxu0 }
 0xea9   : > { %9244 = vst [vmem:[#allocation19_spill] sm:$0xff] %v8275_v52  ;;  %v6583_v62 = vpop.f32.mrb[81].mxu0 }
 0xeaa   : > { %v8277_v1 = vpop.f32.mrb[82].mxu0 }
 0xeab   : > { %9245 = vst [vmem:[#allocation20_spill] sm:$0xff] %v8277_v1  ;;  %v6584_v31 = vpop.f32.mrb[83].mxu0 }
 0xeb0   : > { %v3396_v40 = vpop.f32.mrb[84].mxu0 }
 0xeb1   : > { %v3556_v32 = vmul.f32 0.35355338, %v3396_v40  ;;  %v6595_v0 = vpop.f32.mrb[85].mxu0 }
 0xeb2   : > { %v3399_v38 = vpop.f32.mrb[86].mxu0 }
 0xeb3   : > { %v3557_v28 = vmul.f32 0.35355338, %v3399_v38  ;;  %v6596_v39 = vpop.f32.mrb[87].mxu0  ;;  %v3564_v50 = vsel %vm1103_vm3, %v3556_v32, -inf }
 0xeb4   : > { %3565 = vmax.xlane.f32.xlu0 %v3564_v50 }
 0xeb5   : > { %v3567_v60 = vsel %vm1103_vm3, %v3557_v28, -inf }
 0xeb6   : > { %3568 = vmax.xlane.f32.xlu1 %v3567_v60 }
 0xed9   : > { %v3498_v16 = vpop.f32.mrb[88].mxu0 }
 0xeda   : > { %v6607_v15 = vpop.f32.mrb[89].mxu0 }
 0xedb   : > { %v3501_v8 = vpop.f32.mrb[90].mxu0 }
 0xedc   : > { %v3561_v12 = vmul.f32 0.35355338, %v3501_v8  ;;  %v8283_v63 = vpop.f32.mrb[96].mxu1  ;;  %v6608_v47 = vpop.f32.mrb[91].mxu0 }
 0xedd   : > { %9246 = vst [vmem:[#allocation21_spill] sm:$0xff] %v8283_v63  ;;  %v6589_v62 = vpop.f32.mrb[97].mxu1  ;;  %v3560_v47 = vmul.f32 0.35355338, %v3498_v16 }
 0xede   : > { %v8285_v31 = vpop.f32.mrb[98].mxu1  ;;  %v3579_v40 = vsel %vm1103_vm3, %v3561_v12, -inf }
 0xedf   : > { %9247 = vst [vmem:[#allocation22_spill] sm:$0xff] %v8285_v31  ;;  %v6590_v38 = vpop.f32.mrb[99].mxu1  ;;  %3580 = vmax.xlane.f32.xlu1 %v3579_v40  ;;  %v3576_v40 = vsel %vm1103_vm3, %v3560_v47, -inf }
 0xee4   : > { %v3447_v39 = vpop.f32.mrb[100].mxu1 }
 0xee5   : > { %v3558_v50 = vmul.f32 0.35355338, %v3447_v39  ;;  %v6601_v60 = vpop.f32.mrb[101].mxu1 }
 0xee6   : > { %v3450_v55 = vpop.f32.mrb[102].mxu1 }
 0xee7   : > { %v3559_v15 = vmul.f32 0.35355338, %v3450_v55  ;;  %v6602_v22 = vpop.f32.mrb[103].mxu1  ;;  %v3570_v8 = vsel %vm1103_vm3, %v3558_v50, -inf }
 0xee8   : > { %3571 = vmax.xlane.f32.xlu0 %v3570_v8 }
 0xee9   : > { %v3573_v62 = vsel %vm1103_vm3, %v3559_v15, -inf }
 0xeec   : > { %v3549_v49 = vpop.f32.mrb[104].mxu1  ;;  %3574 = vmax.xlane.f32.xlu0 %v3573_v62 }
 0xeed   : > { %v6613_v52 = vpop.f32.mrb[105].mxu1  ;;  %v3562_v18 = vmul.f32 0.35355338, %v3549_v49 }
 0xeee   : > { %v3552_v1 = vpop.f32.mrb[106].mxu1 }
 0xeef   : > { %v6614_v0 = vpop.f32.mrb[107].mxu1  ;;  %v3582_v22 = vsel %vm1103_vm3, %v3562_v18, -inf  ;;  %v8300_v55 = vmul.f32 0.35355338, %v3552_v1 }
 0xef0   : > { %3577 = vmax.xlane.f32.xlu0 %v3576_v40  ;;  %3703 = vrot.lane.b32.xlu1 %v7657_v10, %s7390_s30 }
 0xef1   : > { %v3585_v49 = vsel %vm1103_vm3, %v8300_v55, -inf }
 0xef4   : > { %3583 = vmax.xlane.f32.xlu0 %v3582_v22  ;;  %3750 = vrot.lane.b32.xlu1 %v7669_v30, %s7390_s30 }
 0xf0a   : > { %3656 = vrot.lane.b32.xlu0 %v7661_v14, %s7390_s30 }
 0xf18   : > { %3586 = vmax.xlane.f32.xlu1 %v3585_v49 }
 0xf29   : > { %3797 = vrot.lane.b32.xlu1 %v7665_v24, %s7390_s30  ;;  %s9217_s30 = smov 48  }
 0xf41   : > { %v3566_v52 = vpop.xlane.xlu0 %3565 }
 0xf42   : > { %v3588_v16 = vsub.f32 %v3556_v32, %v3566_v52 }
 0xf43   : > { %v3569_v0 = vpop.xlane.xlu1 %3568 }
 0xf44   : > { %v3596_v38 = vmul.f32 1.442695, %v3588_v16  ;;  %v3589_v39 = vsub.f32 %v3557_v28, %v3569_v0 }
 0xf46   : > { %7168 = vpow2.f32 %v3596_v38  ;;  %v3598_v60 = vmul.f32 1.442695, %v3589_v39 }
 0xf48   : > { %7170 = vpow2.f32 %v3598_v60 }
 0xf50   : > { %v8306_v8 = vpop.eup %7168 }
 0xf51   : > { %v3612_v1 = vsel %vm1103_vm3, %v8306_v8, 0.0 }
 0xf52   : > { %v8310_v62 = vpop.eup %7170  ;;  %3613 = vadd.xlane.f32.xlu0 %v3612_v1 }
 0xf53   : > { %v3615_v40 = vsel %vm1103_vm3, %v8310_v62, 0.0 }
 0xf54   : > { %3616 = vadd.xlane.f32.xlu1 %v3615_v40 }
 0xf6c   : > { %v3581_v22 = vpop.xlane.xlu1 %3580 }
 0xf6d   : > { %v3593_v52 = vsub.f32 %v3561_v12, %v3581_v22 }
 0xf6f   : > { %v3606_v39 = vmul.f32 1.442695, %v3593_v52 }
 0xf70   : > { %v3704_v32 = vpop.permute.xlu1 %3703 }
 0xf71   : > { %6622 = vmatpush3.bf16.msra.mxu1 %v3704_v32 }
 0xf72   : > { %6633 = vmatprep.subr.bf16.mxu1 %v9243_v19 }
 0xf75   : > { %v3572_v28 = vpop.xlane.xlu0 %3571 }
 0xf76   : > { %v3590_v49 = vsub.f32 %v3558_v50, %v3572_v28 }
 0xf78   : > { %v3600_v16 = vmul.f32 1.442695, %v3590_v49 }
 0xf79   : > { %v3575_v0 = vpop.xlane.xlu0 %3574 }
 0xf7a   : > { %7172 = vpow2.f32 %v3600_v16  ;;  %v3591_v38 = vsub.f32 %v3559_v15, %v3575_v0 }
 0xf7c   : > { %v3602_v60 = vmul.f32 1.442695, %v3591_v38 }
 0xf7d   : > { %v3578_v63 = vpop.xlane.xlu0 %3577 }
 0xf7e   : > { %7174 = vpow2.f32 %v3602_v60  ;;  %v3592_v1 = vsub.f32 %v3560_v47, %v3578_v63 }
 0xf7f   : > { %7176 = vpow2.f32 %v3606_v39 }
 0xf80   : > { %v3604_v31 = vmul.f32 1.442695, %v3592_v1 }
 0xf81   : > { %v3584_v40 = vpop.xlane.xlu0 %3583 }
 0xf82   : > { %7178 = vpow2.f32 %v3604_v31  ;;  %v3594_v25 = vsub.f32 %v3562_v18, %v3584_v40 }
 0xf84   : > { %v7173_v32 = vpop.eup %7172  ;;  %v3608_v21 = vmul.f32 1.442695, %v3594_v25 }
 0xf85   : > { %v3657_v43 = vpop.permute.xlu0 %3656  ;;  %v3618_v50 = vsel %vm1103_vm3, %v7173_v32, 0.0 }
 0xf86   : > { %7180 = vpow2.f32 %v3608_v21  ;;  %3619 = vadd.xlane.f32.xlu0 %v3618_v50  ;;  %6616 = vmatpush3.bf16.msra.mxu0 %v3657_v43  ;;  %v3751_v43 = vpop.permute.xlu1 %3750 }
 0xf87   : > { %6627 = vmatprep.subr.bf16.mxu0 %v9243_v19 }
 0xf88   : > { %v7175_v12 = vpop.eup %7174 }
 0xf89   : > { %v3621_v15 = vsel %vm1103_vm3, %v7175_v12, 0.0  ;;  %v7177_v22 = vpop.eup %7176 }
 0xf8a   : > { %3622 = vadd.xlane.f32.xlu1 %v3621_v15  ;;  %v3627_v18 = vsel %vm1103_vm3, %v7177_v22, 0.0 }
 0xf8c   : > { %v7179_v63 = vpop.eup %7178 }
 0xf8d   : > { %v3624_v47 = vsel %vm1103_vm3, %v7179_v63, 0.0 }
 0xf8e   : > { %3625 = vadd.xlane.f32.xlu0 %v3624_v47  ;;  %3628 = vadd.xlane.f32.xlu1 %v3627_v18 }
 0xf90   : > { %v8320_v25 = vpop.eup %7180 }
 0xf91   : > { %v3630_v21 = vsel %vm1103_vm3, %v8320_v25, 0.0 }
 0xf92   : > { %3631 = vadd.xlane.f32.xlu0 %v3630_v21 }
 0xf9f   : > { %3897 = vrot.lane.b32.xlu1 %v7671_v34, %s7391_s15 }
 0xfa5   : > { %v3587_v31 = vpop.xlane.xlu1 %3586 }
 0xfa6   : > { %v3595_v28 = vsub.f32 %v8300_v55, %v3587_v31 }
 0xfa8   : > { %3846 = vrot.lane.b32.xlu0 %v7673_v36, %s7391_s15  ;;  %v3610_v49 = vmul.f32 1.442695, %v3595_v28 }
 0xfa9   : > { %v3798_v55 = vpop.permute.xlu1 %3797 }
 0xfaa   : > { %7182 = vpow2.f32 %v3610_v49 }
 0xfac   : > { %3844 = vrot.lane.b32.xlu0 %v7659_v13, %s7391_s15 }
 0xfb0   : > { %3895 = vrot.lane.b32.xlu0 %v7655_v9, %s7391_s15 }
 0xfb4   : > { %3946 = vrot.lane.b32.xlu0 %v7667_v27, %s7391_s15  ;;  %v8335_v52 = vpop.eup %7182 }
 0xfb5   : > { %v3633_v16 = vsel %vm1103_vm3, %v8335_v52, 0.0 }
 0xfc3   : > { %3634 = vadd.xlane.f32.xlu1 %v3633_v16 }
 0xfd4   : > { %3948 = vrot.lane.b32.xlu1 %v7680_v44, %s7391_s15 }
 0xfd8   : > { %3999 = vrot.lane.b32.xlu1 %v7678_v42, %s7391_s15 }
 0xfdc   : > { %3997 = vrot.lane.b32.xlu1 %v7663_v23, %s7391_s15 }
 0xfdf   : > { %v3614_v0 = vpop.xlane.xlu0 %3613 }
 0xfe0   : > { %7184 = vrcp.f32 %v3614_v0 }
 0xfe1   : > { %v3617_v38 = vpop.xlane.xlu1 %3616 }
 0xfe2   : > { %7186 = vrcp.f32 %v3617_v38 }
 0xfea   : > { %v7185_v39 = vpop.eup %7184 }
 0xfeb   : > { %v3644_v1 = vmul.f32 %v7185_v39, %v8306_v8 }
 0xfec   : > { %v7187_v60 = vpop.eup %7186 }
 0xfed   : > { %v3645_v40 = vmul.f32 %v7187_v60, %v8310_v62 }
 0xfef   : > { %v3652_v50 = vpack.c.bf16 %v3645_v40, %v3644_v1 }
 0xff1   : > { %6618 = vmatmul.mubr.msk.bf16.vlgmr.msra.gmra.mrb[92].mxu0 %vm1103_vm3, %v3652_v50 }
 0xff2   : > { %6628 = vmatpush3.bf16.msra.mxu0 %v3751_v43  ;;  %6629 = vmatprep.mubr.msk.bf16.mxu0 %vm7385_vm1, %v9243_v19 }
 0xff3   : > { %6639 = vmatprep.subr.bf16.mxu0 %v9243_v19 }
0x1013   : > { %v3620_v15 = vpop.xlane.xlu0 %3619 }
0x1014   : > { %7188 = vrcp.f32 %v3620_v15 }
0x1017   : > { %v3623_v47 = vpop.xlane.xlu1 %3622 }
0x1018   : > { %7190 = vrcp.f32 %v3623_v47 }
0x101b   : > { %v3626_v18 = vpop.xlane.xlu0 %3625  ;;  %v3629_v21 = vpop.xlane.xlu1 %3628 }
0x101c   : > { %7192 = vrcp.f32 %v3626_v18 }
0x101d   : > { %7194 = vrcp.f32 %v3629_v21 }
0x101e   : > { %v7189_v8 = vpop.eup %7188 }
0x101f   : > { %v3646_v62 = vmul.f32 %v7189_v8, %v7173_v32  ;;  %v3632_v49 = vpop.xlane.xlu0 %3631 }
0x1020   : > { %7196 = vrcp.f32 %v3632_v49 }
0x1022   : > { %v7191_v31 = vpop.eup %7190 }
0x1023   : > { %v3647_v28 = vmul.f32 %v7191_v31, %v7175_v12  ;;  %v3847_v60 = vpop.permute.xlu0 %3846  ;;  %v3898_v12 = vpop.permute.xlu1 %3897 }
0x1024   : > { %v3852_v40 = vsel %vm906_vm2, %v3847_v60, 0 }
0x1025   : > { %v3653_v16 = vpack.c.bf16 %v3647_v28, %v3646_v62  ;;  %v3903_v62 = vsel %vm906_vm2, %v3898_v12, 0 }
0x1026   : > { %v7193_v43 = vpop.eup %7192 }
0x1027   : > { %v7195_v0 = vpop.eup %7194  ;;  %v3648_v38 = vmul.f32 %v7193_v43, %v7179_v63  ;;  %6624 = vmatmul.mubr.msk.bf16.vlgmr.msra.gmra.mrb[108].mxu1 %vm1103_vm3, %v3653_v16  ;;  %v3845_v32 = vpop.permute.xlu0 %3844 }
0x1028   : > { %v3649_v39 = vmul.f32 %v7195_v0, %v7177_v22  ;;  %6634 = vmatpush3.bf16.msra.mxu1 %v3798_v55  ;;  %6635 = vmatprep.mubr.msk.bf16.mxu1 %vm7385_vm1, %v9243_v19 }
0x1029   : > { %6645 = vmatprep.subr.bf16.mxu1 %v9243_v19 }
0x102a   : > { %v3654_v1 = vpack.c.bf16 %v3649_v39, %v3648_v38  ;;  %v7197_v15 = vpop.eup %7196 }
0x102b   : > { %v3896_v50 = vpop.permute.xlu0 %3895  ;;  %v3650_v18 = vmul.f32 %v7197_v15, %v8320_v25 }
0x102c   : > { %6630 = vmatmul.mubr.msk.bf16.vlgmr.msra.gmra.mrb[96].mxu0 %vm1103_vm3, %v3654_v1 }
0x102d   : > { %6640 = vmatpush3.bf16.xpose.msra.mxu0 %v3852_v40  ;;  %6641 = vmatprep.mubr.msk.bf16.mxu0 %vm7385_vm1, %v9243_v19 }
0x102e   : > { %6651 = vmatprep.subr.bf16.mxu0 %v9243_v19 }
0x102f   : > { %v3947_v21 = vpop.permute.xlu0 %3946 }
0x1034   : > { %6642 = vmatmul.mubr.msk.bf16.vlgmr.msra.gmra.mrb[100].mxu0 %vm906_vm2, %v3845_v32 }
0x1035   : > { %6653 = vmatprep.mubr.msk.bf16.mxu0 %vm7385_vm1, %v9243_v19 }
0x1050   : > { %v3635_v22 = vpop.xlane.xlu1 %3634 }
0x1051   : > { %7198 = vrcp.f32 %v3635_v22 }
0x1054   : > { %v3949_v63 = vpop.permute.xlu1 %3948 }
0x1055   : > { %v3954_v55 = vsel %vm906_vm2, %v3949_v63, 0 }
0x1056   : > { %6652 = vmatpush3.bf16.xpose.msra.mxu0 %v3954_v55 }
0x1057   : > { %6663 = vmatprep.subr.bf16.mxu0 %v9243_v19 }
0x1058   : > { %v4000_v25 = vpop.permute.xlu1 %3999 }
0x1059   : > { %v4005_v28 = vsel %vm906_vm2, %v4000_v25, 0 }
0x105b   : > { %v7199_v47 = vpop.eup %7198 }
0x105c   : > { %v3651_v8 = vmul.f32 %v7199_v47, %v8335_v52  ;;  %v3998_v52 = vpop.permute.xlu1 %3997 }
0x105d   : > { %6654 = vmatmul.mubr.msk.bf16.vlgmr.msra.gmra.mrb[104].mxu0 %vm906_vm2, %v3947_v21 }
0x105e   : > { %v3655_v31 = vpack.c.bf16 %v3651_v8, %v3650_v18  ;;  %6665 = vmatprep.mubr.msk.bf16.mxu0 %vm7385_vm1, %v9243_v19 }
0x1060   : > { %6636 = vmatmul.mubr.msk.bf16.vlgmr.msra.gmra.mrb[112].mxu1 %vm1103_vm3, %v3655_v31 }
0x1061   : > { %6646 = vmatpush3.bf16.xpose.msra.mxu1 %v3903_v62  ;;  %6647 = vmatprep.mubr.msk.bf16.mxu1 %vm7385_vm1, %v9243_v19 }
0x1062   : > { %6657 = vmatprep.subr.bf16.mxu1 %v9243_v19 }
0x1068   : > { %6648 = vmatmul.mubr.msk.bf16.vlgmr.msra.gmra.mrb[116].mxu1 %vm906_vm2, %v3896_v50 }
0x1069   : > { %6658 = vmatpush3.bf16.xpose.msra.mxu1 %v4005_v28  ;;  %6659 = vmatprep.mubr.msk.bf16.mxu1 %vm7385_vm1, %v9243_v19 }
0x106a   : > { %6669 = vmatprep.subr.bf16.mxu1 %v9243_v19 }
0x1070   : > { %6660 = vmatmul.mubr.msk.bf16.vlgmr.msra.gmra.mrb[120].mxu1 %vm906_vm2, %v3998_v52 }
0x1071   : > { %6671 = vmatprep.mubr.msk.bf16.mxu1 %vm7385_vm1, %v9243_v19 }
0x10c4   : > { %v8383_v49 = vpop.f32.mrb[92].mxu0 }
0x10c5   : > { %v6619_v16 = vpop.f32.mrb[93].mxu0 }
0x10c6   : > { %v8385_v43 = vpop.f32.mrb[94].mxu0 }
0x10c7   : > { %v6620_v38 = vpop.f32.mrb[95].mxu0 }
0x10fa   : > { %v8389_v39 = vpop.f32.mrb[108].mxu1 }
0x10fb   : > { %9248 = vst [vmem:[#allocation23_spill] sm:$0xff] %v8389_v39  ;;  %v6625_v60 = vpop.f32.mrb[109].mxu1 }
0x10fc   : > { %v8391_v1 = vpop.f32.mrb[110].mxu1 }
0x10fd   : > { %v6626_v32 = vpop.f32.mrb[111].mxu1 }
0x10ff   : > { %v8395_v12 = vpop.f32.mrb[96].mxu0 }
0x1100   : > { %9249 = vst [vmem:[#allocation24_spill] sm:$0xff] %v8395_v12  ;;  %v6631_v22 = vpop.f32.mrb[97].mxu0 }
0x1101   : > { %v8397_v63 = vpop.f32.mrb[98].mxu0 }
0x1102   : > { %9250 = vst [vmem:[#allocation25_spill] sm:$0xff] %v8397_v63  ;;  %v6632_v50 = vpop.f32.mrb[99].mxu0 }
0x1107   : > { %v3888_v15 = vpop.f32.mrb[100].mxu0 }
0x1108   : > { %v4048_v47 = vmul.f32 0.35355338, %v3888_v15  ;;  %v6643_v18 = vpop.f32.mrb[101].mxu0 }
0x1109   : > { %v3891_v21 = vpop.f32.mrb[102].mxu0 }
0x110a   : > { %v4049_v8 = vmul.f32 0.35355338, %v3891_v21  ;;  %v6644_v31 = vpop.f32.mrb[103].mxu0  ;;  %v4056_v62 = vsel %vm1103_vm3, %v4048_v47, -inf }
0x110b   : > { %4057 = vmax.xlane.f32.xlu0 %v4056_v62 }
0x110c   : > { %v4059_v25 = vsel %vm1103_vm3, %v4049_v8, -inf }
0x110d   : > { %4060 = vmax.xlane.f32.xlu1 %v4059_v25 }
0x1130   : > { %v3990_v28 = vpop.f32.mrb[104].mxu0 }
0x1131   : > { %v6655_v52 = vpop.f32.mrb[105].mxu0 }
0x1132   : > { %v3993_v16 = vpop.f32.mrb[106].mxu0 }
0x1133   : > { %v4053_v38 = vmul.f32 0.35355338, %v3993_v16  ;;  %v8403_v60 = vpop.f32.mrb[112].mxu1  ;;  %v6656_v32 = vpop.f32.mrb[107].mxu0 }
0x1134   : > { %9251 = vst [vmem:[#allocation26_spill] sm:$0xff] %v8403_v60  ;;  %v6637_v22 = vpop.f32.mrb[113].mxu1  ;;  %v4052_v32 = vmul.f32 0.35355338, %v3990_v28 }
0x1135   : > { %v8405_v50 = vpop.f32.mrb[114].mxu1  ;;  %v4071_v15 = vsel %vm1103_vm3, %v4053_v38, -inf }
0x1136   : > { %9252 = vst [vmem:[#allocation27_spill] sm:$0xff] %v8405_v50  ;;  %v6638_v21 = vpop.f32.mrb[115].mxu1  ;;  %4072 = vmax.xlane.f32.xlu1 %v4071_v15  ;;  %v4068_v15 = vsel %vm1103_vm3, %v4052_v32, -inf }
0x113b   : > { %v3939_v31 = vpop.f32.mrb[116].mxu1 }
0x113c   : > { %v4050_v62 = vmul.f32 0.35355338, %v3939_v31  ;;  %v6649_v25 = vpop.f32.mrb[117].mxu1 }
0x113d   : > { %v3942_v55 = vpop.f32.mrb[118].mxu1 }
0x113e   : > { %v4051_v52 = vmul.f32 0.35355338, %v3942_v55  ;;  %v6650_v40 = vpop.f32.mrb[119].mxu1  ;;  %v4062_v16 = vsel %vm1103_vm3, %v4050_v62, -inf }
0x113f   : > { %4063 = vmax.xlane.f32.xlu0 %v4062_v16 }
0x1140   : > { %v4065_v22 = vsel %vm1103_vm3, %v4051_v52, -inf }
0x1143   : > { %v4041_v0 = vpop.f32.mrb[120].mxu1  ;;  %4066 = vmax.xlane.f32.xlu0 %v4065_v22 }
0x1144   : > { %v6661_v12 = vpop.f32.mrb[121].mxu1  ;;  %v4054_v48 = vmul.f32 0.35355338, %v4041_v0 }
0x1145   : > { %v4044_v63 = vpop.f32.mrb[122].mxu1 }
0x1146   : > { %v4055_v18 = vmul.f32 0.35355338, %v4044_v63  ;;  %v6662_v21 = vpop.f32.mrb[123].mxu1  ;;  %v4074_v40 = vsel %vm1103_vm3, %v4054_v48, -inf }
0x1147   : > { %4069 = vmax.xlane.f32.xlu0 %v4068_v15 }
0x1148   : > { %v4077_v31 = vsel %vm1103_vm3, %v4055_v18, -inf }
0x1149   : > { %4078 = vmax.xlane.f32.xlu1 %v4077_v31 }
0x114b   : > { %4075 = vmax.xlane.f32.xlu0 %v4074_v40 }
0x115a   : > { %4195 = vrot.lane.b32.xlu1 %v7657_v10, %s7391_s15 }
0x115e   : > { %4242 = vrot.lane.b32.xlu1 %v7669_v30, %s7391_s15 }
0x1161   : > { %4148 = vrot.lane.b32.xlu0 %v7661_v14, %s7391_s15 }
0x1162   : > { %4289 = vrot.lane.b32.xlu1 %v7665_v24, %s7391_s15 }
0x1198   : > { %v4058_v0 = vpop.xlane.xlu0 %4057 }
0x1199   : > { %v4080_v12 = vsub.f32 %v4048_v47, %v4058_v0 }
0x119a   : > { %v4061_v63 = vpop.xlane.xlu1 %4060 }
0x119b   : > { %v4088_v55 = vmul.f32 1.442695, %v4080_v12  ;;  %v4081_v28 = vsub.f32 %v4049_v8, %v4061_v63 }
0x119d   : > { %7200 = vpow2.f32 %v4088_v55  ;;  %v4090_v25 = vmul.f32 1.442695, %v4081_v28 }
0x119f   : > { %7202 = vpow2.f32 %v4090_v25 }
0x11a7   : > { %v8423_v16 = vpop.eup %7200 }
0x11a8   : > { %v4104_v22 = vsel %vm1103_vm3, %v8423_v16, 0.0 }
0x11a9   : > { %v8427_v21 = vpop.eup %7202  ;;  %4105 = vadd.xlane.f32.xlu0 %v4104_v22 }
0x11aa   : > { %v4107_v15 = vsel %vm1103_vm3, %v8427_v21, 0.0 }
0x11ab   : > { %4108 = vadd.xlane.f32.xlu1 %v4107_v15 }
0x11c3   : > { %v4073_v31 = vpop.xlane.xlu1 %4072 }
0x11c4   : > { %v4085_v0 = vsub.f32 %v4053_v38, %v4073_v31 }
0x11c6   : > { %v4098_v55 = vmul.f32 1.442695, %v4085_v0 }
0x11cc   : > { %v4064_v47 = vpop.xlane.xlu0 %4063 }
0x11cd   : > { %v4082_v40 = vsub.f32 %v4050_v62, %v4064_v47 }
0x11cf   : > { %v4092_v8 = vmul.f32 1.442695, %v4082_v40 }
0x11d0   : > { %v4067_v12 = vpop.xlane.xlu0 %4066 }
0x11d1   : > { %7204 = vpow2.f32 %v4092_v8  ;;  %v4083_v63 = vsub.f32 %v4051_v52, %v4067_v12 }
0x11d3   : > { %v4094_v28 = vmul.f32 1.442695, %v4083_v63 }
0x11d4   : > { %v4070_v25 = vpop.xlane.xlu0 %4069 }
0x11d5   : > { %7206 = vpow2.f32 %v4094_v28  ;;  %v4084_v60 = vsub.f32 %v4052_v32, %v4070_v25 }
0x11d6   : > { %v4079_v50 = vpop.xlane.xlu1 %4078  ;;  %7208 = vpow2.f32 %v4098_v55 }
0x11d7   : > { %v4096_v22 = vmul.f32 1.442695, %v4084_v60  ;;  %v4087_v46 = vsub.f32 %v4055_v18, %v4079_v50 }
0x11d8   : > { %v4076_v35 = vpop.xlane.xlu0 %4075 }
0x11d9   : > { %7210 = vpow2.f32 %v4096_v22  ;;  %v4102_v15 = vmul.f32 1.442695, %v4087_v46  ;;  %v4086_v33 = vsub.f32 %v4054_v48, %v4076_v35 }
0x11da   : > { %v4196_v39 = vpop.permute.xlu1 %4195 }
0x11db   : > { %v8431_v62 = vpop.eup %7204  ;;  %7212 = vpow2.f32 %v4102_v15  ;;  %v4100_v38 = vmul.f32 1.442695, %v4086_v33  ;;  %6670 = vmatpush3.bf16.msra.mxu1 %v4196_v39 }
0x11dc   : > { %v4149_v52 = vpop.permute.xlu0 %4148  ;;  %v4110_v31 = vsel %vm1103_vm3, %v8431_v62, 0.0  ;;  %6681 = vmatprep.subr.bf16.mxu1 %v9243_v19 }
0x11dd   : > { %7214 = vpow2.f32 %v4100_v38  ;;  %4111 = vadd.xlane.f32.xlu0 %v4110_v31  ;;  %6664 = vmatpush3.bf16.msra.mxu0 %v4149_v52 }
0x11de   : > { %6675 = vmatprep.subr.bf16.mxu0 %v9243_v19 }
0x11df   : > { %v7207_v60 = vpop.eup %7206 }
0x11e0   : > { %v4113_v35 = vsel %vm1103_vm3, %v7207_v60, 0.0  ;;  %v7209_v48 = vpop.eup %7208 }
0x11e1   : > { %4114 = vadd.xlane.f32.xlu1 %v4113_v35  ;;  %v4119_v39 = vsel %vm1103_vm3, %v7209_v48, 0.0 }
0x11e3   : > { %v7211_v46 = vpop.eup %7210 }
0x11e4   : > { %v4116_v33 = vsel %vm1103_vm3, %v7211_v46, 0.0 }
0x11e5   : > { %v8440_v50 = vpop.eup %7212  ;;  %4117 = vadd.xlane.f32.xlu0 %v4116_v33  ;;  %4120 = vadd.xlane.f32.xlu1 %v4119_v39 }
0x11e6   : > { %v4125_v47 = vsel %vm1103_vm3, %v8440_v50, 0.0 }
0x11e7   : > { %v7215_v18 = vpop.eup %7214 }
0x11e8   : > { %v4122_v32 = vsel %vm1103_vm3, %v7215_v18, 0.0 }
0x11e9   : > { %4123 = vadd.xlane.f32.xlu0 %v4122_v32  ;;  %4126 = vadd.xlane.f32.xlu1 %v4125_v47 }
0x11fa   : > { %4389 = vrot.lane.b32.xlu1 %v7671_v34, %s7392_s16  ;;  %v4243_v34 = vpop.permute.xlu1 %4242 }
0x11fe   : > { %4387 = vrot.lane.b32.xlu1 %v7655_v9, %s7392_s16  ;;  %v4290_v9 = vpop.permute.xlu1 %4289 }
0x11ff   : > { %4338 = vrot.lane.b32.xlu0 %v7673_v36, %s7392_s16 }
0x1202   : > { %4491 = vrot.lane.b32.xlu1 %v7678_v42, %s7392_s16 }
0x1203   : > { %4336 = vrot.lane.b32.xlu0 %v7659_v13, %s7392_s16 }
0x1206   : > { %4489 = vrot.lane.b32.xlu1 %v7663_v23, %s7392_s16 }
0x1207   : > { %4440 = vrot.lane.b32.xlu0 %v7680_v44, %s7392_s16 }
0x120b   : > { %4438 = vrot.lane.b32.xlu0 %v7667_v27, %s7392_s16 }
0x1236   : > { %v4106_v40 = vpop.xlane.xlu0 %4105 }
0x1237   : > { %7216 = vrcp.f32 %v4106_v40 }
0x1238   : > { %v4109_v36 = vpop.xlane.xlu1 %4108 }
0x1239   : > { %7218 = vrcp.f32 %v4109_v36 }
0x1241   : > { %v7217_v0 = vpop.eup %7216 }
0x1242   : > { %v4136_v8 = vmul.f32 %v7217_v0, %v8423_v16 }
0x1243   : > { %v7219_v42 = vpop.eup %7218 }
0x1244   : > { %v4137_v13 = vmul.f32 %v7219_v42, %v8427_v21 }
0x1246   : > { %v4144_v12 = vpack.c.bf16 %v4137_v13, %v4136_v8 }
0x1248   : > { %6666 = vmatmul.mubr.msk.bf16.vlgmr.msra.gmra.mrb[108].mxu0 %vm1103_vm3, %v4144_v12 }
0x1249   : > { %6676 = vmatpush3.bf16.msra.mxu0 %v4243_v34  ;;  %6677 = vmatprep.mubr.msk.bf16.mxu0 %vm7385_vm1, %v9243_v19 }
0x124a   : > { %6687 = vmatprep.subr.bf16.mxu0 %v9243_v19 }
0x126a   : > { %v4112_v23 = vpop.xlane.xlu0 %4111 }
0x126b   : > { %7220 = vrcp.f32 %v4112_v23 }
0x126e   : > { %v4115_v27 = vpop.xlane.xlu1 %4114 }
0x126f   : > { %7222 = vrcp.f32 %v4115_v27 }
0x1272   : > { %v4118_v44 = vpop.xlane.xlu0 %4117  ;;  %v4121_v63 = vpop.xlane.xlu1 %4120 }
0x1273   : > { %7224 = vrcp.f32 %v4118_v44 }
0x1274   : > { %7226 = vrcp.f32 %v4121_v63 }
0x1275   : > { %v7221_v21 = vpop.eup %7220 }
0x1276   : > { %v4124_v16 = vpop.xlane.xlu0 %4123  ;;  %v4127_v55 = vpop.xlane.xlu1 %4126  ;;  %v4138_v25 = vmul.f32 %v7221_v21, %v8431_v62 }
0x1277   : > { %7228 = vrcp.f32 %v4124_v16 }
0x1278   : > { %7230 = vrcp.f32 %v4127_v55 }
0x1279   : > { %v7223_v28 = vpop.eup %7222 }
0x127a   : > { %v4139_v22 = vmul.f32 %v7223_v28, %v7207_v60  ;;  %v4339_v15 = vpop.permute.xlu0 %4338  ;;  %v4390_v39 = vpop.permute.xlu1 %4389 }
0x127b   : > { %v4344_v36 = vsel %vm906_vm2, %v4339_v15, 0 }
0x127c   : > { %v4145_v38 = vpack.c.bf16 %v4139_v22, %v4138_v25 }
0x127d   : > { %v7225_v52 = vpop.eup %7224 }
0x127e   : > { %v7227_v31 = vpop.eup %7226  ;;  %v4140_v35 = vmul.f32 %v7225_v52, %v7211_v46  ;;  %6672 = vmatmul.mubr.msk.bf16.vlgmr.msra.gmra.mrb[124].mxu1 %vm1103_vm3, %v4145_v38  ;;  %v4337_v60 = vpop.permute.xlu0 %4336 }
0x127f   : > { %v4141_v33 = vmul.f32 %v7227_v31, %v7209_v48  ;;  %6682 = vmatpush3.bf16.msra.mxu1 %v4290_v9  ;;  %6683 = vmatprep.mubr.msk.bf16.mxu1 %vm7385_vm1, %v9243_v19  ;;  %v4388_v46 = vpop.permute.xlu1 %4387  ;;  %v4395_v9 = vsel %vm906_vm2, %v4390_v39, 0 }
0x1280   : > { %6693 = vmatprep.subr.bf16.mxu1 %v9243_v19 }
0x1281   : > { %v7229_v32 = vpop.eup %7228  ;;  %v4146_v47 = vpack.c.bf16 %v4141_v33, %v4140_v35 }
0x1282   : > { %v7231_v34 = vpop.eup %7230  ;;  %v4142_v62 = vmul.f32 %v7229_v32, %v7215_v18  ;;  %v4441_v18 = vpop.permute.xlu0 %4440 }
0x1283   : > { %v4143_v40 = vmul.f32 %v7231_v34, %v8440_v50  ;;  %6678 = vmatmul.mubr.msk.bf16.vlgmr.msra.gmra.mrb[112].mxu0 %vm1103_vm3, %v4146_v47  ;;  %v4446_v50 = vsel %vm906_vm2, %v4441_v18, 0  ;;  %v4492_v0 = vpop.permute.xlu1 %4491 }
0x1284   : > { %6688 = vmatpush3.bf16.xpose.msra.mxu0 %v4344_v36  ;;  %6689 = vmatprep.mubr.msk.bf16.mxu0 %vm7385_vm1, %v9243_v19  ;;  %v4497_v42 = vsel %vm906_vm2, %v4492_v0, 0 }
0x1285   : > { %v4147_v48 = vpack.c.bf16 %v4143_v40, %v4142_v62  ;;  %6699 = vmatprep.subr.bf16.mxu0 %v9243_v19 }
0x1286   : > { %v4439_v8 = vpop.permute.xlu0 %4438 }
0x1287   : > { %6684 = vmatmul.mubr.msk.bf16.vlgmr.msra.gmra.mrb[128].mxu1 %vm1103_vm3, %v4147_v48  ;;  %v4490_v13 = vpop.permute.xlu1 %4489 }
0x1288   : > { %6694 = vmatpush3.bf16.xpose.msra.mxu1 %v4395_v9  ;;  %6695 = vmatprep.mubr.msk.bf16.mxu1 %vm7385_vm1, %v9243_v19 }
0x1289   : > { %6705 = vmatprep.subr.bf16.mxu1 %v9243_v19 }
0x128b   : > { %6690 = vmatmul.mubr.msk.bf16.vlgmr.msra.gmra.mrb[116].mxu0 %vm906_vm2, %v4337_v60 }
0x128c   : > { %6700 = vmatpush3.bf16.xpose.msra.mxu0 %v4446_v50  ;;  %6701 = vmatprep.mubr.msk.bf16.mxu0 %vm7385_vm1, %v9243_v19 }
0x128d   : > { %6711 = vmatprep.subr.bf16.mxu0 %v9243_v19 }
0x128f   : > { %6696 = vmatmul.mubr.msk.bf16.vlgmr.msra.gmra.mrb[132].mxu1 %vm906_vm2, %v4388_v46 }
0x1290   : > { %6706 = vmatpush3.bf16.xpose.msra.mxu1 %v4497_v42  ;;  %6707 = vmatprep.mubr.msk.bf16.mxu1 %vm7385_vm1, %v9243_v19 }
0x1291   : > { %6717 = vmatprep.subr.bf16.mxu1 %v9243_v19 }
0x1293   : > { %6702 = vmatmul.mubr.msk.bf16.vlgmr.msra.gmra.mrb[120].mxu0 %vm906_vm2, %v4439_v8 }
0x1294   : > { %6713 = vmatprep.mubr.msk.bf16.mxu0 %vm7385_vm1, %v9243_v19 }
0x1297   : > { %6708 = vmatmul.mubr.msk.bf16.vlgmr.msra.gmra.mrb[136].mxu1 %vm906_vm2, %v4490_v13 }
0x1298   : > { %6719 = vmatprep.mubr.msk.bf16.mxu1 %vm7385_vm1, %v9243_v19 }
0x131b   : > { %v8499_v12 = vpop.f32.mrb[108].mxu0 }
0x131c   : > { %v6667_v23 = vpop.f32.mrb[109].mxu0 }
0x131d   : > { %v8501_v27 = vpop.f32.mrb[110].mxu0 }
0x131e   : > { %v6858_v44 = vpack.i.bf16 %v8501_v27, %v8499_v12  ;;  %v6668_v63 = vpop.f32.mrb[111].mxu0 }
0x1351   : > { %v8505_v16 = vpop.f32.mrb[124].mxu1 }
0x1352   : > { %v6673_v55 = vpop.f32.mrb[125].mxu1 }
0x1353   : > { %v8507_v21 = vpop.f32.mrb[126].mxu1 }
0x1354   : > { %v6674_v25 = vpop.f32.mrb[127].mxu1 }
0x1356   : > { %v8511_v22 = vpop.f32.mrb[112].mxu0 }
0x1357   : > { %v6679_v15 = vpop.f32.mrb[113].mxu0 }
0x1358   : > { %v8513_v38 = vpop.f32.mrb[114].mxu0 }
0x1359   : > { %v6680_v31 = vpop.f32.mrb[115].mxu0 }
0x135a   : > { %v8517_v35 = vpop.f32.mrb[128].mxu1 }
0x135b   : > { %v6685_v33 = vpop.f32.mrb[129].mxu1 }
0x135c   : > { %v8519_v39 = vpop.f32.mrb[130].mxu1 }
0x135d   : > { %v6686_v47 = vpop.f32.mrb[131].mxu1 }
0x135e   : > { %v4380_v34 = vpop.f32.mrb[116].mxu0 }
0x135f   : > { %v4540_v62 = vmul.f32 0.35355338, %v4380_v34  ;;  %v6691_v60 = vpop.f32.mrb[117].mxu0 }
0x1360   : > { %v4383_v40 = vpop.f32.mrb[118].mxu0 }
0x1361   : > { %v4541_v36 = vmul.f32 0.35355338, %v4383_v40  ;;  %v6692_v48 = vpop.f32.mrb[119].mxu0  ;;  %v4548_v46 = vsel %vm1103_vm3, %v4540_v62, -inf }
0x1362   : > { %v4431_v9 = vpop.f32.mrb[132].mxu1  ;;  %4549 = vmax.xlane.f32.xlu0 %v4548_v46 }
0x1363   : > { %v4542_v18 = vmul.f32 0.35355338, %v4431_v9  ;;  %v6697_v50 = vpop.f32.mrb[133].mxu1  ;;  %v4551_v0 = vsel %vm1103_vm3, %v4541_v36, -inf }
0x1364   : > { %v4434_v42 = vpop.f32.mrb[134].mxu1  ;;  %4552 = vmax.xlane.f32.xlu1 %v4551_v0 }
0x1365   : > { %v4543_v8 = vmul.f32 0.35355338, %v4434_v42  ;;  %v6698_v13 = vpop.f32.mrb[135].mxu1  ;;  %v4554_v23 = vsel %vm1103_vm3, %v4542_v18, -inf }
0x1366   : > { %4555 = vmax.xlane.f32.xlu0 %v4554_v23  ;;  %v4482_v63 = vpop.f32.mrb[120].mxu0 }
0x1367   : > { %v6703_v55 = vpop.f32.mrb[121].mxu0  ;;  %v4544_v15 = vmul.f32 0.35355338, %v4482_v63  ;;  %v4557_v47 = vsel %vm1103_vm3, %v4543_v8, -inf }
0x1368   : > { %v4485_v25 = vpop.f32.mrb[122].mxu0 }
0x1369   : > { %v4545_v31 = vmul.f32 0.35355338, %v4485_v25  ;;  %v6704_v33 = vpop.f32.mrb[123].mxu0  ;;  %v4560_v0 = vsel %vm1103_vm3, %v4544_v15, -inf }
0x136a   : > { %v4533_v34 = vpop.f32.mrb[136].mxu1  ;;  %4558 = vmax.xlane.f32.xlu0 %v4557_v47 }
0x136b   : > { %v6709_v60 = vpop.f32.mrb[137].mxu1  ;;  %v4563_v40 = vsel %vm1103_vm3, %v4545_v31, -inf  ;;  %v4546_v46 = vmul.f32 0.35355338, %v4533_v34 }
0x136c   : > { %v4536_v48 = vpop.f32.mrb[138].mxu1  ;;  %4564 = vmax.xlane.f32.xlu1 %v4563_v40 }
0x136d   : > { %v8528_v9 = vmul.f32 0.35355338, %v4536_v48  ;;  %v6710_v50 = vpop.f32.mrb[139].mxu1  ;;  %v4566_v13 = vsel %vm1103_vm3, %v4546_v46, -inf }
0x136e   : > { %4561 = vmax.xlane.f32.xlu0 %v4560_v0 }
0x136f   : > { %v4569_v42 = vsel %vm1103_vm3, %v8528_v9, -inf }
0x1370   : > { %4570 = vmax.xlane.f32.xlu1 %v4569_v42 }
0x1372   : > { %4567 = vmax.xlane.f32.xlu0 %v4566_v13 }
0x13ef   : > { %v4550_v23 = vpop.xlane.xlu0 %4549 }
0x13f0   : > { %v4572_v63 = vsub.f32 %v4540_v62, %v4550_v23 }
0x13f1   : > { %v4553_v55 = vpop.xlane.xlu1 %4552 }
0x13f2   : > { %v4580_v25 = vmul.f32 1.442695, %v4572_v63  ;;  %v4573_v33 = vsub.f32 %v4541_v36, %v4553_v55 }
0x13f3   : > { %v4556_v47 = vpop.xlane.xlu0 %4555 }
0x13f4   : > { %7232 = vpow2.f32 %v4580_v25  ;;  %v4582_v34 = vmul.f32 1.442695, %v4573_v33  ;;  %v4574_v60 = vsub.f32 %v4542_v18, %v4556_v47 }
0x13f6   : > { %7234 = vpow2.f32 %v4582_v34  ;;  %v4584_v40 = vmul.f32 1.442695, %v4574_v60 }
0x13f7   : > { %v4559_v48 = vpop.xlane.xlu0 %4558 }
0x13f8   : > { %7236 = vpow2.f32 %v4584_v40  ;;  %v4575_v50 = vsub.f32 %v4543_v8, %v4559_v48  ;;  %v9253_v40 = vpack.i.bf16 %v7905_v56, %v7903_v54  ;;  %v9256_v54 = vpack.i.bf16 %v8265_v58, %v8263_v29  ;;  %v9274_v58 = vld [vmem:[#allocation18_spill] sm:$0xff] }
0x13f9   : > { %v4565_v0 = vpop.xlane.xlu1 %4564  ;;  %v9257_v56 = vpack.i.bf16 %v8385_v43, %v8383_v49  ;;  %v9260_v29 = vpack.i.bf16 %v8157_v37, %v8155_v3 }
0x13fa   : > { %v4586_v52 = vmul.f32 1.442695, %v4575_v50  ;;  %v4577_v42 = vsub.f32 %v4545_v31, %v4565_v0  ;;  %v9254_v50 = vpack.i.bf16 %v8025_v20, %v8023_v11  ;;  %v9258_v20 = vpack.i.bf16 %v7917_v5, %v7915_v4 }
0x13fb   : > { %v4562_v32 = vpop.xlane.xlu0 %4561  ;;  %v9261_v4 = vpack.i.bf16 %v7911_v61, %v7909_v57  ;;  %v9262_v5 = vpack.i.bf16 %v8031_v26, %v8029_v45  ;;  %v9267_v57 = vpack.i.bf16 %v8507_v21, %v8505_v16  ;;  %v9268_v61 = vld [vmem:[#allocation14_spill] sm:$0xff]  ;;  %v9269_v45 = vld [vmem:[#allocation13_spill] sm:$0xff] }
0x13fc   : > { %7238 = vpow2.f32 %v4586_v52  ;;  %v4590_v13 = vmul.f32 1.442695, %v4577_v42  ;;  %v4576_v28 = vsub.f32 %v4544_v15, %v4562_v32  ;;  %v9270_v26 = vpack.i.bf16 %v9268_v61, %v9269_v45 }
0x13fd   : > { %v4571_v48 = vpop.xlane.xlu1 %4570 }
0x13fe   : > { %v8534_v62 = vpop.eup %7232  ;;  %7240 = vpow2.f32 %v4590_v13  ;;  %v4588_v36 = vmul.f32 1.442695, %v4576_v28 }
0x13ff   : > { %v4568_v23 = vpop.xlane.xlu0 %4567  ;;  %v4596_v18 = vsel %vm1103_vm3, %v8534_v62, 0.0 }
0x1400   : > { %v8538_v63 = vpop.eup %7234  ;;  %7242 = vpow2.f32 %v4588_v36  ;;  %v4578_v55 = vsub.f32 %v4546_v46, %v4568_v23  ;;  %4597 = vadd.xlane.f32.xlu0 %v4596_v18 }
0x1401   : > { %v4599_v8 = vsel %vm1103_vm3, %v8538_v63, 0.0 }
0x1402   : > { %v8542_v31 = vpop.eup %7236  ;;  %v4592_v52 = vmul.f32 1.442695, %v4578_v55  ;;  %4600 = vadd.xlane.f32.xlu1 %v4599_v8 }
0x1403   : > { %v4602_v32 = vsel %vm1103_vm3, %v8542_v31, 0.0 }
0x1404   : > { %7244 = vpow2.f32 %v4592_v52  ;;  %4603 = vadd.xlane.f32.xlu0 %v4602_v32 }
0x1406   : > { %v8546_v28 = vpop.eup %7238 }
0x1407   : > { %v4605_v15 = vsel %vm1103_vm3, %v8546_v28, 0.0 }
0x1408   : > { %v8550_v25 = vpop.eup %7240  ;;  %4606 = vadd.xlane.f32.xlu1 %v4605_v15 }
0x1409   : > { %v4611_v47 = vsel %vm1103_vm3, %v8550_v25, 0.0 }
0x140a   : > { %v8552_v46 = vpop.eup %7242 }
0x140b   : > { %v4608_v33 = vsel %vm1103_vm3, %v8552_v46, 0.0 }
0x140c   : > { %4609 = vadd.xlane.f32.xlu0 %v4608_v33  ;;  %4612 = vadd.xlane.f32.xlu1 %v4611_v47 }
0x140e   : > { %v8558_v34 = vpop.eup %7244 }
0x140f   : > { %v4614_v60 = vsel %vm1103_vm3, %v8558_v34, 0.0 }
0x1410   : > { %4615 = vadd.xlane.f32.xlu0 %v4614_v60 }
0x141d   : > { %4687 = vrot.lane.b32.xlu1 %v7657_v10, %s7392_s16  ;;  %v4579_v10 = vsub.f32 %v8528_v9, %v4571_v48 }
0x1421   : > { %4734 = vrot.lane.b32.xlu1 %v7669_v30, %s7392_s16  ;;  %v9255_v30 = vpack.i.bf16 %v8145_v6, %v8143_v17  ;;  %v9259_v6 = vpack.i.bf16 %v8037_v2, %v8035_v41  ;;  %v9263_v41 = vpack.i.bf16 %v8151_v59, %v8149_v51  ;;  %v9264_v2 = vpack.i.bf16 %v8271_v53, %v8269_v7  ;;  %v9271_v51 = vld [vmem:[#allocation16_spill] sm:$0xff]  ;;  %v9272_v59 = vld [vmem:[#allocation15_spill] sm:$0xff]  ;;  %v9275_v7 = vld [vmem:[#allocation17_spill] sm:$0xff] }
0x1422   : > { %v9273_v37 = vpack.i.bf16 %v9271_v51, %v9272_v59  ;;  %v9276_v53 = vpack.i.bf16 %v9274_v58, %v9275_v7 }
0x1426   : > { %4640 = vrot.lane.b32.xlu0 %v7661_v14, %s7392_s16  ;;  %v4594_v14 = vmul.f32 1.442695, %v4579_v10 }
0x1428   : > { %7246 = vpow2.f32 %v4594_v14 }
0x142a   : > { %6809 = vrot.lane.b32.xlu0 %v9253_v40, %s9216_s20 }
0x142e   : > { %6819 = vrot.lane.b32.xlu0 %v9254_v50, %s7394_s21 }
0x1432   : > { %6829 = vrot.lane.b32.xlu0 %v9255_v30, %s7395_s22  ;;  %v8591_v11 = vpop.eup %7246 }
0x1433   : > { %v4617_v17 = vsel %vm1103_vm3, %v8591_v11, 0.0 }
0x1436   : > { %6839 = vrot.lane.b32.xlu0 %v9256_v54, %s9221_s0 }
0x143a   : > { %6849 = vrot.lane.b32.xlu0 %v9257_v56, %s9219_s23 }
0x143e   : > { %6859 = vrot.lane.b32.xlu0 %v6858_v44, %s9217_s30 }
0x1442   : > { %6869 = vrot.lane.b32.xlu0 %v9258_v20, %s9216_s20 }
0x1445   : > { %4618 = vadd.xlane.f32.xlu1 %v4617_v17 }
0x1446   : > { %6879 = vrot.lane.b32.xlu0 %v9259_v6, %s7394_s21 }
0x144a   : > { %6889 = vrot.lane.b32.xlu0 %v9260_v29, %s7395_s22  ;;  %v9277_v29 = vld [vmem:[#allocation12_spill] sm:$0xff] }
0x1456   : > { %4781 = vrot.lane.b32.xlu1 %v7665_v24, %s7392_s16  ;;  %v9265_v24 = vld [vmem:[#allocation23_spill] sm:$0xff] }
0x1457   : > { %v9266_v3 = vpack.i.bf16 %v8391_v1, %v9265_v24  ;;  %v6963_v24 = vld [vmem:[%s9191_s6 + $0x18] sm:$0xff]  }
0x145a   : > { %6814 = vrot.lane.b32.xlu1 %v9261_v4, %s9216_s20 }
0x145e   : > { %6824 = vrot.lane.b32.xlu1 %v9262_v5, %s7394_s21  ;;  %v6960_v5 = vld [vmem:[%s9191_s6] sm:$0xff]  }
0x1462   : > { %6834 = vrot.lane.b32.xlu1 %v9263_v41, %s7395_s22  ;;  %v6961_v41 = vld [vmem:[%s9191_s6 + $0x8] sm:$0xff]  }
0x1466   : > { %6844 = vrot.lane.b32.xlu1 %v9264_v2, %s9221_s0  ;;  %v6962_v2 = vld [vmem:[%s9191_s6 + $0x10] sm:$0xff]   ;;  %s9286_s0 = smov 40  }
0x146a   : > { %6854 = vrot.lane.b32.xlu1 %v9266_v3, %s9219_s23  ;;  %s9293_s23 = smov 48  }
0x146e   : > { %6864 = vrot.lane.b32.xlu1 %v9267_v57, %s9217_s30  ;;  %s9279_s30 = smov 32  }
0x1472   : > { %6874 = vrot.lane.b32.xlu1 %v9270_v26, %s9216_s20  ;;  %s7399_s20 = smov 56  }
0x1476   : > { %6884 = vrot.lane.b32.xlu1 %v9273_v37, %s7394_s21 }
0x147a   : > { %6894 = vrot.lane.b32.xlu1 %v9276_v53, %s7395_s22  ;;  %s432_s22 = sand.u32 1, %s7374_s26  }
0x148d   : > { %v4598_v49 = vpop.xlane.xlu0 %4597 }
0x148f   : > { %v4601_v43 = vpop.xlane.xlu1 %4600 }
0x1490   : > { %7248 = vrcp.f32 %v4601_v43  ;;  %v9281_v43 = vld [vmem:[#allocation21_spill] sm:$0xff] }
0x1491   : > { %v4604_v1 = vpop.xlane.xlu0 %4603  ;;  %7250 = vrcp.f32 %v4598_v49  ;;  %v9280_v49 = vld [vmem:[#allocation22_spill] sm:$0xff] }
0x1492   : > { %7252 = vrcp.f32 %v4604_v1  ;;  %v9282_v1 = vpack.i.bf16 %v9280_v49, %v9281_v43 }
0x1495   : > { %v4607_v12 = vpop.xlane.xlu1 %4606 }
0x1496   : > { %7254 = vrcp.f32 %v4607_v12  ;;  %v9283_v12 = vld [vmem:[#allocation20_spill] sm:$0xff] }
0x1499   : > { %v4610_v27 = vpop.xlane.xlu0 %4609  ;;  %v4613_v44 = vpop.xlane.xlu1 %4612 }
0x149a   : > { %7256 = vrcp.f32 %v4610_v27  ;;  %v7249_v16 = vpop.eup %7248  ;;  %v9284_v27 = vld [vmem:[#allocation19_spill] sm:$0xff] }
0x149b   : > { %7258 = vrcp.f32 %v4613_v44  ;;  %v7251_v21 = vpop.eup %7250  ;;  %v4629_v13 = vmul.f32 %v7249_v16, %v8538_v63  ;;  %v9285_v44 = vpack.i.bf16 %v9283_v12, %v9284_v27  ;;  %v9298_v12 = vld [vmem:[#allocation8_spill] sm:$0xff] }
0x149c   : > { %v7253_v42 = vpop.eup %7252  ;;  %v4628_v23 = vmul.f32 %v7251_v21, %v8534_v62 }
0x149d   : > { %v4616_v9 = vpop.xlane.xlu0 %4615  ;;  %v4688_v0 = vpop.permute.xlu1 %4687  ;;  %v4630_v18 = vmul.f32 %v7253_v42, %v8542_v31  ;;  %v9287_v42 = vld [vmem:[#allocation27_spill] sm:$0xff] }
0x149e   : > { %6718 = vmatpush3.bf16.msra.mxu1 %v4688_v0  ;;  %v4636_v52 = vpack.c.bf16 %v4629_v13, %v4628_v23  ;;  %7260 = vrcp.f32 %v4616_v9  ;;  %v9288_v13 = vld [vmem:[#allocation26_spill] sm:$0xff]  ;;  %v9290_v23 = vld [vmem:[#allocation25_spill] sm:$0xff] }
0x149f   : > { %6729 = vmatprep.subr.bf16.mxu1 %v9243_v19 }
0x14a0   : > { %v7255_v36 = vpop.eup %7254 }
0x14a1   : > { %v4631_v55 = vmul.f32 %v7255_v36, %v8546_v28  ;;  %v4641_v8 = vpop.permute.xlu0 %4640  ;;  %v4735_v47 = vpop.permute.xlu1 %4734  ;;  %v9289_v36 = vpack.i.bf16 %v9287_v42, %v9288_v13 }
0x14a2   : > { %6712 = vmatpush3.bf16.msra.mxu0 %v4641_v8  ;;  %v9294_v8 = vpack.i.bf16 %v8519_v39, %v8517_v35 }
0x14a3   : > { %6723 = vmatprep.subr.bf16.mxu0 %v9243_v19  ;;  %v4637_v32 = vpack.c.bf16 %v4631_v55, %v4630_v18  ;;  %v9291_v18 = vld [vmem:[#allocation24_spill] sm:$0xff] }
0x14a4   : > { %v7257_v15 = vpop.eup %7256  ;;  %v9292_v55 = vpack.i.bf16 %v9290_v23, %v9291_v18 }
0x14a5   : > { %v7259_v33 = vpop.eup %7258  ;;  %6714 = vmatmul.mubr.msk.bf16.vlgmr.msra.gmra.mrb[124].mxu0 %vm1103_vm3, %v4636_v52  ;;  %6720 = vmatmul.mubr.msk.bf16.vlgmr.msra.gmra.mrb[140].mxu1 %vm1103_vm3, %v4637_v32  ;;  %v4632_v62 = vmul.f32 %v7257_v15, %v8552_v46  ;;  %v9295_v52 = vpack.i.bf16 %v8513_v38, %v8511_v22 }
0x14a6   : > { %6724 = vmatpush3.bf16.msra.mxu0 %v4735_v47  ;;  %6725 = vmatprep.mubr.msk.bf16.mxu0 %vm7385_vm1, %v9243_v19  ;;  %v4633_v63 = vmul.f32 %v7259_v33, %v8550_v25 }
0x14a7   : > { %6731 = vmatprep.mubr.msk.bf16.mxu1 %vm7385_vm1, %v9243_v19  ;;  %6735 = vmatprep.subr.bf16.mxu0 %v6960_v5 }
0x14a8   : > { %v4638_v31 = vpack.c.bf16 %v4633_v63, %v4632_v62  ;;  %v7261_v48 = vpop.eup %7260  ;;  %v6810_v63 = vpop.permute.xlu0 %6809 }
0x14a9   : > { %v4634_v10 = vmul.f32 %v7261_v48, %v8558_v34  ;;  %v6812_v39 = vunpack.i.h.bf16 %v6810_v63 }
0x14ad   : > { %6726 = vmatmul.mubr.msk.bf16.vlgmr.msra.gmra.mrb[128].mxu0 %vm1103_vm3, %v4638_v31  ;;  %v6820_v31 = vpop.permute.xlu0 %6819 }
0x14ae   : > { %6736 = vmatpush3.bf16.msra.mxu0 %v6960_v5  ;;  %v6822_v22 = vunpack.i.h.bf16 %v6820_v31  ;;  %v6821_v38 = vunpack.i.l.bf16 %v6820_v31  ;;  %v9297_v5 = vld [vmem:[#allocation5_spill] sm:$0xff] }
0x14af   : > { %6737 = vmatprep.subr.bf16.mxu0 %v6961_v41 }
0x14b2   : > { %6738 = vmatpush3.bf16.msra.mxu0 %v6961_v41 }
0x14b3   : > { %6739 = vmatprep.subr.bf16.mxu0 %v6962_v2 }
0x14b6   : > { %6740 = vmatpush3.bf16.msra.mxu0 %v6962_v2 }
0x14b7   : > { %6741 = vmatprep.subr.bf16.mxu0 %v6963_v24 }
0x14ba   : > { %6742 = vmatpush3.bf16.msra.mxu0 %v6963_v24 }
0x14d2   : > { %v4619_v28 = vpop.xlane.xlu1 %4618 }
0x14d3   : > { %7262 = vrcp.f32 %v4619_v28  ;;  %v6830_v28 = vpop.permute.xlu0 %6829 }
0x14d6   : > { %v4782_v60 = vpop.permute.xlu1 %4781 }
0x14d7   : > { %6730 = vmatpush3.bf16.msra.mxu1 %v4782_v60  ;;  %v6840_v60 = vpop.permute.xlu0 %6839 }
0x14da   : > { %v8654_v40 = vpop.permute.xlu1 %6814 }
0x14db   : > { %v6850_v48 = vpop.permute.xlu0 %6849 }
0x14dc   : > { %v6851_v49 = vunpack.i.l.bf16 %v6850_v48 }
0x14dd   : > { %v7263_v50 = vpop.eup %7262 }
0x14de   : > { %v4635_v46 = vmul.f32 %v7263_v50, %v8591_v11  ;;  %v8658_v25 = vpop.permute.xlu1 %6824  ;;  %v9278_v11 = vld [vmem:[#allocation11_spill] sm:$0xff] }
0x14df   : > { %v8713_v50 = vpop.permute.xlu0 %6859 }
0x14e0   : > { %v4639_v30 = vpack.c.bf16 %v4635_v46, %v4634_v10  ;;  %v6811_v10 = vunpack.i.l.bf16 %v6810_v63  ;;  %v6832_v46 = vunpack.i.h.bf16 %v6830_v28 }
0x14e2   : > { %6732 = vmatmul.mubr.msk.bf16.vlgmr.msra.gmra.mrb[144].mxu1 %vm1103_vm3, %v4639_v30  ;;  %v8661_v19 = vpop.permute.xlu1 %6834  ;;  %v6831_v30 = vunpack.i.l.bf16 %v6830_v28  ;;  %v5052_v41 = vsel %vm906_vm2, %v9297_v5, %v6811_v10 }
0x14e3   : > { %v8715_v35 = vpop.permute.xlu0 %6869  ;;  %v5060_v2 = vsel %vm1103_vm3, %v5052_v41, %v6821_v38 }
0x14e4   : > { %v6872_v5 = vunpack.i.h.bf16 %v8715_v35  ;;  %v6871_v41 = vunpack.i.l.bf16 %v8715_v35 }
0x14e6   : > { %v8663_v14 = vpop.permute.xlu1 %6844 }
0x14e7   : > { %v6847_v43 = vunpack.i.h.bf16 %v8663_v14 }
0x14ea   : > { %v8665_v54 = vpop.permute.xlu1 %6854 }
0x14ee   : > { %v8667_v56 = vpop.permute.xlu1 %6864 }
0x14ef   : > { %v6867_v23 = vunpack.i.h.bf16 %v8667_v56  ;;  %v6866_v18 = vunpack.i.l.bf16 %v8667_v56 }
0x14f2   : > { %v6875_v20 = vpop.permute.xlu1 %6874 }
0x14f3   : > { %v6877_v17 = vunpack.i.h.bf16 %v6875_v20  ;;  %v6876_v6 = vunpack.i.l.bf16 %v6875_v20  ;;  %v6841_v20 = vunpack.i.l.bf16 %v6840_v60 }
0x14f5   : > { %v8671_v34 = vsel %vm906_vm2, %v9277_v29, %v6877_v17  ;;  %v8675_v4 = vsel %vm906_vm2, %v9278_v11, %v6876_v6  ;;  %v8717_v17 = vpop.permute.xlu0 %6879  ;;  %v9296_v29 = vld [vmem:[#allocation6_spill] sm:$0xff] }
0x14f6   : > { %v8719_v6 = vpop.permute.xlu1 %6884  ;;  %v5053_v11 = vsel %vm906_vm2, %v9296_v29, %v6812_v39 }
0x14f7   : > { %v5061_v24 = vsel %vm1103_vm3, %v5053_v11, %v6822_v22 }
0x1578   : > { %v4680_v3 = vpop.f32.mrb[124].mxu0  ;;  %v4727_v57 = vpop.f32.mrb[140].mxu1 }
0x1579   : > { %v6715_v61 = vpop.f32.mrb[125].mxu0  ;;  %v6721_v45 = vpop.f32.mrb[141].mxu1 }
0x157a   : > { %v4683_v26 = vpop.f32.mrb[126].mxu0  ;;  %v4730_v51 = vpop.f32.mrb[142].mxu1  ;;  %v5069_v61 = vsel %vm5068_vm4, %v5060_v2, %v6831_v30  ;;  %v5070_v45 = vsel %vm5068_vm4, %v5061_v24, %v6832_v46  ;;  %v6882_v2 = vunpack.i.h.bf16 %v8717_v17  ;;  %v6881_v24 = vunpack.i.l.bf16 %v8717_v17 }
0x157b   : > { %v6898_v59 = vpack.i.bf16 %v4683_v26, %v4680_v3  ;;  %v6908_v37 = vpack.i.bf16 %v4730_v51, %v4727_v57  ;;  %v6716_v58 = vpop.f32.mrb[127].mxu0  ;;  %v6722_v7 = vpop.f32.mrb[143].mxu1  ;;  %v6817_v3 = vunpack.i.h.bf16 %v8654_v40  ;;  %v6816_v57 = vunpack.i.l.bf16 %v8654_v40 }
0x157c   : > { %v6827_v26 = vunpack.i.h.bf16 %v8658_v25  ;;  %v6826_v51 = vunpack.i.l.bf16 %v8658_v25  ;;  %v6837_v58 = vunpack.i.h.bf16 %v8661_v19  ;;  %v6836_v7 = vunpack.i.l.bf16 %v8661_v19 }
0x157d   : > { %6909 = vrot.lane.b32.xlu1 %v6908_v37, %s7399_s20  ;;  %6899 = vrot.lane.b32.xlu0 %v6898_v59, %s7399_s20  ;;  %v6842_v59 = vunpack.i.h.bf16 %v6840_v60  ;;  %v5078_v37 = vsel %vm5077_vm5, %v5069_v61, %v6841_v20  ;;  %v6846_v40 = vunpack.i.l.bf16 %v8663_v14  ;;  %v5055_v27 = vsel %vm906_vm2, %v9298_v12, %v6817_v3 }
0x157e   : > { %v6862_v19 = vunpack.i.h.bf16 %v8713_v50  ;;  %v5063_v14 = vsel %vm1103_vm3, %v5055_v27, %v6827_v26 }
0x1580   : > { %v4774_v53 = vpop.f32.mrb[128].mxu0 }
0x1581   : > { %6914 = vrot.lane.b32.xlu1 %v9282_v1, %s9279_s30  ;;  %6904 = vrot.lane.b32.xlu0 %v9285_v44, %s9279_s30  ;;  %v6727_v16 = vpop.f32.mrb[129].mxu0  ;;  %v6890_v1 = vpop.permute.xlu0 %6889  ;;  %v9299_v44 = vld [vmem:[#allocation7_spill] sm:$0xff]  ;;  %s5965_s30 = sshll.u32 %s432_s22, 6 }
0x1582   : > { %v4777_v21 = vpop.f32.mrb[130].mxu0  ;;  %v5054_v25 = vsel %vm906_vm2, %v9299_v44, %v6816_v57  ;;  %v6857_v16 = vunpack.i.h.bf16 %v8665_v54  ;;  %v6892_v3 = vunpack.i.h.bf16 %v6890_v1  ;;  %v6891_v57 = vunpack.i.l.bf16 %v6890_v1 }
0x1583   : > { %v6938_v9 = vpack.i.bf16 %v4777_v21, %v4774_v53  ;;  %v6728_v0 = vpop.f32.mrb[131].mxu0  ;;  %v6852_v53 = vunpack.i.h.bf16 %v6850_v48  ;;  %v6856_v21 = vunpack.i.l.bf16 %v8665_v54  ;;  %v5062_v42 = vsel %vm1103_vm3, %v5054_v25, %v6826_v51  ;;  %v9300_v51 = vld [vmem:[#allocation10_spill] sm:$0xff] }
0x1584   : > { %v6861_v0 = vunpack.i.l.bf16 %v8713_v50  ;;  %v5071_v13 = vsel %vm5068_vm4, %v5062_v42, %v6836_v7  ;;  %v5079_v54 = vsel %vm5077_vm5, %v5070_v45, %v6842_v59  ;;  %v5057_v59 = vsel %vm906_vm2, %v9300_v51, %v6872_v5  ;;  %v7312_v5 = vld [vmem:[%s7525_s24] sm:$0xff] }
0x1585   : > { %6924 = vrot.lane.b32.xlu1 %v9289_v36, %s9286_s0  ;;  %6919 = vrot.lane.b32.xlu0 %v9292_v55, %s9286_s0  ;;  %v5072_v36 = vsel %vm5068_vm4, %v5063_v14, %v6837_v58  ;;  %v5087_v55 = vsel %vm5086_vm6, %v5078_v37, %v6851_v49  ;;  %v9301_v37 = vld [vmem:[#allocation9_spill] sm:$0xff]  ;;  %v5065_v35 = vsel %vm1103_vm3, %v5057_v59, %v6882_v2  ;;  %v7315_v59 = vld [vmem:[%s7525_s24 + $0x18] sm:$0xff]  ;;  %s9107_s0 = scalar_lea.vmem [#allocation2], %s5965_s30  ;;  %s7324_s30 = sshll.u32 %s7401_s1, 4  ;;  %s7325_s30 = int_to_ptr.vmem [resolvable:$false] %s7324_s30 }
0x1586   : > { %v5096_v60 = vsel %vm5095_vm7, %v5087_v55, %v6861_v0  ;;  %v5056_v58 = vsel %vm906_vm2, %v9301_v37, %v6871_v41  ;;  %v5074_v1 = vsel %vm5068_vm4, %v5065_v35, %v6892_v3  ;;  %v6886_v55 = vunpack.i.l.bf16 %v8719_v6  ;;  %v7313_v3 = vld [vmem:[%s7525_s24 + $0x10] sm:$0xff]  ;;  %v7316_v35 = vld [vmem:[%s7525_s24 + $0x20] sm:$0xff] }
0x1587   : > { %v5064_v49 = vsel %vm1103_vm3, %v5056_v58, %v6881_v24 }
0x1588   : > { %v5073_v17 = vsel %vm5068_vm4, %v5064_v49, %v6891_v57 }
0x1589   : > { %6934 = vrot.lane.b32.xlu1 %v9294_v8, %s9293_s23  ;;  %6929 = vrot.lane.b32.xlu0 %v9295_v52, %s9293_s23  ;;  %v5080_v8 = vsel %vm5077_vm5, %v5071_v13, %v6846_v40  ;;  %v5081_v52 = vsel %vm5077_vm5, %v5072_v36, %v6847_v43  ;;  %s6102_s23 = sshll.u32 %s7494_s29, 10  ;;  %s9143_s29 = scalar_lea.sflag [#allocation3], %s432_s22 }
0x158a   : > { %s9132_s21 = scalar_lea.hbm %s9198_s13, %s6102_s23  ;;  %s7326_s23 = scalar_lea.vmem %s7325_s30, 2048 }
0x158d   : > { %6939 = vrot.lane.b32.xlu0 %v6938_v9, %s7399_s20  ;;  %v8744_v9 = vpop.permute.xlu1 %6894 }
0x15b5   : > { %v4821_v32 = vpop.f32.mrb[144].mxu1 }
0x15b6   : > { %v6733_v15 = vpop.f32.mrb[145].mxu1 }
0x15b7   : > { %v4824_v33 = vpop.f32.mrb[146].mxu1  ;;  %v5089_v15 = vsel %vm5086_vm6, %v5080_v8, %v6856_v21  ;;  %v6897_v8 = vunpack.i.h.bf16 %v8744_v9 }
0x15b8   : > { %v6943_v47 = vpack.i.bf16 %v4824_v33, %v4821_v32  ;;  %v6734_v62 = vpop.f32.mrb[147].mxu1  ;;  %v5088_v32 = vsel %vm5086_vm6, %v5079_v54, %v6852_v53  ;;  %v5090_v33 = vsel %vm5086_vm6, %v5081_v52, %v6857_v16  ;;  %v5098_v50 = vsel %vm5095_vm7, %v5089_v15, %v6866_v18 }
0x15b9   : > { %v5097_v48 = vsel %vm5095_vm7, %v5088_v32, %v6862_v19  ;;  %v5099_v39 = vsel %vm5095_vm7, %v5090_v33, %v6867_v23  ;;  %v6887_v54 = vunpack.i.h.bf16 %v8719_v6  ;;  %v6896_v52 = vunpack.i.l.bf16 %v8744_v9 }
0x15ba   : > { %6944 = vrot.lane.b32.xlu1 %v6943_v47, %s7399_s20 }
0x15ef   : > { %v6910_v47 = vpop.permute.xlu1 %6909  ;;  %v6900_v62 = vpop.permute.xlu0 %6899 }
0x15f0   : > { %v6912_v63 = vunpack.i.h.bf16 %v6910_v47  ;;  %v6911_v31 = vunpack.i.l.bf16 %v6910_v47  ;;  %v6902_v56 = vunpack.i.h.bf16 %v6900_v62  ;;  %v6901_v28 = vunpack.i.l.bf16 %v6900_v62 }
0x15f2   : > { %v5107_v10 = vsel %vm5104_vm8, %v5098_v50, %v6911_v31  ;;  %v5108_v22 = vsel %vm5104_vm8, %v5099_v39, %v6912_v63  ;;  %v5106_v38 = vsel %vm5104_vm8, %v5097_v48, %v6902_v56  ;;  %v5105_v46 = vsel %vm5104_vm8, %v5096_v60, %v6901_v28 }
0x15f3   : > { %v5114_v30 = vpack.c.bf16 %v5108_v22, %v5107_v10  ;;  %v5113_v20 = vpack.c.bf16 %v5106_v38, %v5105_v46  ;;  %v6905_v29 = vpop.permute.xlu0 %6904  ;;  %v6915_v23 = vpop.permute.xlu1 %6914  ;;  %v5066_v63 = vsel %vm1103_vm3, %v8675_v4, %v6886_v55  ;;  %v5067_v31 = vsel %vm1103_vm3, %v8671_v34, %v6887_v54 }
0x15f4   : > { %v6907_v61 = vunpack.i.h.bf16 %v6905_v29  ;;  %v6906_v45 = vunpack.i.l.bf16 %v6905_v29  ;;  %v6917_v15 = vunpack.i.h.bf16 %v6915_v23  ;;  %v6916_v33 = vunpack.i.l.bf16 %v6915_v23 }
0x15f5   : > { %6743 = vmatprep.mubr.msk.bf16.mxu0 %vm453_vm0, %v5113_v20  ;;  %v5075_v60 = vsel %vm5068_vm4, %v5066_v63, %v6896_v52  ;;  %v5076_v6 = vsel %vm5068_vm4, %v5067_v31, %v6897_v8 }
0x15f6   : > { %6744 = vmatmul.mubr.msk.bf16.vlgmr.msra.gmra.mrb[132].mxu0 %vm453_vm0, %v5114_v30  ;;  %v5083_v12 = vsel %vm5077_vm5, %v5074_v1, %v6907_v61  ;;  %v5082_v27 = vsel %vm5077_vm5, %v5073_v17, %v6906_v45  ;;  %v5084_v9 = vsel %vm5077_vm5, %v5075_v60, %v6916_v33  ;;  %v5085_v48 = vsel %vm5077_vm5, %v5076_v6, %v6917_v15  ;;  %v7314_v61 = vld [vmem:[%s7525_s24 + $0x8] sm:$0xff]  ;;  %v7317_v1 = vld [vmem:[%s7525_s24 + $0x30] sm:$0xff] }
0x15f7   : > { %v6920_v11 = vpop.permute.xlu0 %6919  ;;  %v6925_v18 = vpop.permute.xlu1 %6924 }
0x15f8   : > { %v6922_v7 = vunpack.i.h.bf16 %v6920_v11  ;;  %v6921_v53 = vunpack.i.l.bf16 %v6920_v11  ;;  %v6927_v47 = vunpack.i.h.bf16 %v6925_v18  ;;  %v6926_v62 = vunpack.i.l.bf16 %v6925_v18 }
0x15fa   : > { %v5091_v25 = vsel %vm5086_vm6, %v5082_v27, %v6921_v53  ;;  %v5092_v16 = vsel %vm5086_vm6, %v5083_v12, %v6922_v7  ;;  %v5093_v39 = vsel %vm5086_vm6, %v5084_v9, %v6926_v62  ;;  %v5094_v4 = vsel %vm5086_vm6, %v5085_v48, %v6927_v47  ;;  %v7318_v27 = vld [vmem:[%s7525_s24 + $0x28] sm:$0xff] }
0x15fb   : > { %v6930_v26 = vpop.permute.xlu0 %6929  ;;  %v6935_v32 = vpop.permute.xlu1 %6934  ;;  %v6966_v9 = vld [vmem:[%s9194_s9 + $0x4] ss:$8 sps:$4 sm:$0xff]   ;;  %v6964_v48 = vld [vmem:[%s9194_s9] ss:$8 sps:$4 sm:$0xff]  }
0x15fc   : > { %v6932_v43 = vunpack.i.h.bf16 %v6930_v26  ;;  %v6931_v40 = vunpack.i.l.bf16 %v6930_v26  ;;  %v6937_v56 = vunpack.i.h.bf16 %v6935_v32  ;;  %v6936_v28 = vunpack.i.l.bf16 %v6935_v32  ;;  %5444 = vmatprep.subr.bf16.mxu1 %v6966_v9 }
0x15fd   : > { %5445 = vmatpush1.bf16.msra.mxu1 %v6964_v48 }
0x15fe   : > { %v5100_v0 = vsel %vm5095_vm7, %v5091_v25, %v6931_v40  ;;  %v5101_v42 = vsel %vm5095_vm7, %v5092_v16, %v6932_v43  ;;  %v5102_v22 = vsel %vm5095_vm7, %v5093_v39, %v6936_v28  ;;  %v5103_v38 = vsel %vm5095_vm7, %v5094_v4, %v6937_v56  ;;  %v7319_v16 = vld [vmem:[%s7525_s24 + $0x38] sm:$0xff]  ;;  %v6972_v4 = vld [vmem:[%s9194_s9 + $0x24] ss:$8 sps:$4 sm:$0xff]   ;;  %s5899_s24 = sshll.u32 %s9107_s0, 4  ;;  %s9137_s24 = int_to_ptr.vmem [resolvable:$true] %s5899_s24 }
0x15ff   : > { %v6940_v44 = vpop.permute.xlu0 %6939  ;;  %v6967_v39 = vld [vmem:[%s9194_s9 + $0x10] ss:$8 sps:$4 sm:$0xff]   ;;  %s7320_s20 = scalar_lea.vmem %s9137_s24, 1024  ;;  %p7327_p0 = scmp.lt.s32.totalorder %s9137_s24, %s7325_s30 }
0x1600   : > { %v6942_v21 = vunpack.i.h.bf16 %v6940_v44  ;;  %v6941_v19 = vunpack.i.l.bf16 %v6940_v44  ;;  %p7321_p11 = scmp.ne.s32.totalorder %s9137_s24, %s7320_s20  ;;  %p7328_p1 = scmp.lt.s32.totalorder %s7326_s23, %s7320_s20 }
0x1602   : > { %v5110_v14 = vsel %vm5104_vm8, %v5101_v42, %v6942_v21  ;;  %v5109_v13 = vsel %vm5104_vm8, %v5100_v0, %v6941_v19  ;;  %p7322_p12 = pnand %p7321_p11, %p7511_p5  ;;  %p7329_p2 = por %p7328_p1, %p7327_p0 }
0x1603   : > { %v5115_v36 = vpack.c.bf16 %v5110_v14, %v5109_v13 }
0x1604   : > { %p7323_p13 = pneg %p7322_p12 }
0x1605   : > { %6747 = vmatprep.mubr.msk.bf16.mxu0 %vm453_vm0, %v5115_v36 }
0x1606   : > { %p7330_p3 = pnand %p7329_p2, %p7323_p13 }
0x162c   : > { %v6945_v50 = vpop.permute.xlu1 %6944 }
0x162d   : > { %v6947_v10 = vunpack.i.h.bf16 %v6945_v50  ;;  %v6946_v34 = vunpack.i.l.bf16 %v6945_v50  ;;  %v6969_v50 = vld [vmem:[%s9194_s9 + $0x14] ss:$8 sps:$4 sm:$0xff]  }
0x162e   : > { %5446 = vmatprep.subr.bf16.mxu1 %v6969_v50 }
0x162f   : > { %v5111_v46 = vsel %vm5104_vm8, %v5102_v22, %v6946_v34  ;;  %v5112_v30 = vsel %vm5104_vm8, %v5103_v38, %v6947_v10  ;;  %5447 = vmatpush1.bf16.msra.mxu1 %v6967_v39  ;;  %v6970_v10 = vld [vmem:[%s9194_s9 + $0x20] ss:$8 sps:$4 sm:$0xff]   ;;  %v6975_v34 = vld [vmem:[%s9194_s9 + $0x34] ss:$8 sps:$4 sm:$0xff]   ;;  %v6973_v22 = vld [vmem:[%s9194_s9 + $0x30] ss:$8 sps:$4 sm:$0xff]  }
0x1630   : > { %v5116_v20 = vpack.c.bf16 %v5112_v30, %v5111_v46  ;;  %5448 = vmatprep.subr.bf16.mxu1 %v6972_v4  ;;  %v7400_v38 = vmov 0  }
0x1631   : > { %5476 = vmatprep.mubr.bf16.mxu1 %v7400_v38 }
0x1632   : > { %6748 = vmatmul.mubr.msk.bf16.gmra.mrb[136].mxu0 %vm453_vm0, %v5116_v20 }
0x1633   : > { %5449 = vmatpush1.bf16.msra.mxu1 %v6970_v10 }
0x1634   : > { %5450 = vmatprep.subr.bf16.mxu1 %v6975_v34 }
0x1637   : > { %5451 = vmatpush1.bf16.msra.mxu1 %v6973_v22 }
0x16c9   : > { %v6745_v29 = vpop.f32.mrb[132].mxu0 }
0x16ca   : > { %v5195_v11 = vpop.f32.mrb[133].mxu0  ;;  %v8815_v57 = vadd.f32 %v7313_v3, %v6745_v29 }
0x16cb   : > { %v8812_v41 = vadd.f32 %v7312_v5, %v5195_v11  ;;  %v6746_v2 = vpop.f32.mrb[134].mxu0 }
0x16cc   : > { %v5198_v24 = vpop.f32.mrb[135].mxu0  ;;  %v8825_v37 = vadd.f32 %v7315_v59, %v6746_v2  ;;  %v5242_v58 = vsel %vm453_vm0, %v8815_v57, 0.0 }
0x16cd   : > { %v8818_v45 = vadd.f32 %v7314_v61, %v5198_v24  ;;  %v5236_v26 = vsel %vm453_vm0, %v8812_v41, 0.0 }
0x16ce   : > { %5237 = vadd.xlane.f32.xlu0 %v5236_v26  ;;  %v5245_v7 = vsel %vm453_vm0, %v8825_v37, 0.0 }
0x16cf   : > { %v5239_v51 = vsel %vm453_vm0, %v8818_v45, 0.0 }
0x16d0   : > { %5240 = vadd.xlane.f32.xlu1 %v5239_v51 }
0x16d2   : > { %5243 = vadd.xlane.f32.xlu0 %v5242_v58 }
0x16d6   : > { %5246 = vadd.xlane.f32.xlu0 %v5245_v7 }
0x1705   : > { %v6749_v53 = vpop.f32.mrb[136].mxu0 }
0x1706   : > { %v5211_v49 = vpop.f32.mrb[137].mxu0  ;;  %v8835_v12 = vadd.f32 %v7317_v1, %v6749_v53 }
0x1707   : > { %v8832_v43 = vadd.f32 %v7316_v35, %v5211_v49  ;;  %v6750_v40 = vpop.f32.mrb[138].mxu0 }
0x1708   : > { %v5214_v17 = vpop.f32.mrb[139].mxu0  ;;  %v8843_v21 = vadd.f32 %v7319_v16, %v6750_v40  ;;  %v5254_v0 = vsel %vm453_vm0, %v8835_v12, 0.0 }
0x1709   : > { %v8838_v44 = vadd.f32 %v7318_v27, %v5214_v17  ;;  %v5248_v25 = vsel %vm453_vm0, %v8832_v43, 0.0 }
0x170a   : > { %5249 = vadd.xlane.f32.xlu0 %v5248_v25  ;;  %v5257_v42 = vsel %vm453_vm0, %v8843_v21, 0.0 }
0x170b   : > { %v5251_v19 = vsel %vm453_vm0, %v8838_v44, 0.0 }
0x170c   : > { %5252 = vadd.xlane.f32.xlu1 %v5251_v19 }
0x170e   : > { %5255 = vadd.xlane.f32.xlu0 %v5254_v0 }
0x1710   : > { %5258 = vadd.xlane.f32.xlu1 %v5257_v42 }
0x175b   : > { %v5238_v14 = vpop.xlane.xlu0 %5237 }
0x175c   : > { %v5260_v13 = vmul.f32 0.015625, %v5238_v14 }
0x175d   : > { %v5241_v36 = vpop.xlane.xlu1 %5240 }
0x175e   : > { %v8852_v23 = vsub.f32 %v8812_v41, %v5260_v13  ;;  %v5261_v18 = vmul.f32 0.015625, %v5241_v36 }
0x175f   : > { %v5244_v54 = vpop.xlane.xlu0 %5243 }
0x1760   : > { %v8855_v55 = vsub.f32 %v8818_v45, %v5261_v18  ;;  %v5262_v8 = vmul.f32 0.015625, %v5244_v54  ;;  %v5276_v52 = vmul.f32 %v8852_v23, %v8852_v23 }
0x1762   : > { %v8860_v32 = vsub.f32 %v8815_v57, %v5262_v8  ;;  %v5284_v15 = vsel %vm453_vm0, %v5276_v52, 0.0  ;;  %v5277_v33 = vmul.f32 %v8855_v55, %v8855_v55  ;;  %v6066_v52 = vld [vmem:[%s9192_s7] ss:$0 sm:$0xff] }
0x1763   : > { %v5247_v47 = vpop.xlane.xlu0 %5246  ;;  %5285 = vadd.xlane.f32.xlu0 %v5284_v15 }
0x1764   : > { %v5263_v62 = vmul.f32 0.015625, %v5247_v47  ;;  %v5287_v63 = vsel %vm453_vm0, %v5277_v33, 0.0  ;;  %v5278_v31 = vmul.f32 %v8860_v32, %v8860_v32 }
0x1765   : > { %5288 = vadd.xlane.f32.xlu1 %v5287_v63 }
0x1766   : > { %v8869_v56 = vsub.f32 %v8825_v37, %v5263_v62  ;;  %v5290_v28 = vsel %vm453_vm0, %v5278_v31, 0.0  ;;  %v6067_v31 = vld [vmem:[%s9193_s8] ss:$0 sm:$0xff] }
0x1767   : > { %5291 = vadd.xlane.f32.xlu0 %v5290_v28 }
0x1768   : > { %v5279_v60 = vmul.f32 %v8869_v56, %v8869_v56 }
0x176a   : > { %v5293_v6 = vsel %vm453_vm0, %v5279_v60, 0.0 }
0x176b   : > { %5294 = vadd.xlane.f32.xlu1 %v5293_v6 }
0x1797   : > { %v5250_v46 = vpop.xlane.xlu0 %5249 }
0x1798   : > { %v5264_v30 = vmul.f32 0.015625, %v5250_v46 }
0x1799   : > { %v5253_v20 = vpop.xlane.xlu1 %5252 }
0x179a   : > { %v8901_v29 = vsub.f32 %v8832_v43, %v5264_v30  ;;  %v5265_v11 = vmul.f32 0.015625, %v5253_v20 }
0x179b   : > { %v5256_v5 = vpop.xlane.xlu0 %5255 }
0x179c   : > { %v8904_v2 = vsub.f32 %v8838_v44, %v5265_v11  ;;  %v5266_v24 = vmul.f32 0.015625, %v5256_v5  ;;  %v5280_v3 = vmul.f32 %v8901_v29, %v8901_v29 }
0x179d   : > { %v5259_v61 = vpop.xlane.xlu1 %5258 }
0x179e   : > { %v8909_v26 = vsub.f32 %v8835_v12, %v5266_v24  ;;  %v5267_v51 = vmul.f32 0.015625, %v5259_v61  ;;  %v5296_v59 = vsel %vm453_vm0, %v5280_v3, 0.0  ;;  %v5281_v58 = vmul.f32 %v8904_v2, %v8904_v2 }
0x179f   : > { %5297 = vadd.xlane.f32.xlu0 %v5296_v59 }
0x17a0   : > { %v8915_v7 = vsub.f32 %v8843_v21, %v5267_v51  ;;  %v5299_v53 = vsel %vm453_vm0, %v5281_v58, 0.0  ;;  %v5282_v49 = vmul.f32 %v8909_v26, %v8909_v26 }
0x17a1   : > { %5300 = vadd.xlane.f32.xlu1 %v5299_v53 }
0x17a2   : > { %v5302_v35 = vsel %vm453_vm0, %v5282_v49, 0.0  ;;  %v5283_v40 = vmul.f32 %v8915_v7, %v8915_v7 }
0x17a3   : > { %5303 = vadd.xlane.f32.xlu0 %v5302_v35 }
0x17a4   : > { %v5305_v17 = vsel %vm453_vm0, %v5283_v40, 0.0 }
0x17a5   : > { %5306 = vadd.xlane.f32.xlu1 %v5305_v17 }
0x17f0   : > { %v5286_v1 = vpop.xlane.xlu0 %5285 }
0x17f1   : > { %v5308_v27 = vmul.f32 0.015625, %v5286_v1 }
0x17f2   : > { %v5289_v25 = vpop.xlane.xlu1 %5288 }
0x17f3   : > { %v5316_v16 = vadd.f32 1e-05, %v5308_v27  ;;  %v5309_v19 = vmul.f32 0.015625, %v5289_v25 }
0x17f4   : > { %v5292_v0 = vpop.xlane.xlu0 %5291 }
0x17f5   : > { %7264 = vrsqrt.f32 %v5316_v16  ;;  %v5317_v42 = vadd.f32 1e-05, %v5309_v19  ;;  %v5310_v14 = vmul.f32 0.015625, %v5292_v0 }
0x17f7   : > { %7266 = vrsqrt.f32 %v5317_v42  ;;  %v5318_v13 = vadd.f32 1e-05, %v5310_v14 }
0x17f8   : > { %v5295_v36 = vpop.xlane.xlu1 %5294 }
0x17f9   : > { %7268 = vrsqrt.f32 %v5318_v13  ;;  %v5311_v18 = vmul.f32 0.015625, %v5295_v36  ;;  %v6978_v36 = vld [vmem:[%s9196_s11 + $0x48] sm:$0xff]  }
0x17fb   : > { %v5319_v54 = vadd.f32 1e-05, %v5311_v18  ;;  %v6980_v18 = vld [vmem:[%s9196_s11 + $0x50] sm:$0xff]  }
0x17fd   : > { %7270 = vrsqrt.f32 %v5319_v54  ;;  %v6981_v54 = vld [vmem:[%s9196_s11 + $0x10] sm:$0xff]  }
0x17ff   : > { %v7265_v8 = vpop.eup %7264 }
0x1800   : > { %v5332_v15 = vmul.f32 %v7265_v8, %v8852_v23  ;;  %v6982_v8 = vld [vmem:[%s9196_s11 + $0x58] sm:$0xff]  }
0x1801   : > { %v7267_v33 = vpop.eup %7266 }
0x1802   : > { %v5346_v47 = vmul.f32 %v6066_v52, %v5332_v15  ;;  %v5333_v62 = vmul.f32 %v7267_v33, %v8855_v55  ;;  %v6984_v15 = vld [vmem:[%s9196_s11 + $0x60] sm:$0xff]  }
0x1803   : > { %v7269_v63 = vpop.eup %7268  ;;  %v6985_v33 = vld [vmem:[%s9196_s11 + $0x20] sm:$0xff]  }
0x1804   : > { %v5347_v28 = vmul.f32 %v6066_v52, %v5333_v62  ;;  %v5334_v60 = vmul.f32 %v7269_v63, %v8860_v32  ;;  %v5360_v6 = vadd.f32 %v6067_v31, %v5346_v47  ;;  %v6986_v47 = vld [vmem:[%s9196_s11 + $0x68] sm:$0xff]   ;;  %v6988_v63 = vld [vmem:[%s9196_s11 + $0x70] sm:$0xff]  }
0x1805   : > { %v6987_v62 = vld [vmem:[%s9196_s11 + $0x28] sm:$0xff]  }
0x1806   : > { %v5361_v9 = vadd.f32 %v6067_v31, %v5347_v28  ;;  %v5348_v23 = vmul.f32 %v6066_v52, %v5334_v60  ;;  %v6990_v28 = vld [vmem:[%s9196_s11 + $0x78] sm:$0xff]  }
0x1807   : > { %v7271_v48 = vpop.eup %7270  ;;  %v6991_v60 = vld [vmem:[%s9196_s11 + $0x38] sm:$0xff]  }
0x1808   : > { %v5335_v50 = vmul.f32 %v7271_v48, %v8869_v56  ;;  %v5368_v39 = vpack.c.bf16 %v5361_v9, %v5360_v6  ;;  %v5362_v10 = vadd.f32 %v6067_v31, %v5348_v23  ;;  %v5382_v6 = vlaneseq }
0x180a   : > { %6076 = vmatmul.mubr.msk.bf16.vlgmr.msra.gmra.mrb[148].mxu1 %vm453_vm0, %v5368_v39  ;;  %v5349_v4 = vmul.f32 %v6066_v52, %v5335_v50  ;;  %v5383_v9 = vshrl.u32 %v5382_v6, 7  ;;  %v5380_v50 = vld [vmem:[%s9195_s10] sm:$0x3] }
0x180b   : > { %5486 = vmatprep.mubr.bf16.mxu1 %v7400_v38 }
0x180c   : > { %v5363_v55 = vadd.f32 %v6067_v31, %v5349_v4  ;;  %v5384_v48 = vsub.s32 0, %v5383_v9  ;;  %v5388_v39 = vsub.s32 1, %v5383_v9 }
0x180e   : > { %v5369_v34 = vpack.c.bf16 %v5363_v55, %v5362_v10  ;;  %v8996_v23 = vrot.slane %v5380_v50, %v5384_v48  ;;  %v8998_v4 = vrot.slane %v5380_v50, %v5388_v39 }
0x1812   : > { %6077 = vmatmul.mubr.msk.bf16.gmra.mrb[152].mxu1 %vm453_vm0, %v5369_v34 }
0x1813   : > { %5496 = vmatprep.mubr.bf16.mxu1 %v7400_v38 }
0x182c   : > { %v5298_v32 = vpop.xlane.xlu0 %5297 }
0x182d   : > { %v5312_v22 = vmul.f32 0.015625, %v5298_v32 }
0x182e   : > { %v5301_v46 = vpop.xlane.xlu1 %5300 }
0x182f   : > { %v5320_v30 = vadd.f32 1e-05, %v5312_v22  ;;  %v5313_v20 = vmul.f32 0.015625, %v5301_v46 }
0x1830   : > { %v5304_v56 = vpop.xlane.xlu0 %5303 }
0x1831   : > { %7272 = vrsqrt.f32 %v5320_v30  ;;  %v5321_v11 = vadd.f32 1e-05, %v5313_v20  ;;  %v5314_v5 = vmul.f32 0.015625, %v5304_v56 }
0x1832   : > { %v5307_v24 = vpop.xlane.xlu1 %5306 }
0x1833   : > { %7274 = vrsqrt.f32 %v5321_v11  ;;  %v5322_v3 = vadd.f32 1e-05, %v5314_v5  ;;  %v5315_v61 = vmul.f32 0.015625, %v5307_v24 }
0x1835   : > { %7276 = vrsqrt.f32 %v5322_v3  ;;  %v5323_v51 = vadd.f32 1e-05, %v5315_v61 }
0x1837   : > { %7278 = vrsqrt.f32 %v5323_v51 }
0x183b   : > { %v7273_v59 = vpop.eup %7272 }
0x183c   : > { %v5336_v58 = vmul.f32 %v7273_v59, %v8901_v29 }
0x183d   : > { %v7275_v53 = vpop.eup %7274 }
0x183e   : > { %v5337_v49 = vmul.f32 %v7275_v53, %v8904_v2  ;;  %v5350_v35 = vmul.f32 %v6066_v52, %v5336_v58 }
0x183f   : > { %v7277_v40 = vpop.eup %7276 }
0x1840   : > { %v5351_v17 = vmul.f32 %v6066_v52, %v5337_v49  ;;  %v5338_v27 = vmul.f32 %v7277_v40, %v8909_v26  ;;  %v5364_v16 = vadd.f32 %v6067_v31, %v5350_v35  ;;  %v6976_v26 = vld [vmem:[%s9196_s11 + $0x40] sm:$0xff]  }
0x1841   : > { %v7279_v1 = vpop.eup %7278  ;;  %6263 = vmatprep.subr.bf16.mxu0 %v6976_v26 }
0x1842   : > { %v5339_v25 = vmul.f32 %v7279_v1, %v8915_v7  ;;  %v5365_v19 = vadd.f32 %v6067_v31, %v5351_v17  ;;  %v5352_v14 = vmul.f32 %v6066_v52, %v5338_v27  ;;  %v6977_v7 = vld [vmem:[%s9196_s11] sm:$0xff]  }
0x1843   : > { %6264 = vmatpush3.bf16.msra.mxu0 %v6977_v7 }
0x1844   : > { %v5370_v0 = vpack.c.bf16 %v5365_v19, %v5364_v16  ;;  %v5353_v42 = vmul.f32 %v6066_v52, %v5339_v25  ;;  %v5366_v13 = vadd.f32 %v6067_v31, %v5352_v14  ;;  %6265 = vmatprep.subr.bf16.mxu0 %v6978_v36  ;;  %v6983_v52 = vld [vmem:[%s9196_s11 + $0x18] sm:$0xff]  }
0x1846   : > { %6078 = vmatmul.mubr.msk.bf16.gmra.mrb[156].mxu1 %vm453_vm0, %v5370_v0  ;;  %v5367_v29 = vadd.f32 %v6067_v31, %v5353_v42  ;;  %v6989_v31 = vld [vmem:[%s9196_s11 + $0x30] sm:$0xff]  }
0x1847   : > { %5506 = vmatprep.mubr.bf16.mxu1 %v7400_v38  ;;  %v6979_v38 = vld [vmem:[%s9196_s11 + $0x8] sm:$0xff]  }
0x1848   : > { %v5371_v2 = vpack.c.bf16 %v5367_v29, %v5366_v13  ;;  %6266 = vmatpush3.bf16.msra.mxu0 %v6979_v38 }
0x1849   : > { %6267 = vmatprep.subr.bf16.mxu0 %v6980_v18 }
0x184c   : > { %6268 = vmatpush3.bf16.msra.mxu0 %v6981_v54 }
0x184d   : > { %6269 = vmatprep.subr.bf16.mxu0 %v6982_v8 }
0x184e   : > { %6079 = vmatmul.mubr.msk.bf16.gmra.mrb[160].mxu1 %vm453_vm0, %v5371_v2 }
0x1850   : > { %6270 = vmatpush3.bf16.msra.mxu0 %v6983_v52 }
0x1851   : > { %6271 = vmatprep.subr.bf16.mxu0 %v6984_v15 }
0x1854   : > { %6272 = vmatpush3.bf16.msra.mxu0 %v6985_v33 }
0x1855   : > { %6273 = vmatprep.subr.bf16.mxu0 %v6986_v47 }
0x1858   : > { %6274 = vmatpush3.bf16.msra.mxu0 %v6987_v62 }
0x1859   : > { %6275 = vmatprep.subr.bf16.mxu0 %v6988_v63 }
0x185c   : > { %6276 = vmatpush3.bf16.msra.mxu0 %v6989_v31 }
0x185d   : > { %6277 = vmatprep.subr.bf16.mxu0 %v6990_v28 }
0x1860   : > { %6278 = vmatpush3.bf16.msra.mxu0 %v6991_v60 }
0x18dd   : > { %v5478_v55 = vpop.f32.mrb[148].mxu1 }
0x18de   : > { %v9001_v10 = vadd.f32 %v5478_v55, %v8996_v23  ;;  %v5480_v34 = vpop.f32.mrb[149].mxu1 }
0x18df   : > { %v9004_v32 = vadd.f32 %v5480_v34, %v8998_v4  ;;  %v5482_v22 = vpop.f32.mrb[150].mxu1 }
0x18e0   : > { %v5533_v46 = vmul.f32 0.044715, %v9001_v10  ;;  %v9008_v30 = vadd.f32 %v5482_v22, %v8996_v23  ;;  %v5484_v20 = vpop.f32.mrb[151].mxu1 }
0x18e1   : > { %v5534_v56 = vmul.f32 0.044715, %v9004_v32  ;;  %v9012_v11 = vadd.f32 %v5484_v20, %v8998_v4 }
0x18e2   : > { %v5549_v5 = vmul.f32 %v5533_v46, %v9001_v10  ;;  %v5535_v24 = vmul.f32 0.044715, %v9008_v30 }
0x18e3   : > { %v5550_v3 = vmul.f32 %v5534_v56, %v9004_v32  ;;  %v5536_v61 = vmul.f32 0.044715, %v9012_v11 }
0x18e4   : > { %v5565_v51 = vmul.f32 %v5549_v5, %v9001_v10  ;;  %v5551_v59 = vmul.f32 %v5535_v24, %v9008_v30 }
0x18e5   : > { %v5566_v58 = vmul.f32 %v5550_v3, %v9004_v32  ;;  %v5552_v53 = vmul.f32 %v5536_v61, %v9012_v11  ;;  %v5488_v49 = vpop.f32.mrb[152].mxu1  ;;  %v5517_v3 = vmul.f32 0.5, %v9001_v10  ;;  %v5519_v61 = vmul.f32 0.5, %v9008_v30 }
0x18e6   : > { %v5581_v35 = vadd.f32 %v5565_v51, %v9001_v10  ;;  %v5567_v40 = vmul.f32 %v5551_v59, %v9008_v30  ;;  %v9025_v17 = vadd.f32 %v5488_v49, %v8996_v23  ;;  %v5490_v1 = vpop.f32.mrb[153].mxu1  ;;  %v5518_v59 = vmul.f32 0.5, %v9004_v32 }
0x18e7   : > { %v5568_v27 = vmul.f32 %v5552_v53, %v9012_v11  ;;  %v9029_v25 = vadd.f32 %v5490_v1, %v8998_v4  ;;  %v5492_v16 = vpop.f32.mrb[154].mxu1  ;;  %v5582_v19 = vadd.f32 %v5566_v58, %v9004_v32  ;;  %v5520_v58 = vmul.f32 0.5, %v9012_v11 }
0x18e8   : > { %v5597_v0 = vmul.f32 0.7978846, %v5581_v35  ;;  %v5583_v42 = vadd.f32 %v5567_v40, %v9008_v30  ;;  %v5537_v14 = vmul.f32 0.044715, %v9025_v17  ;;  %v5493_v29 = vadd.f32 %v5492_v16, %v8996_v23  ;;  %v5494_v13 = vpop.f32.mrb[155].mxu1 }
0x18e9   : > { %v5538_v2 = vmul.f32 0.044715, %v9029_v25  ;;  %v5495_v26 = vadd.f32 %v5494_v13, %v8998_v4  ;;  %v5584_v7 = vadd.f32 %v5568_v27, %v9012_v11  ;;  %v5598_v36 = vmul.f32 0.7978846, %v5582_v19 }
0x18ea   : > { %7280 = vtanh.f32 %v5597_v0  ;;  %v5599_v38 = vmul.f32 0.7978846, %v5583_v42  ;;  %v5553_v18 = vmul.f32 %v5537_v14, %v9025_v17  ;;  %v5539_v54 = vmul.f32 0.044715, %v5493_v29 }
0x18eb   : > { %v5554_v8 = vmul.f32 %v5538_v2, %v9029_v25  ;;  %v5540_v52 = vmul.f32 0.044715, %v5495_v26  ;;  %v5600_v15 = vmul.f32 0.7978846, %v5584_v7  ;;  %7282 = vtanh.f32 %v5598_v36 }
0x18ec   : > { %7284 = vtanh.f32 %v5599_v38  ;;  %v5569_v33 = vmul.f32 %v5553_v18, %v9025_v17  ;;  %v5555_v47 = vmul.f32 %v5539_v54, %v5493_v29  ;;  %v5521_v30 = vmul.f32 0.5, %v9025_v17 }
0x18ed   : > { %v5570_v62 = vmul.f32 %v5554_v8, %v9029_v25  ;;  %v5556_v63 = vmul.f32 %v5540_v52, %v5495_v26  ;;  %7286 = vtanh.f32 %v5600_v15  ;;  %v5523_v32 = vmul.f32 0.5, %v5493_v29 }
0x18ee   : > { %v5571_v31 = vmul.f32 %v5555_v47, %v5493_v29  ;;  %v5585_v28 = vadd.f32 %v5569_v33, %v9025_v17  ;;  %v5522_v11 = vmul.f32 0.5, %v9029_v25  ;;  %v5524_v7 = vmul.f32 0.5, %v5495_v26 }
0x18ef   : > { %v5572_v60 = vmul.f32 %v5556_v63, %v5495_v26  ;;  %v5586_v6 = vadd.f32 %v5570_v62, %v9029_v25 }
0x18f0   : > { %v5587_v9 = vadd.f32 %v5571_v31, %v5493_v29  ;;  %v5601_v48 = vmul.f32 0.7978846, %v5585_v28 }
0x18f1   : > { %v5588_v50 = vadd.f32 %v5572_v60, %v5495_v26  ;;  %v5602_v39 = vmul.f32 0.7978846, %v5586_v6 }
0x18f2   : > { %v5603_v55 = vmul.f32 0.7978846, %v5587_v9  ;;  %7288 = vtanh.f32 %v5601_v48 }
0x18f3   : > { %v5604_v34 = vmul.f32 0.7978846, %v5588_v50  ;;  %7290 = vtanh.f32 %v5602_v39 }
0x18f4   : > { %v7281_v22 = vpop.eup %7280  ;;  %7292 = vtanh.f32 %v5603_v55 }
0x18f5   : > { %v7283_v46 = vpop.eup %7282  ;;  %v5629_v20 = vadd.f32 1.0, %v7281_v22  ;;  %7294 = vtanh.f32 %v5604_v34 }
0x18f6   : > { %v7285_v56 = vpop.eup %7284  ;;  %v5630_v5 = vadd.f32 1.0, %v7283_v46 }
0x18f7   : > { %v7287_v24 = vpop.eup %7286  ;;  %v5631_v51 = vadd.f32 1.0, %v7285_v56  ;;  %v5645_v49 = vmul.f32 %v5629_v20, %v5517_v3 }
0x18f8   : > { %v5632_v53 = vadd.f32 1.0, %v7287_v24  ;;  %v5646_v40 = vmul.f32 %v5630_v5, %v5518_v59 }
0x18f9   : > { %v5647_v35 = vmul.f32 %v5631_v51, %v5519_v61 }
0x18fa   : > { %v5648_v1 = vmul.f32 %v5632_v53, %v5520_v58 }
0x18fb   : > { %v5661_v27 = vpack.c.bf16 %v5647_v35, %v5645_v49 }
0x18fc   : > { %v7289_v16 = vpop.eup %7288  ;;  %v5662_v19 = vpack.c.bf16 %v5648_v1, %v5646_v40 }
0x18fd   : > { %v7291_v0 = vpop.eup %7290  ;;  %v5633_v42 = vadd.f32 1.0, %v7289_v16 }
0x18fe   : > { %v7293_v14 = vpop.eup %7292  ;;  %5836 = vmatprep.mubr.bf16.mxu0 %v5662_v19  ;;  %v5634_v10 = vadd.f32 1.0, %v7291_v0 }
0x18ff   : > { %v7295_v13 = vpop.eup %7294  ;;  %5837 = vmatmul.mubr.bf16.vlgmr.msra.gmra.mrb[140].mxu0 %v5661_v27  ;;  %v5635_v2 = vadd.f32 1.0, %v7293_v14  ;;  %v5649_v38 = vmul.f32 %v5633_v42, %v5521_v30 }
0x1900   : > { %v5636_v36 = vadd.f32 1.0, %v7295_v13  ;;  %v5650_v54 = vmul.f32 %v5634_v10, %v5522_v11 }
0x1901   : > { %v5651_v18 = vmul.f32 %v5635_v2, %v5523_v32 }
0x1902   : > { %v5652_v8 = vmul.f32 %v5636_v36, %v5524_v7 }
0x1903   : > { %v5663_v52 = vpack.c.bf16 %v5651_v18, %v5649_v38 }
0x1904   : > { %v5664_v15 = vpack.c.bf16 %v5652_v8, %v5650_v54 }
0x1906   : > { %5844 = vmatprep.mubr.bf16.mxu0 %v5664_v15 }
0x1907   : > { %5845 = vmatmul.mubr.bf16.gmra.mrb[144].mxu0 %v5663_v52 }
0x1919   : > { %v5498_v33 = vpop.f32.mrb[156].mxu1 }
0x191a   : > { %v9051_v47 = vadd.f32 %v5498_v33, %v8996_v23  ;;  %v5500_v62 = vpop.f32.mrb[157].mxu1 }
0x191b   : > { %v9054_v17 = vadd.f32 %v5500_v62, %v8998_v4  ;;  %v5502_v29 = vpop.f32.mrb[158].mxu1 }
0x191c   : > { %v5541_v25 = vmul.f32 0.044715, %v9051_v47  ;;  %v9058_v26 = vadd.f32 %v5502_v29, %v8996_v23  ;;  %v5504_v63 = vpop.f32.mrb[159].mxu1 }
0x191d   : > { %v5542_v31 = vmul.f32 0.044715, %v9054_v17  ;;  %v9062_v28 = vadd.f32 %v5504_v63, %v8998_v4 }
0x191e   : > { %v5557_v60 = vmul.f32 %v5541_v25, %v9051_v47  ;;  %v5543_v6 = vmul.f32 0.044715, %v9058_v26 }
0x191f   : > { %v5558_v9 = vmul.f32 %v5542_v31, %v9054_v17  ;;  %v5544_v48 = vmul.f32 0.044715, %v9062_v28 }
0x1920   : > { %v5573_v50 = vmul.f32 %v5557_v60, %v9051_v47  ;;  %v5559_v39 = vmul.f32 %v5543_v6, %v9058_v26  ;;  %v5525_v60 = vmul.f32 0.5, %v9051_v47  ;;  %v5527_v6 = vmul.f32 0.5, %v9058_v26 }
0x1921   : > { %v5574_v55 = vmul.f32 %v5558_v9, %v9054_v17  ;;  %v5560_v34 = vmul.f32 %v5544_v48, %v9062_v28  ;;  %v5508_v22 = vpop.f32.mrb[160].mxu1  ;;  %v5526_v48 = vmul.f32 0.5, %v9054_v17 }
0x1922   : > { %v5575_v46 = vmul.f32 %v5559_v39, %v9058_v26  ;;  %v9074_v20 = vadd.f32 %v5508_v22, %v8996_v23  ;;  %v5510_v56 = vpop.f32.mrb[161].mxu1  ;;  %v5589_v5 = vadd.f32 %v5573_v50, %v9051_v47  ;;  %v5528_v50 = vmul.f32 0.5, %v9062_v28 }
0x1923   : > { %v5576_v24 = vmul.f32 %v5560_v34, %v9062_v28  ;;  %v9079_v3 = vadd.f32 %v5510_v56, %v8998_v4  ;;  %v5512_v61 = vpop.f32.mrb[162].mxu1  ;;  %v5590_v51 = vadd.f32 %v5574_v55, %v9054_v17 }
0x1924   : > { %v5545_v59 = vmul.f32 0.044715, %v9074_v20  ;;  %v5513_v58 = vadd.f32 %v5512_v61, %v8996_v23  ;;  %v5514_v53 = vpop.f32.mrb[163].mxu1  ;;  %v5591_v49 = vadd.f32 %v5575_v46, %v9058_v26  ;;  %v5605_v35 = vmul.f32 0.7978846, %v5589_v5 }
0x1925   : > { %v5546_v40 = vmul.f32 0.044715, %v9079_v3  ;;  %v5515_v1 = vadd.f32 %v5514_v53, %v8998_v4  ;;  %v5592_v27 = vadd.f32 %v5576_v24, %v9062_v28  ;;  %v5606_v16 = vmul.f32 0.7978846, %v5590_v51 }
0x1926   : > { %v5561_v19 = vmul.f32 %v5545_v59, %v9074_v20  ;;  %v5547_v0 = vmul.f32 0.044715, %v5513_v58  ;;  %v5607_v42 = vmul.f32 0.7978846, %v5591_v49  ;;  %7296 = vtanh.f32 %v5605_v35 }
0x1927   : > { %v5562_v14 = vmul.f32 %v5546_v40, %v9079_v3  ;;  %v5548_v10 = vmul.f32 0.044715, %v5515_v1  ;;  %v5608_v23 = vmul.f32 0.7978846, %v5592_v27  ;;  %7298 = vtanh.f32 %v5606_v16 }
0x1928   : > { %v5577_v13 = vmul.f32 %v5561_v19, %v9074_v20  ;;  %v5563_v30 = vmul.f32 %v5547_v0, %v5513_v58  ;;  %7300 = vtanh.f32 %v5607_v42  ;;  %v5529_v17 = vmul.f32 0.5, %v9074_v20 }
0x1929   : > { %v5578_v32 = vmul.f32 %v5562_v14, %v9079_v3  ;;  %v5564_v4 = vmul.f32 %v5548_v10, %v5515_v1  ;;  %7302 = vtanh.f32 %v5608_v23  ;;  %v5531_v26 = vmul.f32 0.5, %v5513_v58 }
0x192a   : > { %v5579_v2 = vmul.f32 %v5563_v30, %v5513_v58  ;;  %v5593_v11 = vadd.f32 %v5577_v13, %v9074_v20  ;;  %v5530_v49 = vmul.f32 0.5, %v9079_v3  ;;  %v5532_v35 = vmul.f32 0.5, %v5515_v1  ;;  %v6080_v20 = vld [vmem:[%s9197_s12] ss:$0 sm:$0xff] }
0x192b   : > { %v5580_v7 = vmul.f32 %v5564_v4, %v5515_v1  ;;  %v5594_v36 = vadd.f32 %v5578_v32, %v9079_v3 }
0x192c   : > { %v5595_v38 = vadd.f32 %v5579_v2, %v5513_v58  ;;  %v5609_v18 = vmul.f32 0.7978846, %v5593_v11 }
0x192d   : > { %v5596_v54 = vadd.f32 %v5580_v7, %v5515_v1  ;;  %v5610_v8 = vmul.f32 0.7978846, %v5594_v36 }
0x192e   : > { %v5611_v52 = vmul.f32 0.7978846, %v5595_v38  ;;  %7304 = vtanh.f32 %v5609_v18 }
0x192f   : > { %v5612_v15 = vmul.f32 0.7978846, %v5596_v54  ;;  %7306 = vtanh.f32 %v5610_v8 }
0x1930   : > { %v7297_v33 = vpop.eup %7296  ;;  %7308 = vtanh.f32 %v5611_v52 }
0x1931   : > { %v7299_v62 = vpop.eup %7298  ;;  %v5637_v29 = vadd.f32 1.0, %v7297_v33  ;;  %7310 = vtanh.f32 %v5612_v15 }
0x1932   : > { %v7301_v25 = vpop.eup %7300  ;;  %v5638_v63 = vadd.f32 1.0, %v7299_v62 }
0x1933   : > { %v7303_v31 = vpop.eup %7302  ;;  %v5639_v9 = vadd.f32 1.0, %v7301_v25  ;;  %v5653_v55 = vmul.f32 %v5637_v29, %v5525_v60 }
0x1934   : > { %v5640_v39 = vadd.f32 1.0, %v7303_v31  ;;  %v5654_v22 = vmul.f32 %v5638_v63, %v5526_v48 }
0x1935   : > { %v5655_v34 = vmul.f32 %v5639_v9, %v5527_v6 }
0x1936   : > { %v5656_v46 = vmul.f32 %v5640_v39, %v5528_v50 }
0x1937   : > { %v5665_v56 = vpack.c.bf16 %v5655_v34, %v5653_v55 }
0x1938   : > { %v7305_v5 = vpop.eup %7304  ;;  %v5666_v24 = vpack.c.bf16 %v5656_v46, %v5654_v22 }
0x1939   : > { %v7307_v61 = vpop.eup %7306  ;;  %v5641_v51 = vadd.f32 1.0, %v7305_v5 }
0x193a   : > { %v7309_v59 = vpop.eup %7308  ;;  %5852 = vmatprep.mubr.bf16.mxu0 %v5666_v24  ;;  %v5642_v47 = vadd.f32 1.0, %v7307_v61 }
0x193b   : > { %v7311_v53 = vpop.eup %7310  ;;  %5853 = vmatmul.mubr.bf16.gmra.mrb[148].mxu0 %v5665_v56  ;;  %v5643_v28 = vadd.f32 1.0, %v7309_v59  ;;  %v5657_v27 = vmul.f32 %v5641_v51, %v5529_v17 }
0x193c   : > { %v5644_v40 = vadd.f32 1.0, %v7311_v53  ;;  %v5658_v19 = vmul.f32 %v5642_v47, %v5530_v49 }
0x193d   : > { %v5659_v16 = vmul.f32 %v5643_v28, %v5531_v26 }
0x193e   : > { %v5660_v0 = vmul.f32 %v5644_v40, %v5532_v35 }
0x193f   : > { %v5667_v42 = vpack.c.bf16 %v5659_v16, %v5657_v27 }
0x1940   : > { %v5668_v14 = vpack.c.bf16 %v5660_v0, %v5658_v19 }
0x1942   : > { %5860 = vmatprep.mubr.bf16.mxu0 %v5668_v14 }
0x1943   : > { %5861 = vmatmul.mubr.bf16.gmra.mrb[152].mxu0 %v5667_v42 }
0x19d2   : > { %v6279_v10 = vpop.f32.mrb[140].mxu0 }
0x19d3   : > { %v6280_v58 = vpop.f32.mrb[141].mxu0 }
0x19d4   : > { %v6281_v3 = vadd.f32 %v6280_v58, %v6279_v10  ;;  %v6282_v1 = vpop.f32.mrb[142].mxu0 }
0x19d5   : > { %v6283_v23 = vpop.f32.mrb[143].mxu0 }
0x19d6   : > { %v5839_v13 = vadd.f32 %v6281_v3, %v6080_v20  ;;  %v6284_v30 = vadd.f32 %v6283_v23, %v6282_v1 }
0x19d8   : > { %v5869_v32 = vadd.f32 %v5839_v13, %v8812_v41  ;;  %v5842_v4 = vadd.f32 %v6284_v30, %v6080_v20 }
0x19da   : > { %5877 = vst.msk [vmem:[%s9107_s0] sm:$0xff] %vm453_vm0, %v5869_v32  ;;  %v5870_v2 = vadd.f32 %v5842_v4, %v8818_v45  ;;  %v6285_v11 = vpop.f32.mrb[144].mxu0 }
0x19db   : > { %v6286_v7 = vpop.f32.mrb[145].mxu0 }
0x19dc   : > { %5878 = vst.msk [vmem:[%s9107_s0 + $0x8] sm:$0xff] %vm453_vm0, %v5870_v2  ;;  %v6287_v36 = vadd.f32 %v6286_v7, %v6285_v11  ;;  %v6288_v38 = vpop.f32.mrb[146].mxu0 }
0x19dd   : > { %v6289_v18 = vpop.f32.mrb[147].mxu0 }
0x19de   : > { %v5847_v54 = vadd.f32 %v6287_v36, %v6080_v20  ;;  %v6290_v41 = vadd.f32 %v6289_v18, %v6288_v38 }
0x19e0   : > { %v5871_v8 = vadd.f32 %v5847_v54, %v8815_v57  ;;  %v5850_v52 = vadd.f32 %v6290_v41, %v6080_v20 }
0x19e2   : > { %5879 = vst.msk [vmem:[%s9107_s0 + $0x10] sm:$0xff] %vm453_vm0, %v5871_v8  ;;  %v5872_v15 = vadd.f32 %v5850_v52, %v8825_v37 }
0x19e4   : > { %5880 = vst.msk [vmem:[%s9107_s0 + $0x18] sm:$0xff] %vm453_vm0, %v5872_v15 }
0x1a0e   : > { %v6291_v45 = vpop.f32.mrb[148].mxu0 }
0x1a0f   : > { %v6292_v33 = vpop.f32.mrb[149].mxu0 }
0x1a10   : > { %v6293_v62 = vadd.f32 %v6292_v33, %v6291_v45  ;;  %v6294_v29 = vpop.f32.mrb[150].mxu0 }
0x1a11   : > { %v6295_v25 = vpop.f32.mrb[151].mxu0 }
0x1a12   : > { %v5855_v63 = vadd.f32 %v6293_v62, %v6080_v20  ;;  %v6296_v31 = vadd.f32 %v6295_v25, %v6294_v29 }
0x1a14   : > { %v5873_v60 = vadd.f32 %v5855_v63, %v8832_v43  ;;  %v5858_v57 = vadd.f32 %v6296_v31, %v6080_v20 }
0x1a16   : > { %5881 = vst.msk [vmem:[%s9107_s0 + $0x20] sm:$0xff] %vm453_vm0, %v5873_v60  ;;  %v5874_v6 = vadd.f32 %v5858_v57, %v8838_v44  ;;  %v6297_v37 = vpop.f32.mrb[152].mxu0 }
0x1a17   : > { %v6298_v9 = vpop.f32.mrb[153].mxu0 }
0x1a18   : > { %5882 = vst.msk [vmem:[%s9107_s0 + $0x28] sm:$0xff] %vm453_vm0, %v5874_v6  ;;  %v6299_v48 = vadd.f32 %v6298_v9, %v6297_v37  ;;  %v6300_v50 = vpop.f32.mrb[154].mxu0 }
0x1a19   : > { %v6301_v39 = vpop.f32.mrb[155].mxu0 }
0x1a1a   : > { %v5863_v55 = vadd.f32 %v6299_v48, %v6080_v20  ;;  %v6302_v34 = vadd.f32 %v6301_v39, %v6300_v50 }
0x1a1c   : > { %v5875_v43 = vadd.f32 %v5863_v55, %v8835_v12  ;;  %v5866_v22 = vadd.f32 %v6302_v34, %v6080_v20 }
0x1a1e   : > { %5883 = vst.msk [vmem:[%s9107_s0 + $0x30] sm:$0xff] %vm453_vm0, %v5875_v43  ;;  %v5876_v44 = vadd.f32 %v5866_v22, %v8843_v21 }
0x1a20   : > { %5884 = vst.msk [vmem:[%s9107_s0 + $0x38] sm:$0xff] %vm453_vm0, %v5876_v44 }
0x1a21   : > { %7333 = shalt.err (!%p7330_p3)
}
0x1a22   : > { %s7334_s22 = scalar_lea.hbm %s9132_s21, 1024  ;;  %s7338_s16 = scalar_lea.hbm %s9198_s13, 2048 }
0x1a23   : > { %p7335_p4 = scmp.ne.s32.totalorder %s9132_s21, %s7334_s22  ;;  %p7339_p9 = scmp.lt.u32.totalorder %s9132_s21, %s9198_s13 }
0x1a24   : > { %p7340_p10 = scmp.lt.u32.totalorder %s7338_s16, %s7334_s22  ;;  %p7342_p12 = scmp.lt.u32.totalorder %s7334_s22, %s9132_s21 }
0x1a25   : > { %p7336_p7 = pnand %p7335_p4, %p7511_p5 }
0x1a26   : > { %p7341_p11 = por %p7340_p10, %p7339_p9 }
0x1a27   : > { %p7337_p8 = pneg %p7336_p7 }
0x1a28   : > { %p7343_p13 = por %p7342_p12, %p7341_p11 }
0x1a2a   : > { %p7344_p0 = pnand %p7343_p13, %p7337_p8 }
0x1a2c   : > { %7347 = shalt.err (!%p7344_p0)
}
0x1a2d   : > { %s7402_s20 = smov 128   ;;  %s9302_s23 = smov 8  }
0x1a2e   : > { %6751 = dma.vmem_to_hbm [thread:$0]  (%p7511_p5), %s9137_s24, 1024, %s9132_s21, %s9143_s29, %s7402_s20, %s7402_s20, %s9302_s23  }
0x1a2f PF: > { %p6757_p1 = scmp.ge.s32.totalorder %s7382_s28, 2  ;;  %s5914_s0 = sand.u32 1, %s7370_s25  }
0x1a30   : > { %s5915_s22 = scalar_lea.sflag [#allocation3], %s5914_s0 }
0x1a31   : > { %p6754_p2 = pnand %p6757_p1, %p7515_p6 }
0x1a33   : > { %7365 = dma.done.wait (!%p6754_p2), %s5915_s22, 1024  }
0x1a34   : > { %7367 = vsyncadd (!%p6754_p2), %s5915_s22, 4294966272  ;;  %p23_p3 = scmp.ge.s32.totalorder %s7498_s14, 4   ;;  %s9303_s25 = smov %s7374_s26 }
0x1a35   : > { %s9304_s26 = smov %s7378_s27  ;;  %s9305_s27 = smov %s7509_s17 }
0x1a36   : > { %s9306_s28 = smov %s7498_s14  ;;  %25 = sbr.rel (!%p23_p3) target bundleno = 6 (0x6), region = 107 }
0x1a3d   :  { %5920 = vsyncpa [#allocation3], 1 }
0x1a3e   :  { %5922 = vsyncpa [#allocation3 + $0x1], 1 }

</bundles_post_ra>
